<compile_context>
chip_gen: v7x
topology: tpu7x:2x2x1
jax: 0.10.0
libtpu: 0.0.40
codegen_flags: <defaults>
</compile_context>

<pallas_src>
import jax
import jax.numpy as jnp
from jax import lax
from jax.experimental import pallas as pl
from jax.experimental.pallas import tpu as pltpu

_VMEM = pl.BlockSpec(memory_space=pltpu.MemorySpace.VMEM)


# ----------------------------------------------------------------------------
# Fused forward pass (one pallas_call)
# ----------------------------------------------------------------------------
def textrcnn_forward(params, input_ids):
    """Fused TextRCNN forward. input_ids: (B, T) int32. Returns (B, C) float32."""
    B, T = input_ids.shape
    emb_table = params["embedding"]
    E = emb_table.shape[1]

    # Embedding lookup (data-dependent gather) stays as plain-JAX glue.
    # Gather directly in time-major order so the float data never needs a transpose.
    # TODO(synk): could be pulled in-kernel via SMEM ids + per-row VMEM loads; minor win.
    ids_tm = jnp.transpose(input_ids).reshape(-1)                 # (T*B,), row = t*B + b
    x_flat = jnp.take(emb_table, ids_tm, axis=0)                  # (T*B, E)

    assert len(params["lstm"]) == 2, "kernel is specialized for num_layers=2"
    (w_if1, w_hf1, b_f1, w_ir1, w_hr1, b_r1) = params["lstm"][0]
    (w_if2, w_hf2, b_f2, w_ir2, w_hr2, b_r2) = params["lstm"][1]
    H = w_hf1.shape[0]
    C = params["fc_w"].shape[1]
    G = 4 * H  # per-direction gate width

    # Fused per-layer input-projection weights / biases: [fwd 4H | rev 4H] on lanes.
    w_i1 = jnp.concatenate([w_if1, w_ir1], axis=1)                # (E,  8H)
    b1 = jnp.concatenate([b_f1, b_r1], axis=1)                    # (1,  8H)
    w_i2 = jnp.concatenate([w_if2, w_ir2], axis=1)                # (2H, 8H)
    b2 = jnp.concatenate([b_f2, b_r2], axis=1)                    # (1,  8H)

    # Split the classifier weight so the head never lane-concats embed & lstm out.
    fc_w = params["fc_w"]
    fc_we, fc_wf, fc_wr = fc_w[:E], fc_w[E:E + H], fc_w[E + H:]
    fc_b = params["fc_b"]

    # TODO(synk): inter-layer dropout (p=0.6) is train-only in PyTorch; inference semantics here.

    def kernel(x_ref, w_i1_ref, w_hf1_ref, w_hr1_ref, b1_ref,
               w_i2_ref, w_hf2_ref, w_hr2_ref, b2_ref,
               fc_we_ref, fc_wf_ref, fc_wr_ref, fc_b_ref,
               out_ref, l1_ref):
        f32 = jnp.float32

        def lstm_cell(gates, c_prev):
            # PyTorch gate order: i, f, g, o
            i = jax.nn.sigmoid(gates[:, 0 * H:1 * H])
            f = jax.nn.sigmoid(gates[:, 1 * H:2 * H])
            g = jnp.tanh(gates[:, 2 * H:3 * H])
            o = jax.nn.sigmoid(gates[:, 3 * H:4 * H])
            c_new = f * c_prev + i * g
            h_new = o * jnp.tanh(c_new)
            return h_new, c_new

        x = x_ref[...]                                            # (T*B, E)
        zeros = jnp.zeros((B, H), f32)

        # ---------------- layer 1 ----------------
        # Hoisted input projection: one matmul for all timesteps & both directions,
        # bias folded in once (no per-step bias broadcast).
        xp1 = (jnp.dot(x, w_i1_ref[...], preferred_element_type=f32)
               + b1_ref[...])                                     # (T*B, 8H)
        w_hf1 = w_hf1_ref[...]
        w_hr1 = w_hr1_ref[...]

        h_f, c_f, h_r, c_r = zeros, zeros, zeros, zeros
        for s in range(T):                                        # fully unrolled
            tf, tr = s, T - 1 - s
            gf = xp1[tf * B:(tf + 1) * B, :G] + jnp.dot(
                h_f, w_hf1, preferred_element_type=f32)
            gr = xp1[tr * B:(tr + 1) * B, G:] + jnp.dot(
                h_r, w_hr1, preferred_element_type=f32)
            h_f, c_f = lstm_cell(gf, c_f)
            h_r, c_r = lstm_cell(gr, c_r)
            l1_ref[tf * B:(tf + 1) * B, :H] = h_f                 # layer-2 input, fwd half
            l1_ref[tr * B:(tr + 1) * B, H:] = h_r                 # layer-2 input, rev half

        # ---------------- layer 2 ----------------
        xp2 = (jnp.dot(l1_ref[...], w_i2_ref[...], preferred_element_type=f32)
               + b2_ref[...])                                     # (T*B, 8H)
        w_hf2 = w_hf2_ref[...]
        w_hr2 = w_hr2_ref[...]

        h_f, c_f, h_r, c_r = zeros, zeros, zeros, zeros
        pooled_f = None
        pooled_r = None
        for s in range(T):
            tf, tr = s, T - 1 - s
            gf = xp2[tf * B:(tf + 1) * B, :G] + jnp.dot(
                h_f, w_hf2, preferred_element_type=f32)
            gr = xp2[tr * B:(tr + 1) * B, G:] + jnp.dot(
                h_r, w_hr2, preferred_element_type=f32)
            h_f, c_f = lstm_cell(gf, c_f)
            h_r, c_r = lstm_cell(gr, c_r)
            # max-over-time accumulated on the fly (order independent).
            pooled_f = h_f if pooled_f is None else jnp.maximum(pooled_f, h_f)
            pooled_r = h_r if pooled_r is None else jnp.maximum(pooled_r, h_r)

        # ---------------- head ----------------
        # relu(max_t(x)) == max_t(relu(x)); split matmul avoids the lane concat.
        pooled_e = x[0:B, :]
        for t in range(1, T):
            pooled_e = jnp.maximum(pooled_e, x[t * B:(t + 1) * B, :])
        pooled_e = jnp.maximum(pooled_e, 0.0)
        pooled_f = jnp.maximum(pooled_f, 0.0)
        pooled_r = jnp.maximum(pooled_r, 0.0)

        out_ref[...] = (
            jnp.dot(pooled_e, fc_we_ref[...], preferred_element_type=f32)
            + jnp.dot(pooled_f, fc_wf_ref[...], preferred_element_type=f32)
            + jnp.dot(pooled_r, fc_wr_ref[...], preferred_element_type=f32)
            + fc_b_ref[...])

    return pl.pallas_call(
        kernel,
        out_shape=jax.ShapeDtypeStruct((B, C), jnp.float32),
        in_specs=[_VMEM] * 13,
        out_specs=_VMEM,
        scratch_shapes=[pltpu.VMEM((T * B, 2 * H), jnp.float32)],
    )(x_flat, w_i1, w_hf1, w_hr1, b1, w_i2, w_hf2, w_hr2, b2,
      fc_we, fc_wf, fc_wr, fc_b)


# ----------------------------------------------------------------------------
# Pure-JAX reference (same math, no Pallas) for a correctness check
# ----------------------------------------------------------------------------
def _ref_forward(params, input_ids):
    embed = jnp.take(params["embedding"], input_ids, axis=0)  # (B, T, E)
    B, T, _ = embed.shape

    def run_dir(x_bt, w_i, w_h, b, reverse):
        H = w_h.shape[0]
        xs = jnp.transpose(x_bt, (1, 0, 2))
        if reverse:
            xs = xs[::-1]

        def step(carry, x_t):
            h, c = carry
            g = x_t @ w_i + h @ w_h + b
            i = jax.nn.sigmoid(g[:, :H])
            f = jax.nn.sigmoid(g[:, H:2 * H])
            gg = jnp.tanh(g[:, 2 * H:3 * H])
            o = jax.nn.sigmoid(g[:, 3 * H:])
            c = f * c + i * gg
            h = o * jnp.tanh(c)
            return (h, c), h

        h0 = jnp.zeros((B, H), jnp.float32)
        _, hs = lax.scan(step, (h0, h0), xs)
        if reverse:
            hs = hs[::-1]
        return jnp.transpose(hs, (1, 0, 2))  # (B, T, H)

    x = embed
    for (w_if, w_hf, b_f, w_ir, w_hr, b_r) in params["lstm"]:
        of = run_dir(x, w_if, w_hf, b_f, reverse=False)
        orr = run_dir(x, w_ir, w_hr, b_r, reverse=True)
        x = jnp.concatenate([of, orr], axis=-1)

    feat = jnp.maximum(jnp.concatenate([embed, x], axis=-1), 0.0)
    pooled = jnp.max(feat, axis=1)
    return pooled @ params["fc_w"] + params["fc_b"]


# ----------------------------------------------------------------------------
# Deterministic parameter init (shapes per the PyTorch module, scaled down)
# ----------------------------------------------------------------------------
def init_params(key, vocab_size, embed_dim, hidden, num_layers, num_classes):
    keys = iter(jax.random.split(key, 64))
    k = 1.0 / jnp.sqrt(hidden)

    params = {}
    params["embedding"] = jax.random.normal(next(keys), (vocab_size, embed_dim),
                                            jnp.float32)

    lstm_layers = []
    in_dim = embed_dim
    for _ in range(num_layers):
        layer = []
        for _direction in range(2):
            w_i = jax.random.uniform(next(keys), (in_dim, 4 * hidden),
                                     jnp.float32, -k, k)
            w_h = jax.random.uniform(next(keys), (hidden, 4 * hidden),
                                     jnp.float32, -k, k)
            b = jax.random.uniform(next(keys), (1, 4 * hidden),
                                   jnp.float32, -k, k) \
                + jax.random.uniform(next(keys), (1, 4 * hidden),
                                     jnp.float32, -k, k)   # b_ih + b_hh
            layer += [w_i, w_h, b]
        lstm_layers.append(tuple(layer))
        in_dim = 2 * hidden
    params["lstm"] = lstm_layers

    fc_in = 2 * hidden + embed_dim
    kf = 1.0 / jnp.sqrt(fc_in)
    params["fc_w"] = jax.random.uniform(next(keys), (fc_in, num_classes),
                                        jnp.float32, -kf, kf)
    params["fc_b"] = jax.random.uniform(next(keys), (1, num_classes),
                                        jnp.float32, -kf, kf)
    return params


if __name__ == "__main__":
    VOCAB, EMBED, HIDDEN, LAYERS, CLASSES = 50, 32, 32, 2, 4
    B, T = 2, 8

    key = jax.random.PRNGKey(0)
    k_params, k_ids = jax.random.split(key)
    params = init_params(k_params, VOCAB, EMBED, HIDDEN, LAYERS, CLASSES)
    input_ids = jax.random.randint(k_ids, (B, T), 0, VOCAB, dtype=jnp.int32)

    logits = jax.block_until_ready(textrcnn_forward(params, input_ids))
    assert logits.shape == (B, CLASSES) and logits.dtype == jnp.float32

    ref = jax.block_until_ready(_ref_forward(params, input_ids))
    assert jnp.allclose(logits, ref, atol=2e-4, rtol=2e-4), (logits, ref)

    print("KERNEL_OK")
</pallas_src>

<mosaic_0001>
module attributes {stable_mosaic.version = 11 : i64} {
  func.func @kernel(%arg0: memref<16x32xf32, #tpu.memory_space<vmem>>, %arg1: memref<32x256xf32, #tpu.memory_space<vmem>>, %arg2: memref<32x128xf32, #tpu.memory_space<vmem>>, %arg3: memref<32x128xf32, #tpu.memory_space<vmem>>, %arg4: memref<1x256xf32, #tpu.memory_space<vmem>>, %arg5: memref<64x256xf32, #tpu.memory_space<vmem>>, %arg6: memref<32x128xf32, #tpu.memory_space<vmem>>, %arg7: memref<32x128xf32, #tpu.memory_space<vmem>>, %arg8: memref<1x256xf32, #tpu.memory_space<vmem>>, %arg9: memref<32x4xf32, #tpu.memory_space<vmem>>, %arg10: memref<32x4xf32, #tpu.memory_space<vmem>>, %arg11: memref<32x4xf32, #tpu.memory_space<vmem>>, %arg12: memref<1x4xf32, #tpu.memory_space<vmem>>, %arg13: memref<2x4xf32, #tpu.memory_space<vmem>>, %arg14: memref<16x64xf32, #tpu.memory_space<vmem>>) attributes {dimension_semantics = [], scalar_prefetch = 0 : i64, scratch_operands = 1 : i64, tpu.core_type = #tpu.core_type<tc>} {
    %c0 = arith.constant 0 : index
    %c0_0 = arith.constant 0 : index
    %0 = vector.load %arg0[%c0, %c0_0] : memref<16x32xf32, #tpu.memory_space<vmem>>, vector<16x32xf32>
    %cst = arith.constant 0.000000e+00 : f32
    %1 = vector.broadcast %cst : f32 to vector<2x32xf32>
    %c0_1 = arith.constant 0 : index
    %c0_2 = arith.constant 0 : index
    %2 = vector.load %arg1[%c0_1, %c0_2] : memref<32x256xf32, #tpu.memory_space<vmem>>, vector<32x256xf32>
    %cst_3 = arith.constant dense<0.000000e+00> : vector<16x256xf32>
    %3 = tpu.matmul %0, %2, %cst_3 {dimension_numbers = #tpu.dot_dimension_numbers<[1], [0], [0], [1], [0, 0, 1, 1], [], []>} : vector<16x32xf32>, vector<32x256xf32>, vector<16x256xf32> -> vector<16x256xf32>
    %c0_4 = arith.constant 0 : index
    %c0_5 = arith.constant 0 : index
    %4 = vector.load %arg4[%c0_4, %c0_5] : memref<1x256xf32, #tpu.memory_space<vmem>>, vector<1x256xf32>
    %5 = vector.broadcast %4 : vector<1x256xf32> to vector<16x256xf32>
    %6 = arith.addf %3, %5 : vector<16x256xf32>
    %c0_6 = arith.constant 0 : index
    %c0_7 = arith.constant 0 : index
    %7 = vector.load %arg2[%c0_6, %c0_7] : memref<32x128xf32, #tpu.memory_space<vmem>>, vector<32x128xf32>
    %c0_8 = arith.constant 0 : index
    %c0_9 = arith.constant 0 : index
    %8 = vector.load %arg3[%c0_8, %c0_9] : memref<32x128xf32, #tpu.memory_space<vmem>>, vector<32x128xf32>
    %9 = vector.extract_strided_slice %6 {offsets = [0, 0], sizes = [2, 128], strides = [1, 1]} : vector<16x256xf32> to vector<2x128xf32>
    %cst_10 = arith.constant dense<0.000000e+00> : vector<2x128xf32>
    %10 = tpu.matmul %1, %7, %cst_10 {dimension_numbers = #tpu.dot_dimension_numbers<[1], [0], [0], [1], [0, 0, 1, 1], [], []>} : vector<2x32xf32>, vector<32x128xf32>, vector<2x128xf32> -> vector<2x128xf32>
    %11 = arith.addf %9, %10 : vector<2x128xf32>
    %12 = vector.extract_strided_slice %6 {offsets = [14, 128], sizes = [2, 128], strides = [1, 1]} : vector<16x256xf32> to vector<2x128xf32>
    %cst_11 = arith.constant dense<0.000000e+00> : vector<2x128xf32>
    %13 = tpu.matmul %1, %8, %cst_11 {dimension_numbers = #tpu.dot_dimension_numbers<[1], [0], [0], [1], [0, 0, 1, 1], [], []>} : vector<2x32xf32>, vector<32x128xf32>, vector<2x128xf32> -> vector<2x128xf32>
    %14 = arith.addf %12, %13 : vector<2x128xf32>
    %15 = vector.extract_strided_slice %11 {offsets = [0, 0], sizes = [2, 32], strides = [1, 1]} : vector<2x128xf32> to vector<2x32xf32>
    %16 = arith.negf %15 : vector<2x32xf32>
    %17 = math.exp %16 : vector<2x32xf32>
    %cst_12 = arith.constant 1.000000e+00 : f32
    %18 = vector.broadcast %cst_12 : f32 to vector<2x32xf32>
    %19 = arith.addf %18, %17 : vector<2x32xf32>
    %20 = arith.divf %18, %19 : vector<2x32xf32>
    %21 = vector.extract_strided_slice %11 {offsets = [0, 32], sizes = [2, 32], strides = [1, 1]} : vector<2x128xf32> to vector<2x32xf32>
    %22 = arith.negf %21 : vector<2x32xf32>
    %23 = math.exp %22 : vector<2x32xf32>
    %cst_13 = arith.constant 1.000000e+00 : f32
    %24 = vector.broadcast %cst_13 : f32 to vector<2x32xf32>
    %25 = arith.addf %24, %23 : vector<2x32xf32>
    %26 = arith.divf %24, %25 : vector<2x32xf32>
    %27 = vector.extract_strided_slice %11 {offsets = [0, 64], sizes = [2, 32], strides = [1, 1]} : vector<2x128xf32> to vector<2x32xf32>
    %28 = math.tanh %27 : vector<2x32xf32>
    %29 = vector.extract_strided_slice %11 {offsets = [0, 96], sizes = [2, 32], strides = [1, 1]} : vector<2x128xf32> to vector<2x32xf32>
    %30 = arith.negf %29 : vector<2x32xf32>
    %31 = math.exp %30 : vector<2x32xf32>
    %cst_14 = arith.constant 1.000000e+00 : f32
    %32 = vector.broadcast %cst_14 : f32 to vector<2x32xf32>
    %33 = arith.addf %32, %31 : vector<2x32xf32>
    %34 = arith.divf %32, %33 : vector<2x32xf32>
    %35 = arith.mulf %26, %1 : vector<2x32xf32>
    %36 = arith.mulf %20, %28 : vector<2x32xf32>
    %37 = arith.addf %35, %36 : vector<2x32xf32>
    %38 = math.tanh %37 : vector<2x32xf32>
    %39 = arith.mulf %34, %38 : vector<2x32xf32>
    %40 = vector.extract_strided_slice %14 {offsets = [0, 0], sizes = [2, 32], strides = [1, 1]} : vector<2x128xf32> to vector<2x32xf32>
    %41 = arith.negf %40 : vector<2x32xf32>
    %42 = math.exp %41 : vector<2x32xf32>
    %cst_15 = arith.constant 1.000000e+00 : f32
    %43 = vector.broadcast %cst_15 : f32 to vector<2x32xf32>
    %44 = arith.addf %43, %42 : vector<2x32xf32>
    %45 = arith.divf %43, %44 : vector<2x32xf32>
    %46 = vector.extract_strided_slice %14 {offsets = [0, 32], sizes = [2, 32], strides = [1, 1]} : vector<2x128xf32> to vector<2x32xf32>
    %47 = arith.negf %46 : vector<2x32xf32>
    %48 = math.exp %47 : vector<2x32xf32>
    %cst_16 = arith.constant 1.000000e+00 : f32
    %49 = vector.broadcast %cst_16 : f32 to vector<2x32xf32>
    %50 = arith.addf %49, %48 : vector<2x32xf32>
    %51 = arith.divf %49, %50 : vector<2x32xf32>
    %52 = vector.extract_strided_slice %14 {offsets = [0, 64], sizes = [2, 32], strides = [1, 1]} : vector<2x128xf32> to vector<2x32xf32>
    %53 = math.tanh %52 : vector<2x32xf32>
    %54 = vector.extract_strided_slice %14 {offsets = [0, 96], sizes = [2, 32], strides = [1, 1]} : vector<2x128xf32> to vector<2x32xf32>
    %55 = arith.negf %54 : vector<2x32xf32>
    %56 = math.exp %55 : vector<2x32xf32>
    %cst_17 = arith.constant 1.000000e+00 : f32
    %57 = vector.broadcast %cst_17 : f32 to vector<2x32xf32>
    %58 = arith.addf %57, %56 : vector<2x32xf32>
    %59 = arith.divf %57, %58 : vector<2x32xf32>
    %60 = arith.mulf %51, %1 : vector<2x32xf32>
    %61 = arith.mulf %45, %53 : vector<2x32xf32>
    %62 = arith.addf %60, %61 : vector<2x32xf32>
    %63 = math.tanh %62 : vector<2x32xf32>
    %64 = arith.mulf %59, %63 : vector<2x32xf32>
    %c0_18 = arith.constant 0 : index
    %c0_19 = arith.constant 0 : index
    %65 = vector.load %arg14[%c0_18, %c0_19] : memref<16x64xf32, #tpu.memory_space<vmem>>, vector<2x32xf32>
    tpu.vector_store %arg14[%c0_18, %c0_19], %39 {strides = array<i32>} : memref<16x64xf32, #tpu.memory_space<vmem>>, vector<2x32xf32>,
    %c14 = arith.constant 14 : index
    %c32 = arith.constant 32 : index
    %66 = vector.load %arg14[%c14, %c32] : memref<16x64xf32, #tpu.memory_space<vmem>>, vector<2x32xf32>
    tpu.vector_store %arg14[%c14, %c32], %64 {strides = array<i32>} : memref<16x64xf32, #tpu.memory_space<vmem>>, vector<2x32xf32>,
    %67 = vector.extract_strided_slice %6 {offsets = [2, 0], sizes = [2, 128], strides = [1, 1]} : vector<16x256xf32> to vector<2x128xf32>
    %cst_20 = arith.constant dense<0.000000e+00> : vector<2x128xf32>
    %68 = tpu.matmul %39, %7, %cst_20 {dimension_numbers = #tpu.dot_dimension_numbers<[1], [0], [0], [1], [0, 0, 1, 1], [], []>} : vector<2x32xf32>, vector<32x128xf32>, vector<2x128xf32> -> vector<2x128xf32>
    %69 = arith.addf %67, %68 : vector<2x128xf32>
    %70 = vector.extract_strided_slice %6 {offsets = [12, 128], sizes = [2, 128], strides = [1, 1]} : vector<16x256xf32> to vector<2x128xf32>
    %cst_21 = arith.constant dense<0.000000e+00> : vector<2x128xf32>
    %71 = tpu.matmul %64, %8, %cst_21 {dimension_numbers = #tpu.dot_dimension_numbers<[1], [0], [0], [1], [0, 0, 1, 1], [], []>} : vector<2x32xf32>, vector<32x128xf32>, vector<2x128xf32> -> vector<2x128xf32>
    %72 = arith.addf %70, %71 : vector<2x128xf32>
    %73 = vector.extract_strided_slice %69 {offsets = [0, 0], sizes = [2, 32], strides = [1, 1]} : vector<2x128xf32> to vector<2x32xf32>
    %74 = arith.negf %73 : vector<2x32xf32>
    %75 = math.exp %74 : vector<2x32xf32>
    %cst_22 = arith.constant 1.000000e+00 : f32
    %76 = vector.broadcast %cst_22 : f32 to vector<2x32xf32>
    %77 = arith.addf %76, %75 : vector<2x32xf32>
    %78 = arith.divf %76, %77 : vector<2x32xf32>
    %79 = vector.extract_strided_slice %69 {offsets = [0, 32], sizes = [2, 32], strides = [1, 1]} : vector<2x128xf32> to vector<2x32xf32>
    %80 = arith.negf %79 : vector<2x32xf32>
    %81 = math.exp %80 : vector<2x32xf32>
    %cst_23 = arith.constant 1.000000e+00 : f32
    %82 = vector.broadcast %cst_23 : f32 to vector<2x32xf32>
    %83 = arith.addf %82, %81 : vector<2x32xf32>
    %84 = arith.divf %82, %83 : vector<2x32xf32>
    %85 = vector.extract_strided_slice %69 {offsets = [0, 64], sizes = [2, 32], strides = [1, 1]} : vector<2x128xf32> to vector<2x32xf32>
    %86 = math.tanh %85 : vector<2x32xf32>
    %87 = vector.extract_strided_slice %69 {offsets = [0, 96], sizes = [2, 32], strides = [1, 1]} : vector<2x128xf32> to vector<2x32xf32>
    %88 = arith.negf %87 : vector<2x32xf32>
    %89 = math.exp %88 : vector<2x32xf32>
    %cst_24 = arith.constant 1.000000e+00 : f32
    %90 = vector.broadcast %cst_24 : f32 to vector<2x32xf32>
    %91 = arith.addf %90, %89 : vector<2x32xf32>
    %92 = arith.divf %90, %91 : vector<2x32xf32>
    %93 = arith.mulf %84, %37 : vector<2x32xf32>
    %94 = arith.mulf %78, %86 : vector<2x32xf32>
    %95 = arith.addf %93, %94 : vector<2x32xf32>
    %96 = math.tanh %95 : vector<2x32xf32>
    %97 = arith.mulf %92, %96 : vector<2x32xf32>
    %98 = vector.extract_strided_slice %72 {offsets = [0, 0], sizes = [2, 32], strides = [1, 1]} : vector<2x128xf32> to vector<2x32xf32>
    %99 = arith.negf %98 : vector<2x32xf32>
    %100 = math.exp %99 : vector<2x32xf32>
    %cst_25 = arith.constant 1.000000e+00 : f32
    %101 = vector.broadcast %cst_25 : f32 to vector<2x32xf32>
    %102 = arith.addf %101, %100 : vector<2x32xf32>
    %103 = arith.divf %101, %102 : vector<2x32xf32>
    %104 = vector.extract_strided_slice %72 {offsets = [0, 32], sizes = [2, 32], strides = [1, 1]} : vector<2x128xf32> to vector<2x32xf32>
    %105 = arith.negf %104 : vector<2x32xf32>
    %106 = math.exp %105 : vector<2x32xf32>
    %cst_26 = arith.constant 1.000000e+00 : f32
    %107 = vector.broadcast %cst_26 : f32 to vector<2x32xf32>
    %108 = arith.addf %107, %106 : vector<2x32xf32>
    %109 = arith.divf %107, %108 : vector<2x32xf32>
    %110 = vector.extract_strided_slice %72 {offsets = [0, 64], sizes = [2, 32], strides = [1, 1]} : vector<2x128xf32> to vector<2x32xf32>
    %111 = math.tanh %110 : vector<2x32xf32>
    %112 = vector.extract_strided_slice %72 {offsets = [0, 96], sizes = [2, 32], strides = [1, 1]} : vector<2x128xf32> to vector<2x32xf32>
    %113 = arith.negf %112 : vector<2x32xf32>
    %114 = math.exp %113 : vector<2x32xf32>
    %cst_27 = arith.constant 1.000000e+00 : f32
    %115 = vector.broadcast %cst_27 : f32 to vector<2x32xf32>
    %116 = arith.addf %115, %114 : vector<2x32xf32>
    %117 = arith.divf %115, %116 : vector<2x32xf32>
    %118 = arith.mulf %109, %62 : vector<2x32xf32>
    %119 = arith.mulf %103, %111 : vector<2x32xf32>
    %120 = arith.addf %118, %119 : vector<2x32xf32>
    %121 = math.tanh %120 : vector<2x32xf32>
    %122 = arith.mulf %117, %121 : vector<2x32xf32>
    %c2 = arith.constant 2 : index
    %c0_28 = arith.constant 0 : index
    %123 = vector.load %arg14[%c2, %c0_28] : memref<16x64xf32, #tpu.memory_space<vmem>>, vector<2x32xf32>
    tpu.vector_store %arg14[%c2, %c0_28], %97 {strides = array<i32>} : memref<16x64xf32, #tpu.memory_space<vmem>>, vector<2x32xf32>,
    %c12 = arith.constant 12 : index
    %c32_29 = arith.constant 32 : index
    %124 = vector.load %arg14[%c12, %c32_29] : memref<16x64xf32, #tpu.memory_space<vmem>>, vector<2x32xf32>
    tpu.vector_store %arg14[%c12, %c32_29], %122 {strides = array<i32>} : memref<16x64xf32, #tpu.memory_space<vmem>>, vector<2x32xf32>,
    %125 = vector.extract_strided_slice %6 {offsets = [4, 0], sizes = [2, 128], strides = [1, 1]} : vector<16x256xf32> to vector<2x128xf32>
    %cst_30 = arith.constant dense<0.000000e+00> : vector<2x128xf32>
    %126 = tpu.matmul %97, %7, %cst_30 {dimension_numbers = #tpu.dot_dimension_numbers<[1], [0], [0], [1], [0, 0, 1, 1], [], []>} : vector<2x32xf32>, vector<32x128xf32>, vector<2x128xf32> -> vector<2x128xf32>
    %127 = arith.addf %125, %126 : vector<2x128xf32>
    %128 = vector.extract_strided_slice %6 {offsets = [10, 128], sizes = [2, 128], strides = [1, 1]} : vector<16x256xf32> to vector<2x128xf32>
    %cst_31 = arith.constant dense<0.000000e+00> : vector<2x128xf32>
    %129 = tpu.matmul %122, %8, %cst_31 {dimension_numbers = #tpu.dot_dimension_numbers<[1], [0], [0], [1], [0, 0, 1, 1], [], []>} : vector<2x32xf32>, vector<32x128xf32>, vector<2x128xf32> -> vector<2x128xf32>
    %130 = arith.addf %128, %129 : vector<2x128xf32>
    %131 = vector.extract_strided_slice %127 {offsets = [0, 0], sizes = [2, 32], strides = [1, 1]} : vector<2x128xf32> to vector<2x32xf32>
    %132 = arith.negf %131 : vector<2x32xf32>
    %133 = math.exp %132 : vector<2x32xf32>
    %cst_32 = arith.constant 1.000000e+00 : f32
    %134 = vector.broadcast %cst_32 : f32 to vector<2x32xf32>
    %135 = arith.addf %134, %133 : vector<2x32xf32>
    %136 = arith.divf %134, %135 : vector<2x32xf32>
    %137 = vector.extract_strided_slice %127 {offsets = [0, 32], sizes = [2, 32], strides = [1, 1]} : vector<2x128xf32> to vector<2x32xf32>
    %138 = arith.negf %137 : vector<2x32xf32>
    %139 = math.exp %138 : vector<2x32xf32>
    %cst_33 = arith.constant 1.000000e+00 : f32
    %140 = vector.broadcast %cst_33 : f32 to vector<2x32xf32>
    %141 = arith.addf %140, %139 : vector<2x32xf32>
    %142 = arith.divf %140, %141 : vector<2x32xf32>
    %143 = vector.extract_strided_slice %127 {offsets = [0, 64], sizes = [2, 32], strides = [1, 1]} : vector<2x128xf32> to vector<2x32xf32>
    %144 = math.tanh %143 : vector<2x32xf32>
    %145 = vector.extract_strided_slice %127 {offsets = [0, 96], sizes = [2, 32], strides = [1, 1]} : vector<2x128xf32> to vector<2x32xf32>
    %146 = arith.negf %145 : vector<2x32xf32>
    %147 = math.exp %146 : vector<2x32xf32>
    %cst_34 = arith.constant 1.000000e+00 : f32
    %148 = vector.broadcast %cst_34 : f32 to vector<2x32xf32>
    %149 = arith.addf %148, %147 : vector<2x32xf32>
    %150 = arith.divf %148, %149 : vector<2x32xf32>
    %151 = arith.mulf %142, %95 : vector<2x32xf32>
    %152 = arith.mulf %136, %144 : vector<2x32xf32>
    %153 = arith.addf %151, %152 : vector<2x32xf32>
    %154 = math.tanh %153 : vector<2x32xf32>
    %155 = arith.mulf %150, %154 : vector<2x32xf32>
    %156 = vector.extract_strided_slice %130 {offsets = [0, 0], sizes = [2, 32], strides = [1, 1]} : vector<2x128xf32> to vector<2x32xf32>
    %157 = arith.negf %156 : vector<2x32xf32>
    %158 = math.exp %157 : vector<2x32xf32>
    %cst_35 = arith.constant 1.000000e+00 : f32
    %159 = vector.broadcast %cst_35 : f32 to vector<2x32xf32>
    %160 = arith.addf %159, %158 : vector<2x32xf32>
    %161 = arith.divf %159, %160 : vector<2x32xf32>
    %162 = vector.extract_strided_slice %130 {offsets = [0, 32], sizes = [2, 32], strides = [1, 1]} : vector<2x128xf32> to vector<2x32xf32>
    %163 = arith.negf %162 : vector<2x32xf32>
    %164 = math.exp %163 : vector<2x32xf32>
    %cst_36 = arith.constant 1.000000e+00 : f32
    %165 = vector.broadcast %cst_36 : f32 to vector<2x32xf32>
    %166 = arith.addf %165, %164 : vector<2x32xf32>
    %167 = arith.divf %165, %166 : vector<2x32xf32>
    %168 = vector.extract_strided_slice %130 {offsets = [0, 64], sizes = [2, 32], strides = [1, 1]} : vector<2x128xf32> to vector<2x32xf32>
    %169 = math.tanh %168 : vector<2x32xf32>
    %170 = vector.extract_strided_slice %130 {offsets = [0, 96], sizes = [2, 32], strides = [1, 1]} : vector<2x128xf32> to vector<2x32xf32>
    %171 = arith.negf %170 : vector<2x32xf32>
    %172 = math.exp %171 : vector<2x32xf32>
    %cst_37 = arith.constant 1.000000e+00 : f32
    %173 = vector.broadcast %cst_37 : f32 to vector<2x32xf32>
    %174 = arith.addf %173, %172 : vector<2x32xf32>
    %175 = arith.divf %173, %174 : vector<2x32xf32>
    %176 = arith.mulf %167, %120 : vector<2x32xf32>
    %177 = arith.mulf %161, %169 : vector<2x32xf32>
    %178 = arith.addf %176, %177 : vector<2x32xf32>
    %179 = math.tanh %178 : vector<2x32xf32>
    %180 = arith.mulf %175, %179 : vector<2x32xf32>
    %c4 = arith.constant 4 : index
    %c0_38 = arith.constant 0 : index
    %181 = vector.load %arg14[%c4, %c0_38] : memref<16x64xf32, #tpu.memory_space<vmem>>, vector<2x32xf32>
    tpu.vector_store %arg14[%c4, %c0_38], %155 {strides = array<i32>} : memref<16x64xf32, #tpu.memory_space<vmem>>, vector<2x32xf32>,
    %c10 = arith.constant 10 : index
    %c32_39 = arith.constant 32 : index
    %182 = vector.load %arg14[%c10, %c32_39] : memref<16x64xf32, #tpu.memory_space<vmem>>, vector<2x32xf32>
    tpu.vector_store %arg14[%c10, %c32_39], %180 {strides = array<i32>} : memref<16x64xf32, #tpu.memory_space<vmem>>, vector<2x32xf32>,
    %183 = vector.extract_strided_slice %6 {offsets = [6, 0], sizes = [2, 128], strides = [1, 1]} : vector<16x256xf32> to vector<2x128xf32>
    %cst_40 = arith.constant dense<0.000000e+00> : vector<2x128xf32>
    %184 = tpu.matmul %155, %7, %cst_40 {dimension_numbers = #tpu.dot_dimension_numbers<[1], [0], [0], [1], [0, 0, 1, 1], [], []>} : vector<2x32xf32>, vector<32x128xf32>, vector<2x128xf32> -> vector<2x128xf32>
    %185 = arith.addf %183, %184 : vector<2x128xf32>
    %186 = vector.extract_strided_slice %6 {offsets = [8, 128], sizes = [2, 128], strides = [1, 1]} : vector<16x256xf32> to vector<2x128xf32>
    %cst_41 = arith.constant dense<0.000000e+00> : vector<2x128xf32>
    %187 = tpu.matmul %180, %8, %cst_41 {dimension_numbers = #tpu.dot_dimension_numbers<[1], [0], [0], [1], [0, 0, 1, 1], [], []>} : vector<2x32xf32>, vector<32x128xf32>, vector<2x128xf32> -> vector<2x128xf32>
    %188 = arith.addf %186, %187 : vector<2x128xf32>
    %189 = vector.extract_strided_slice %185 {offsets = [0, 0], sizes = [2, 32], strides = [1, 1]} : vector<2x128xf32> to vector<2x32xf32>
    %190 = arith.negf %189 : vector<2x32xf32>
    %191 = math.exp %190 : vector<2x32xf32>
    %cst_42 = arith.constant 1.000000e+00 : f32
    %192 = vector.broadcast %cst_42 : f32 to vector<2x32xf32>
    %193 = arith.addf %192, %191 : vector<2x32xf32>
    %194 = arith.divf %192, %193 : vector<2x32xf32>
    %195 = vector.extract_strided_slice %185 {offsets = [0, 32], sizes = [2, 32], strides = [1, 1]} : vector<2x128xf32> to vector<2x32xf32>
    %196 = arith.negf %195 : vector<2x32xf32>
    %197 = math.exp %196 : vector<2x32xf32>
    %cst_43 = arith.constant 1.000000e+00 : f32
    %198 = vector.broadcast %cst_43 : f32 to vector<2x32xf32>
    %199 = arith.addf %198, %197 : vector<2x32xf32>
    %200 = arith.divf %198, %199 : vector<2x32xf32>
    %201 = vector.extract_strided_slice %185 {offsets = [0, 64], sizes = [2, 32], strides = [1, 1]} : vector<2x128xf32> to vector<2x32xf32>
    %202 = math.tanh %201 : vector<2x32xf32>
    %203 = vector.extract_strided_slice %185 {offsets = [0, 96], sizes = [2, 32], strides = [1, 1]} : vector<2x128xf32> to vector<2x32xf32>
    %204 = arith.negf %203 : vector<2x32xf32>
    %205 = math.exp %204 : vector<2x32xf32>
    %cst_44 = arith.constant 1.000000e+00 : f32
    %206 = vector.broadcast %cst_44 : f32 to vector<2x32xf32>
    %207 = arith.addf %206, %205 : vector<2x32xf32>
    %208 = arith.divf %206, %207 : vector<2x32xf32>
    %209 = arith.mulf %200, %153 : vector<2x32xf32>
    %210 = arith.mulf %194, %202 : vector<2x32xf32>
    %211 = arith.addf %209, %210 : vector<2x32xf32>
    %212 = math.tanh %211 : vector<2x32xf32>
    %213 = arith.mulf %208, %212 : vector<2x32xf32>
    %214 = vector.extract_strided_slice %188 {offsets = [0, 0], sizes = [2, 32], strides = [1, 1]} : vector<2x128xf32> to vector<2x32xf32>
    %215 = arith.negf %214 : vector<2x32xf32>
    %216 = math.exp %215 : vector<2x32xf32>
    %cst_45 = arith.constant 1.000000e+00 : f32
    %217 = vector.broadcast %cst_45 : f32 to vector<2x32xf32>
    %218 = arith.addf %217, %216 : vector<2x32xf32>
    %219 = arith.divf %217, %218 : vector<2x32xf32>
    %220 = vector.extract_strided_slice %188 {offsets = [0, 32], sizes = [2, 32], strides = [1, 1]} : vector<2x128xf32> to vector<2x32xf32>
    %221 = arith.negf %220 : vector<2x32xf32>
    %222 = math.exp %221 : vector<2x32xf32>
    %cst_46 = arith.constant 1.000000e+00 : f32
    %223 = vector.broadcast %cst_46 : f32 to vector<2x32xf32>
    %224 = arith.addf %223, %222 : vector<2x32xf32>
    %225 = arith.divf %223, %224 : vector<2x32xf32>
    %226 = vector.extract_strided_slice %188 {offsets = [0, 64], sizes = [2, 32], strides = [1, 1]} : vector<2x128xf32> to vector<2x32xf32>
    %227 = math.tanh %226 : vector<2x32xf32>
    %228 = vector.extract_strided_slice %188 {offsets = [0, 96], sizes = [2, 32], strides = [1, 1]} : vector<2x128xf32> to vector<2x32xf32>
    %229 = arith.negf %228 : vector<2x32xf32>
    %230 = math.exp %229 : vector<2x32xf32>
    %cst_47 = arith.constant 1.000000e+00 : f32
    %231 = vector.broadcast %cst_47 : f32 to vector<2x32xf32>
    %232 = arith.addf %231, %230 : vector<2x32xf32>
    %233 = arith.divf %231, %232 : vector<2x32xf32>
    %234 = arith.mulf %225, %178 : vector<2x32xf32>
    %235 = arith.mulf %219, %227 : vector<2x32xf32>
    %236 = arith.addf %234, %235 : vector<2x32xf32>
    %237 = math.tanh %236 : vector<2x32xf32>
    %238 = arith.mulf %233, %237 : vector<2x32xf32>
    %c6 = arith.constant 6 : index
    %c0_48 = arith.constant 0 : index
    %239 = vector.load %arg14[%c6, %c0_48] : memref<16x64xf32, #tpu.memory_space<vmem>>, vector<2x32xf32>
    tpu.vector_store %arg14[%c6, %c0_48], %213 {strides = array<i32>} : memref<16x64xf32, #tpu.memory_space<vmem>>, vector<2x32xf32>,
    %c8 = arith.constant 8 : index
    %c32_49 = arith.constant 32 : index
    %240 = vector.load %arg14[%c8, %c32_49] : memref<16x64xf32, #tpu.memory_space<vmem>>, vector<2x32xf32>
    tpu.vector_store %arg14[%c8, %c32_49], %238 {strides = array<i32>} : memref<16x64xf32, #tpu.memory_space<vmem>>, vector<2x32xf32>,
    %241 = vector.extract_strided_slice %6 {offsets = [8, 0], sizes = [2, 128], strides = [1, 1]} : vector<16x256xf32> to vector<2x128xf32>
    %cst_50 = arith.constant dense<0.000000e+00> : vector<2x128xf32>
    %242 = tpu.matmul %213, %7, %cst_50 {dimension_numbers = #tpu.dot_dimension_numbers<[1], [0], [0], [1], [0, 0, 1, 1], [], []>} : vector<2x32xf32>, vector<32x128xf32>, vector<2x128xf32> -> vector<2x128xf32>
    %243 = arith.addf %241, %242 : vector<2x128xf32>
    %244 = vector.extract_strided_slice %6 {offsets = [6, 128], sizes = [2, 128], strides = [1, 1]} : vector<16x256xf32> to vector<2x128xf32>
    %cst_51 = arith.constant dense<0.000000e+00> : vector<2x128xf32>
    %245 = tpu.matmul %238, %8, %cst_51 {dimension_numbers = #tpu.dot_dimension_numbers<[1], [0], [0], [1], [0, 0, 1, 1], [], []>} : vector<2x32xf32>, vector<32x128xf32>, vector<2x128xf32> -> vector<2x128xf32>
    %246 = arith.addf %244, %245 : vector<2x128xf32>
    %247 = vector.extract_strided_slice %243 {offsets = [0, 0], sizes = [2, 32], strides = [1, 1]} : vector<2x128xf32> to vector<2x32xf32>
    %248 = arith.negf %247 : vector<2x32xf32>
    %249 = math.exp %248 : vector<2x32xf32>
    %cst_52 = arith.constant 1.000000e+00 : f32
    %250 = vector.broadcast %cst_52 : f32 to vector<2x32xf32>
    %251 = arith.addf %250, %249 : vector<2x32xf32>
    %252 = arith.divf %250, %251 : vector<2x32xf32>
    %253 = vector.extract_strided_slice %243 {offsets = [0, 32], sizes = [2, 32], strides = [1, 1]} : vector<2x128xf32> to vector<2x32xf32>
    %254 = arith.negf %253 : vector<2x32xf32>
    %255 = math.exp %254 : vector<2x32xf32>
    %cst_53 = arith.constant 1.000000e+00 : f32
    %256 = vector.broadcast %cst_53 : f32 to vector<2x32xf32>
    %257 = arith.addf %256, %255 : vector<2x32xf32>
    %258 = arith.divf %256, %257 : vector<2x32xf32>
    %259 = vector.extract_strided_slice %243 {offsets = [0, 64], sizes = [2, 32], strides = [1, 1]} : vector<2x128xf32> to vector<2x32xf32>
    %260 = math.tanh %259 : vector<2x32xf32>
    %261 = vector.extract_strided_slice %243 {offsets = [0, 96], sizes = [2, 32], strides = [1, 1]} : vector<2x128xf32> to vector<2x32xf32>
    %262 = arith.negf %261 : vector<2x32xf32>
    %263 = math.exp %262 : vector<2x32xf32>
    %cst_54 = arith.constant 1.000000e+00 : f32
    %264 = vector.broadcast %cst_54 : f32 to vector<2x32xf32>
    %265 = arith.addf %264, %263 : vector<2x32xf32>
    %266 = arith.divf %264, %265 : vector<2x32xf32>
    %267 = arith.mulf %258, %211 : vector<2x32xf32>
    %268 = arith.mulf %252, %260 : vector<2x32xf32>
    %269 = arith.addf %267, %268 : vector<2x32xf32>
    %270 = math.tanh %269 : vector<2x32xf32>
    %271 = arith.mulf %266, %270 : vector<2x32xf32>
    %272 = vector.extract_strided_slice %246 {offsets = [0, 0], sizes = [2, 32], strides = [1, 1]} : vector<2x128xf32> to vector<2x32xf32>
    %273 = arith.negf %272 : vector<2x32xf32>
    %274 = math.exp %273 : vector<2x32xf32>
    %cst_55 = arith.constant 1.000000e+00 : f32
    %275 = vector.broadcast %cst_55 : f32 to vector<2x32xf32>
    %276 = arith.addf %275, %274 : vector<2x32xf32>
    %277 = arith.divf %275, %276 : vector<2x32xf32>
    %278 = vector.extract_strided_slice %246 {offsets = [0, 32], sizes = [2, 32], strides = [1, 1]} : vector<2x128xf32> to vector<2x32xf32>
    %279 = arith.negf %278 : vector<2x32xf32>
    %280 = math.exp %279 : vector<2x32xf32>
    %cst_56 = arith.constant 1.000000e+00 : f32
    %281 = vector.broadcast %cst_56 : f32 to vector<2x32xf32>
    %282 = arith.addf %281, %280 : vector<2x32xf32>
    %283 = arith.divf %281, %282 : vector<2x32xf32>
    %284 = vector.extract_strided_slice %246 {offsets = [0, 64], sizes = [2, 32], strides = [1, 1]} : vector<2x128xf32> to vector<2x32xf32>
    %285 = math.tanh %284 : vector<2x32xf32>
    %286 = vector.extract_strided_slice %246 {offsets = [0, 96], sizes = [2, 32], strides = [1, 1]} : vector<2x128xf32> to vector<2x32xf32>
    %287 = arith.negf %286 : vector<2x32xf32>
    %288 = math.exp %287 : vector<2x32xf32>
    %cst_57 = arith.constant 1.000000e+00 : f32
    %289 = vector.broadcast %cst_57 : f32 to vector<2x32xf32>
    %290 = arith.addf %289, %288 : vector<2x32xf32>
    %291 = arith.divf %289, %290 : vector<2x32xf32>
    %292 = arith.mulf %283, %236 : vector<2x32xf32>
    %293 = arith.mulf %277, %285 : vector<2x32xf32>
    %294 = arith.addf %292, %293 : vector<2x32xf32>
    %295 = math.tanh %294 : vector<2x32xf32>
    %296 = arith.mulf %291, %295 : vector<2x32xf32>
    %c8_58 = arith.constant 8 : index
    %c0_59 = arith.constant 0 : index
    %297 = vector.load %arg14[%c8_58, %c0_59] : memref<16x64xf32, #tpu.memory_space<vmem>>, vector<2x32xf32>
    tpu.vector_store %arg14[%c8_58, %c0_59], %271 {strides = array<i32>} : memref<16x64xf32, #tpu.memory_space<vmem>>, vector<2x32xf32>,
    %c6_60 = arith.constant 6 : index
    %c32_61 = arith.constant 32 : index
    %298 = vector.load %arg14[%c6_60, %c32_61] : memref<16x64xf32, #tpu.memory_space<vmem>>, vector<2x32xf32>
    tpu.vector_store %arg14[%c6_60, %c32_61], %296 {strides = array<i32>} : memref<16x64xf32, #tpu.memory_space<vmem>>, vector<2x32xf32>,
    %299 = vector.extract_strided_slice %6 {offsets = [10, 0], sizes = [2, 128], strides = [1, 1]} : vector<16x256xf32> to vector<2x128xf32>
    %cst_62 = arith.constant dense<0.000000e+00> : vector<2x128xf32>
    %300 = tpu.matmul %271, %7, %cst_62 {dimension_numbers = #tpu.dot_dimension_numbers<[1], [0], [0], [1], [0, 0, 1, 1], [], []>} : vector<2x32xf32>, vector<32x128xf32>, vector<2x128xf32> -> vector<2x128xf32>
    %301 = arith.addf %299, %300 : vector<2x128xf32>
    %302 = vector.extract_strided_slice %6 {offsets = [4, 128], sizes = [2, 128], strides = [1, 1]} : vector<16x256xf32> to vector<2x128xf32>
    %cst_63 = arith.constant dense<0.000000e+00> : vector<2x128xf32>
    %303 = tpu.matmul %296, %8, %cst_63 {dimension_numbers = #tpu.dot_dimension_numbers<[1], [0], [0], [1], [0, 0, 1, 1], [], []>} : vector<2x32xf32>, vector<32x128xf32>, vector<2x128xf32> -> vector<2x128xf32>
    %304 = arith.addf %302, %303 : vector<2x128xf32>
    %305 = vector.extract_strided_slice %301 {offsets = [0, 0], sizes = [2, 32], strides = [1, 1]} : vector<2x128xf32> to vector<2x32xf32>
    %306 = arith.negf %305 : vector<2x32xf32>
    %307 = math.exp %306 : vector<2x32xf32>
    %cst_64 = arith.constant 1.000000e+00 : f32
    %308 = vector.broadcast %cst_64 : f32 to vector<2x32xf32>
    %309 = arith.addf %308, %307 : vector<2x32xf32>
    %310 = arith.divf %308, %309 : vector<2x32xf32>
    %311 = vector.extract_strided_slice %301 {offsets = [0, 32], sizes = [2, 32], strides = [1, 1]} : vector<2x128xf32> to vector<2x32xf32>
    %312 = arith.negf %311 : vector<2x32xf32>
    %313 = math.exp %312 : vector<2x32xf32>
    %cst_65 = arith.constant 1.000000e+00 : f32
    %314 = vector.broadcast %cst_65 : f32 to vector<2x32xf32>
    %315 = arith.addf %314, %313 : vector<2x32xf32>
    %316 = arith.divf %314, %315 : vector<2x32xf32>
    %317 = vector.extract_strided_slice %301 {offsets = [0, 64], sizes = [2, 32], strides = [1, 1]} : vector<2x128xf32> to vector<2x32xf32>
    %318 = math.tanh %317 : vector<2x32xf32>
    %319 = vector.extract_strided_slice %301 {offsets = [0, 96], sizes = [2, 32], strides = [1, 1]} : vector<2x128xf32> to vector<2x32xf32>
    %320 = arith.negf %319 : vector<2x32xf32>
    %321 = math.exp %320 : vector<2x32xf32>
    %cst_66 = arith.constant 1.000000e+00 : f32
    %322 = vector.broadcast %cst_66 : f32 to vector<2x32xf32>
    %323 = arith.addf %322, %321 : vector<2x32xf32>
    %324 = arith.divf %322, %323 : vector<2x32xf32>
    %325 = arith.mulf %316, %269 : vector<2x32xf32>
    %326 = arith.mulf %310, %318 : vector<2x32xf32>
    %327 = arith.addf %325, %326 : vector<2x32xf32>
    %328 = math.tanh %327 : vector<2x32xf32>
    %329 = arith.mulf %324, %328 : vector<2x32xf32>
    %330 = vector.extract_strided_slice %304 {offsets = [0, 0], sizes = [2, 32], strides = [1, 1]} : vector<2x128xf32> to vector<2x32xf32>
    %331 = arith.negf %330 : vector<2x32xf32>
    %332 = math.exp %331 : vector<2x32xf32>
    %cst_67 = arith.constant 1.000000e+00 : f32
    %333 = vector.broadcast %cst_67 : f32 to vector<2x32xf32>
    %334 = arith.addf %333, %332 : vector<2x32xf32>
    %335 = arith.divf %333, %334 : vector<2x32xf32>
    %336 = vector.extract_strided_slice %304 {offsets = [0, 32], sizes = [2, 32], strides = [1, 1]} : vector<2x128xf32> to vector<2x32xf32>
    %337 = arith.negf %336 : vector<2x32xf32>
    %338 = math.exp %337 : vector<2x32xf32>
    %cst_68 = arith.constant 1.000000e+00 : f32
    %339 = vector.broadcast %cst_68 : f32 to vector<2x32xf32>
    %340 = arith.addf %339, %338 : vector<2x32xf32>
    %341 = arith.divf %339, %340 : vector<2x32xf32>
    %342 = vector.extract_strided_slice %304 {offsets = [0, 64], sizes = [2, 32], strides = [1, 1]} : vector<2x128xf32> to vector<2x32xf32>
    %343 = math.tanh %342 : vector<2x32xf32>
    %344 = vector.extract_strided_slice %304 {offsets = [0, 96], sizes = [2, 32], strides = [1, 1]} : vector<2x128xf32> to vector<2x32xf32>
    %345 = arith.negf %344 : vector<2x32xf32>
    %346 = math.exp %345 : vector<2x32xf32>
    %cst_69 = arith.constant 1.000000e+00 : f32
    %347 = vector.broadcast %cst_69 : f32 to vector<2x32xf32>
    %348 = arith.addf %347, %346 : vector<2x32xf32>
    %349 = arith.divf %347, %348 : vector<2x32xf32>
    %350 = arith.mulf %341, %294 : vector<2x32xf32>
    %351 = arith.mulf %335, %343 : vector<2x32xf32>
    %352 = arith.addf %350, %351 : vector<2x32xf32>
    %353 = math.tanh %352 : vector<2x32xf32>
    %354 = arith.mulf %349, %353 : vector<2x32xf32>
    %c10_70 = arith.constant 10 : index
    %c0_71 = arith.constant 0 : index
    %355 = vector.load %arg14[%c10_70, %c0_71] : memref<16x64xf32, #tpu.memory_space<vmem>>, vector<2x32xf32>
    tpu.vector_store %arg14[%c10_70, %c0_71], %329 {strides = array<i32>} : memref<16x64xf32, #tpu.memory_space<vmem>>, vector<2x32xf32>,
    %c4_72 = arith.constant 4 : index
    %c32_73 = arith.constant 32 : index
    %356 = vector.load %arg14[%c4_72, %c32_73] : memref<16x64xf32, #tpu.memory_space<vmem>>, vector<2x32xf32>
    tpu.vector_store %arg14[%c4_72, %c32_73], %354 {strides = array<i32>} : memref<16x64xf32, #tpu.memory_space<vmem>>, vector<2x32xf32>,
    %357 = vector.extract_strided_slice %6 {offsets = [12, 0], sizes = [2, 128], strides = [1, 1]} : vector<16x256xf32> to vector<2x128xf32>
    %cst_74 = arith.constant dense<0.000000e+00> : vector<2x128xf32>
    %358 = tpu.matmul %329, %7, %cst_74 {dimension_numbers = #tpu.dot_dimension_numbers<[1], [0], [0], [1], [0, 0, 1, 1], [], []>} : vector<2x32xf32>, vector<32x128xf32>, vector<2x128xf32> -> vector<2x128xf32>
    %359 = arith.addf %357, %358 : vector<2x128xf32>
    %360 = vector.extract_strided_slice %6 {offsets = [2, 128], sizes = [2, 128], strides = [1, 1]} : vector<16x256xf32> to vector<2x128xf32>
    %cst_75 = arith.constant dense<0.000000e+00> : vector<2x128xf32>
    %361 = tpu.matmul %354, %8, %cst_75 {dimension_numbers = #tpu.dot_dimension_numbers<[1], [0], [0], [1], [0, 0, 1, 1], [], []>} : vector<2x32xf32>, vector<32x128xf32>, vector<2x128xf32> -> vector<2x128xf32>
    %362 = arith.addf %360, %361 : vector<2x128xf32>
    %363 = vector.extract_strided_slice %359 {offsets = [0, 0], sizes = [2, 32], strides = [1, 1]} : vector<2x128xf32> to vector<2x32xf32>
    %364 = arith.negf %363 : vector<2x32xf32>
    %365 = math.exp %364 : vector<2x32xf32>
    %cst_76 = arith.constant 1.000000e+00 : f32
    %366 = vector.broadcast %cst_76 : f32 to vector<2x32xf32>
    %367 = arith.addf %366, %365 : vector<2x32xf32>
    %368 = arith.divf %366, %367 : vector<2x32xf32>
    %369 = vector.extract_strided_slice %359 {offsets = [0, 32], sizes = [2, 32], strides = [1, 1]} : vector<2x128xf32> to vector<2x32xf32>
    %370 = arith.negf %369 : vector<2x32xf32>
    %371 = math.exp %370 : vector<2x32xf32>
    %cst_77 = arith.constant 1.000000e+00 : f32
    %372 = vector.broadcast %cst_77 : f32 to vector<2x32xf32>
    %373 = arith.addf %372, %371 : vector<2x32xf32>
    %374 = arith.divf %372, %373 : vector<2x32xf32>
    %375 = vector.extract_strided_slice %359 {offsets = [0, 64], sizes = [2, 32], strides = [1, 1]} : vector<2x128xf32> to vector<2x32xf32>
    %376 = math.tanh %375 : vector<2x32xf32>
    %377 = vector.extract_strided_slice %359 {offsets = [0, 96], sizes = [2, 32], strides = [1, 1]} : vector<2x128xf32> to vector<2x32xf32>
    %378 = arith.negf %377 : vector<2x32xf32>
    %379 = math.exp %378 : vector<2x32xf32>
    %cst_78 = arith.constant 1.000000e+00 : f32
    %380 = vector.broadcast %cst_78 : f32 to vector<2x32xf32>
    %381 = arith.addf %380, %379 : vector<2x32xf32>
    %382 = arith.divf %380, %381 : vector<2x32xf32>
    %383 = arith.mulf %374, %327 : vector<2x32xf32>
    %384 = arith.mulf %368, %376 : vector<2x32xf32>
    %385 = arith.addf %383, %384 : vector<2x32xf32>
    %386 = math.tanh %385 : vector<2x32xf32>
    %387 = arith.mulf %382, %386 : vector<2x32xf32>
    %388 = vector.extract_strided_slice %362 {offsets = [0, 0], sizes = [2, 32], strides = [1, 1]} : vector<2x128xf32> to vector<2x32xf32>
    %389 = arith.negf %388 : vector<2x32xf32>
    %390 = math.exp %389 : vector<2x32xf32>
    %cst_79 = arith.constant 1.000000e+00 : f32
    %391 = vector.broadcast %cst_79 : f32 to vector<2x32xf32>
    %392 = arith.addf %391, %390 : vector<2x32xf32>
    %393 = arith.divf %391, %392 : vector<2x32xf32>
    %394 = vector.extract_strided_slice %362 {offsets = [0, 32], sizes = [2, 32], strides = [1, 1]} : vector<2x128xf32> to vector<2x32xf32>
    %395 = arith.negf %394 : vector<2x32xf32>
    %396 = math.exp %395 : vector<2x32xf32>
    %cst_80 = arith.constant 1.000000e+00 : f32
    %397 = vector.broadcast %cst_80 : f32 to vector<2x32xf32>
    %398 = arith.addf %397, %396 : vector<2x32xf32>
    %399 = arith.divf %397, %398 : vector<2x32xf32>
    %400 = vector.extract_strided_slice %362 {offsets = [0, 64], sizes = [2, 32], strides = [1, 1]} : vector<2x128xf32> to vector<2x32xf32>
    %401 = math.tanh %400 : vector<2x32xf32>
    %402 = vector.extract_strided_slice %362 {offsets = [0, 96], sizes = [2, 32], strides = [1, 1]} : vector<2x128xf32> to vector<2x32xf32>
    %403 = arith.negf %402 : vector<2x32xf32>
    %404 = math.exp %403 : vector<2x32xf32>
    %cst_81 = arith.constant 1.000000e+00 : f32
    %405 = vector.broadcast %cst_81 : f32 to vector<2x32xf32>
    %406 = arith.addf %405, %404 : vector<2x32xf32>
    %407 = arith.divf %405, %406 : vector<2x32xf32>
    %408 = arith.mulf %399, %352 : vector<2x32xf32>
    %409 = arith.mulf %393, %401 : vector<2x32xf32>
    %410 = arith.addf %408, %409 : vector<2x32xf32>
    %411 = math.tanh %410 : vector<2x32xf32>
    %412 = arith.mulf %407, %411 : vector<2x32xf32>
    %c12_82 = arith.constant 12 : index
    %c0_83 = arith.constant 0 : index
    %413 = vector.load %arg14[%c12_82, %c0_83] : memref<16x64xf32, #tpu.memory_space<vmem>>, vector<2x32xf32>
    tpu.vector_store %arg14[%c12_82, %c0_83], %387 {strides = array<i32>} : memref<16x64xf32, #tpu.memory_space<vmem>>, vector<2x32xf32>,
    %c2_84 = arith.constant 2 : index
    %c32_85 = arith.constant 32 : index
    %414 = vector.load %arg14[%c2_84, %c32_85] : memref<16x64xf32, #tpu.memory_space<vmem>>, vector<2x32xf32>
    tpu.vector_store %arg14[%c2_84, %c32_85], %412 {strides = array<i32>} : memref<16x64xf32, #tpu.memory_space<vmem>>, vector<2x32xf32>,
    %415 = vector.extract_strided_slice %6 {offsets = [14, 0], sizes = [2, 128], strides = [1, 1]} : vector<16x256xf32> to vector<2x128xf32>
    %cst_86 = arith.constant dense<0.000000e+00> : vector<2x128xf32>
    %416 = tpu.matmul %387, %7, %cst_86 {dimension_numbers = #tpu.dot_dimension_numbers<[1], [0], [0], [1], [0, 0, 1, 1], [], []>} : vector<2x32xf32>, vector<32x128xf32>, vector<2x128xf32> -> vector<2x128xf32>
    %417 = arith.addf %415, %416 : vector<2x128xf32>
    %418 = vector.extract_strided_slice %6 {offsets = [0, 128], sizes = [2, 128], strides = [1, 1]} : vector<16x256xf32> to vector<2x128xf32>
    %cst_87 = arith.constant dense<0.000000e+00> : vector<2x128xf32>
    %419 = tpu.matmul %412, %8, %cst_87 {dimension_numbers = #tpu.dot_dimension_numbers<[1], [0], [0], [1], [0, 0, 1, 1], [], []>} : vector<2x32xf32>, vector<32x128xf32>, vector<2x128xf32> -> vector<2x128xf32>
    %420 = arith.addf %418, %419 : vector<2x128xf32>
    %421 = vector.extract_strided_slice %417 {offsets = [0, 0], sizes = [2, 32], strides = [1, 1]} : vector<2x128xf32> to vector<2x32xf32>
    %422 = arith.negf %421 : vector<2x32xf32>
    %423 = math.exp %422 : vector<2x32xf32>
    %cst_88 = arith.constant 1.000000e+00 : f32
    %424 = vector.broadcast %cst_88 : f32 to vector<2x32xf32>
    %425 = arith.addf %424, %423 : vector<2x32xf32>
    %426 = arith.divf %424, %425 : vector<2x32xf32>
    %427 = vector.extract_strided_slice %417 {offsets = [0, 32], sizes = [2, 32], strides = [1, 1]} : vector<2x128xf32> to vector<2x32xf32>
    %428 = arith.negf %427 : vector<2x32xf32>
    %429 = math.exp %428 : vector<2x32xf32>
    %cst_89 = arith.constant 1.000000e+00 : f32
    %430 = vector.broadcast %cst_89 : f32 to vector<2x32xf32>
    %431 = arith.addf %430, %429 : vector<2x32xf32>
    %432 = arith.divf %430, %431 : vector<2x32xf32>
    %433 = vector.extract_strided_slice %417 {offsets = [0, 64], sizes = [2, 32], strides = [1, 1]} : vector<2x128xf32> to vector<2x32xf32>
    %434 = math.tanh %433 : vector<2x32xf32>
    %435 = vector.extract_strided_slice %417 {offsets = [0, 96], sizes = [2, 32], strides = [1, 1]} : vector<2x128xf32> to vector<2x32xf32>
    %436 = arith.negf %435 : vector<2x32xf32>
    %437 = math.exp %436 : vector<2x32xf32>
    %cst_90 = arith.constant 1.000000e+00 : f32
    %438 = vector.broadcast %cst_90 : f32 to vector<2x32xf32>
    %439 = arith.addf %438, %437 : vector<2x32xf32>
    %440 = arith.divf %438, %439 : vector<2x32xf32>
    %441 = arith.mulf %432, %385 : vector<2x32xf32>
    %442 = arith.mulf %426, %434 : vector<2x32xf32>
    %443 = arith.addf %441, %442 : vector<2x32xf32>
    %444 = math.tanh %443 : vector<2x32xf32>
    %445 = arith.mulf %440, %444 : vector<2x32xf32>
    %446 = vector.extract_strided_slice %420 {offsets = [0, 0], sizes = [2, 32], strides = [1, 1]} : vector<2x128xf32> to vector<2x32xf32>
    %447 = arith.negf %446 : vector<2x32xf32>
    %448 = math.exp %447 : vector<2x32xf32>
    %cst_91 = arith.constant 1.000000e+00 : f32
    %449 = vector.broadcast %cst_91 : f32 to vector<2x32xf32>
    %450 = arith.addf %449, %448 : vector<2x32xf32>
    %451 = arith.divf %449, %450 : vector<2x32xf32>
    %452 = vector.extract_strided_slice %420 {offsets = [0, 32], sizes = [2, 32], strides = [1, 1]} : vector<2x128xf32> to vector<2x32xf32>
    %453 = arith.negf %452 : vector<2x32xf32>
    %454 = math.exp %453 : vector<2x32xf32>
    %cst_92 = arith.constant 1.000000e+00 : f32
    %455 = vector.broadcast %cst_92 : f32 to vector<2x32xf32>
    %456 = arith.addf %455, %454 : vector<2x32xf32>
    %457 = arith.divf %455, %456 : vector<2x32xf32>
    %458 = vector.extract_strided_slice %420 {offsets = [0, 64], sizes = [2, 32], strides = [1, 1]} : vector<2x128xf32> to vector<2x32xf32>
    %459 = math.tanh %458 : vector<2x32xf32>
    %460 = vector.extract_strided_slice %420 {offsets = [0, 96], sizes = [2, 32], strides = [1, 1]} : vector<2x128xf32> to vector<2x32xf32>
    %461 = arith.negf %460 : vector<2x32xf32>
    %462 = math.exp %461 : vector<2x32xf32>
    %cst_93 = arith.constant 1.000000e+00 : f32
    %463 = vector.broadcast %cst_93 : f32 to vector<2x32xf32>
    %464 = arith.addf %463, %462 : vector<2x32xf32>
    %465 = arith.divf %463, %464 : vector<2x32xf32>
    %466 = arith.mulf %457, %410 : vector<2x32xf32>
    %467 = arith.mulf %451, %459 : vector<2x32xf32>
    %468 = arith.addf %466, %467 : vector<2x32xf32>
    %469 = math.tanh %468 : vector<2x32xf32>
    %470 = arith.mulf %465, %469 : vector<2x32xf32>
    %c14_94 = arith.constant 14 : index
    %c0_95 = arith.constant 0 : index
    %471 = vector.load %arg14[%c14_94, %c0_95] : memref<16x64xf32, #tpu.memory_space<vmem>>, vector<2x32xf32>
    tpu.vector_store %arg14[%c14_94, %c0_95], %445 {strides = array<i32>} : memref<16x64xf32, #tpu.memory_space<vmem>>, vector<2x32xf32>,
    %c0_96 = arith.constant 0 : index
    %c32_97 = arith.constant 32 : index
    %472 = vector.load %arg14[%c0_96, %c32_97] : memref<16x64xf32, #tpu.memory_space<vmem>>, vector<2x32xf32>
    tpu.vector_store %arg14[%c0_96, %c32_97], %470 {strides = array<i32>} : memref<16x64xf32, #tpu.memory_space<vmem>>, vector<2x32xf32>,
    %c0_98 = arith.constant 0 : index
    %c0_99 = arith.constant 0 : index
    %473 = vector.load %arg14[%c0_98, %c0_99] : memref<16x64xf32, #tpu.memory_space<vmem>>, vector<16x64xf32>
    %c0_100 = arith.constant 0 : index
    %c0_101 = arith.constant 0 : index
    %474 = vector.load %arg5[%c0_100, %c0_101] : memref<64x256xf32, #tpu.memory_space<vmem>>, vector<64x256xf32>
    %cst_102 = arith.constant dense<0.000000e+00> : vector<16x256xf32>
    %475 = tpu.matmul %473, %474, %cst_102 {dimension_numbers = #tpu.dot_dimension_numbers<[1], [0], [0], [1], [0, 0, 1, 1], [], []>} : vector<16x64xf32>, vector<64x256xf32>, vector<16x256xf32> -> vector<16x256xf32>
    %c0_103 = arith.constant 0 : index
    %c0_104 = arith.constant 0 : index
    %476 = vector.load %arg8[%c0_103, %c0_104] : memref<1x256xf32, #tpu.memory_space<vmem>>, vector<1x256xf32>
    %477 = vector.broadcast %476 : vector<1x256xf32> to vector<16x256xf32>
    %478 = arith.addf %475, %477 : vector<16x256xf32>
    %c0_105 = arith.constant 0 : index
    %c0_106 = arith.constant 0 : index
    %479 = vector.load %arg6[%c0_105, %c0_106] : memref<32x128xf32, #tpu.memory_space<vmem>>, vector<32x128xf32>
    %c0_107 = arith.constant 0 : index
    %c0_108 = arith.constant 0 : index
    %480 = vector.load %arg7[%c0_107, %c0_108] : memref<32x128xf32, #tpu.memory_space<vmem>>, vector<32x128xf32>
    %481 = vector.extract_strided_slice %478 {offsets = [0, 0], sizes = [2, 128], strides = [1, 1]} : vector<16x256xf32> to vector<2x128xf32>
    %cst_109 = arith.constant dense<0.000000e+00> : vector<2x128xf32>
    %482 = tpu.matmul %1, %479, %cst_109 {dimension_numbers = #tpu.dot_dimension_numbers<[1], [0], [0], [1], [0, 0, 1, 1], [], []>} : vector<2x32xf32>, vector<32x128xf32>, vector<2x128xf32> -> vector<2x128xf32>
    %483 = arith.addf %481, %482 : vector<2x128xf32>
    %484 = vector.extract_strided_slice %478 {offsets = [14, 128], sizes = [2, 128], strides = [1, 1]} : vector<16x256xf32> to vector<2x128xf32>
    %cst_110 = arith.constant dense<0.000000e+00> : vector<2x128xf32>
    %485 = tpu.matmul %1, %480, %cst_110 {dimension_numbers = #tpu.dot_dimension_numbers<[1], [0], [0], [1], [0, 0, 1, 1], [], []>} : vector<2x32xf32>, vector<32x128xf32>, vector<2x128xf32> -> vector<2x128xf32>
    %486 = arith.addf %484, %485 : vector<2x128xf32>
    %487 = vector.extract_strided_slice %483 {offsets = [0, 0], sizes = [2, 32], strides = [1, 1]} : vector<2x128xf32> to vector<2x32xf32>
    %488 = arith.negf %487 : vector<2x32xf32>
    %489 = math.exp %488 : vector<2x32xf32>
    %cst_111 = arith.constant 1.000000e+00 : f32
    %490 = vector.broadcast %cst_111 : f32 to vector<2x32xf32>
    %491 = arith.addf %490, %489 : vector<2x32xf32>
    %492 = arith.divf %490, %491 : vector<2x32xf32>
    %493 = vector.extract_strided_slice %483 {offsets = [0, 32], sizes = [2, 32], strides = [1, 1]} : vector<2x128xf32> to vector<2x32xf32>
    %494 = arith.negf %493 : vector<2x32xf32>
    %495 = math.exp %494 : vector<2x32xf32>
    %cst_112 = arith.constant 1.000000e+00 : f32
    %496 = vector.broadcast %cst_112 : f32 to vector<2x32xf32>
    %497 = arith.addf %496, %495 : vector<2x32xf32>
    %498 = arith.divf %496, %497 : vector<2x32xf32>
    %499 = vector.extract_strided_slice %483 {offsets = [0, 64], sizes = [2, 32], strides = [1, 1]} : vector<2x128xf32> to vector<2x32xf32>
    %500 = math.tanh %499 : vector<2x32xf32>
    %501 = vector.extract_strided_slice %483 {offsets = [0, 96], sizes = [2, 32], strides = [1, 1]} : vector<2x128xf32> to vector<2x32xf32>
    %502 = arith.negf %501 : vector<2x32xf32>
    %503 = math.exp %502 : vector<2x32xf32>
    %cst_113 = arith.constant 1.000000e+00 : f32
    %504 = vector.broadcast %cst_113 : f32 to vector<2x32xf32>
    %505 = arith.addf %504, %503 : vector<2x32xf32>
    %506 = arith.divf %504, %505 : vector<2x32xf32>
    %507 = arith.mulf %498, %1 : vector<2x32xf32>
    %508 = arith.mulf %492, %500 : vector<2x32xf32>
    %509 = arith.addf %507, %508 : vector<2x32xf32>
    %510 = math.tanh %509 : vector<2x32xf32>
    %511 = arith.mulf %506, %510 : vector<2x32xf32>
    %512 = vector.extract_strided_slice %486 {offsets = [0, 0], sizes = [2, 32], strides = [1, 1]} : vector<2x128xf32> to vector<2x32xf32>
    %513 = arith.negf %512 : vector<2x32xf32>
    %514 = math.exp %513 : vector<2x32xf32>
    %cst_114 = arith.constant 1.000000e+00 : f32
    %515 = vector.broadcast %cst_114 : f32 to vector<2x32xf32>
    %516 = arith.addf %515, %514 : vector<2x32xf32>
    %517 = arith.divf %515, %516 : vector<2x32xf32>
    %518 = vector.extract_strided_slice %486 {offsets = [0, 32], sizes = [2, 32], strides = [1, 1]} : vector<2x128xf32> to vector<2x32xf32>
    %519 = arith.negf %518 : vector<2x32xf32>
    %520 = math.exp %519 : vector<2x32xf32>
    %cst_115 = arith.constant 1.000000e+00 : f32
    %521 = vector.broadcast %cst_115 : f32 to vector<2x32xf32>
    %522 = arith.addf %521, %520 : vector<2x32xf32>
    %523 = arith.divf %521, %522 : vector<2x32xf32>
    %524 = vector.extract_strided_slice %486 {offsets = [0, 64], sizes = [2, 32], strides = [1, 1]} : vector<2x128xf32> to vector<2x32xf32>
    %525 = math.tanh %524 : vector<2x32xf32>
    %526 = vector.extract_strided_slice %486 {offsets = [0, 96], sizes = [2, 32], strides = [1, 1]} : vector<2x128xf32> to vector<2x32xf32>
    %527 = arith.negf %526 : vector<2x32xf32>
    %528 = math.exp %527 : vector<2x32xf32>
    %cst_116 = arith.constant 1.000000e+00 : f32
    %529 = vector.broadcast %cst_116 : f32 to vector<2x32xf32>
    %530 = arith.addf %529, %528 : vector<2x32xf32>
    %531 = arith.divf %529, %530 : vector<2x32xf32>
    %532 = arith.mulf %523, %1 : vector<2x32xf32>
    %533 = arith.mulf %517, %525 : vector<2x32xf32>
    %534 = arith.addf %532, %533 : vector<2x32xf32>
    %535 = math.tanh %534 : vector<2x32xf32>
    %536 = arith.mulf %531, %535 : vector<2x32xf32>
    %537 = vector.extract_strided_slice %478 {offsets = [2, 0], sizes = [2, 128], strides = [1, 1]} : vector<16x256xf32> to vector<2x128xf32>
    %cst_117 = arith.constant dense<0.000000e+00> : vector<2x128xf32>
    %538 = tpu.matmul %511, %479, %cst_117 {dimension_numbers = #tpu.dot_dimension_numbers<[1], [0], [0], [1], [0, 0, 1, 1], [], []>} : vector<2x32xf32>, vector<32x128xf32>, vector<2x128xf32> -> vector<2x128xf32>
    %539 = arith.addf %537, %538 : vector<2x128xf32>
    %540 = vector.extract_strided_slice %478 {offsets = [12, 128], sizes = [2, 128], strides = [1, 1]} : vector<16x256xf32> to vector<2x128xf32>
    %cst_118 = arith.constant dense<0.000000e+00> : vector<2x128xf32>
    %541 = tpu.matmul %536, %480, %cst_118 {dimension_numbers = #tpu.dot_dimension_numbers<[1], [0], [0], [1], [0, 0, 1, 1], [], []>} : vector<2x32xf32>, vector<32x128xf32>, vector<2x128xf32> -> vector<2x128xf32>
    %542 = arith.addf %540, %541 : vector<2x128xf32>
    %543 = vector.extract_strided_slice %539 {offsets = [0, 0], sizes = [2, 32], strides = [1, 1]} : vector<2x128xf32> to vector<2x32xf32>
    %544 = arith.negf %543 : vector<2x32xf32>
    %545 = math.exp %544 : vector<2x32xf32>
    %cst_119 = arith.constant 1.000000e+00 : f32
    %546 = vector.broadcast %cst_119 : f32 to vector<2x32xf32>
    %547 = arith.addf %546, %545 : vector<2x32xf32>
    %548 = arith.divf %546, %547 : vector<2x32xf32>
    %549 = vector.extract_strided_slice %539 {offsets = [0, 32], sizes = [2, 32], strides = [1, 1]} : vector<2x128xf32> to vector<2x32xf32>
    %550 = arith.negf %549 : vector<2x32xf32>
    %551 = math.exp %550 : vector<2x32xf32>
    %cst_120 = arith.constant 1.000000e+00 : f32
    %552 = vector.broadcast %cst_120 : f32 to vector<2x32xf32>
    %553 = arith.addf %552, %551 : vector<2x32xf32>
    %554 = arith.divf %552, %553 : vector<2x32xf32>
    %555 = vector.extract_strided_slice %539 {offsets = [0, 64], sizes = [2, 32], strides = [1, 1]} : vector<2x128xf32> to vector<2x32xf32>
    %556 = math.tanh %555 : vector<2x32xf32>
    %557 = vector.extract_strided_slice %539 {offsets = [0, 96], sizes = [2, 32], strides = [1, 1]} : vector<2x128xf32> to vector<2x32xf32>
    %558 = arith.negf %557 : vector<2x32xf32>
    %559 = math.exp %558 : vector<2x32xf32>
    %cst_121 = arith.constant 1.000000e+00 : f32
    %560 = vector.broadcast %cst_121 : f32 to vector<2x32xf32>
    %561 = arith.addf %560, %559 : vector<2x32xf32>
    %562 = arith.divf %560, %561 : vector<2x32xf32>
    %563 = arith.mulf %554, %509 : vector<2x32xf32>
    %564 = arith.mulf %548, %556 : vector<2x32xf32>
    %565 = arith.addf %563, %564 : vector<2x32xf32>
    %566 = math.tanh %565 : vector<2x32xf32>
    %567 = arith.mulf %562, %566 : vector<2x32xf32>
    %568 = vector.extract_strided_slice %542 {offsets = [0, 0], sizes = [2, 32], strides = [1, 1]} : vector<2x128xf32> to vector<2x32xf32>
    %569 = arith.negf %568 : vector<2x32xf32>
    %570 = math.exp %569 : vector<2x32xf32>
    %cst_122 = arith.constant 1.000000e+00 : f32
    %571 = vector.broadcast %cst_122 : f32 to vector<2x32xf32>
    %572 = arith.addf %571, %570 : vector<2x32xf32>
    %573 = arith.divf %571, %572 : vector<2x32xf32>
    %574 = vector.extract_strided_slice %542 {offsets = [0, 32], sizes = [2, 32], strides = [1, 1]} : vector<2x128xf32> to vector<2x32xf32>
    %575 = arith.negf %574 : vector<2x32xf32>
    %576 = math.exp %575 : vector<2x32xf32>
    %cst_123 = arith.constant 1.000000e+00 : f32
    %577 = vector.broadcast %cst_123 : f32 to vector<2x32xf32>
    %578 = arith.addf %577, %576 : vector<2x32xf32>
    %579 = arith.divf %577, %578 : vector<2x32xf32>
    %580 = vector.extract_strided_slice %542 {offsets = [0, 64], sizes = [2, 32], strides = [1, 1]} : vector<2x128xf32> to vector<2x32xf32>
    %581 = math.tanh %580 : vector<2x32xf32>
    %582 = vector.extract_strided_slice %542 {offsets = [0, 96], sizes = [2, 32], strides = [1, 1]} : vector<2x128xf32> to vector<2x32xf32>
    %583 = arith.negf %582 : vector<2x32xf32>
    %584 = math.exp %583 : vector<2x32xf32>
    %cst_124 = arith.constant 1.000000e+00 : f32
    %585 = vector.broadcast %cst_124 : f32 to vector<2x32xf32>
    %586 = arith.addf %585, %584 : vector<2x32xf32>
    %587 = arith.divf %585, %586 : vector<2x32xf32>
    %588 = arith.mulf %579, %534 : vector<2x32xf32>
    %589 = arith.mulf %573, %581 : vector<2x32xf32>
    %590 = arith.addf %588, %589 : vector<2x32xf32>
    %591 = math.tanh %590 : vector<2x32xf32>
    %592 = arith.mulf %587, %591 : vector<2x32xf32>
    %593 = arith.maximumf %511, %567 : vector<2x32xf32>
    %594 = arith.maximumf %536, %592 : vector<2x32xf32>
    %595 = vector.extract_strided_slice %478 {offsets = [4, 0], sizes = [2, 128], strides = [1, 1]} : vector<16x256xf32> to vector<2x128xf32>
    %cst_125 = arith.constant dense<0.000000e+00> : vector<2x128xf32>
    %596 = tpu.matmul %567, %479, %cst_125 {dimension_numbers = #tpu.dot_dimension_numbers<[1], [0], [0], [1], [0, 0, 1, 1], [], []>} : vector<2x32xf32>, vector<32x128xf32>, vector<2x128xf32> -> vector<2x128xf32>
    %597 = arith.addf %595, %596 : vector<2x128xf32>
    %598 = vector.extract_strided_slice %478 {offsets = [10, 128], sizes = [2, 128], strides = [1, 1]} : vector<16x256xf32> to vector<2x128xf32>
    %cst_126 = arith.constant dense<0.000000e+00> : vector<2x128xf32>
    %599 = tpu.matmul %592, %480, %cst_126 {dimension_numbers = #tpu.dot_dimension_numbers<[1], [0], [0], [1], [0, 0, 1, 1], [], []>} : vector<2x32xf32>, vector<32x128xf32>, vector<2x128xf32> -> vector<2x128xf32>
    %600 = arith.addf %598, %599 : vector<2x128xf32>
    %601 = vector.extract_strided_slice %597 {offsets = [0, 0], sizes = [2, 32], strides = [1, 1]} : vector<2x128xf32> to vector<2x32xf32>
    %602 = arith.negf %601 : vector<2x32xf32>
    %603 = math.exp %602 : vector<2x32xf32>
    %cst_127 = arith.constant 1.000000e+00 : f32
    %604 = vector.broadcast %cst_127 : f32 to vector<2x32xf32>
    %605 = arith.addf %604, %603 : vector<2x32xf32>
    %606 = arith.divf %604, %605 : vector<2x32xf32>
    %607 = vector.extract_strided_slice %597 {offsets = [0, 32], sizes = [2, 32], strides = [1, 1]} : vector<2x128xf32> to vector<2x32xf32>
    %608 = arith.negf %607 : vector<2x32xf32>
    %609 = math.exp %608 : vector<2x32xf32>
    %cst_128 = arith.constant 1.000000e+00 : f32
    %610 = vector.broadcast %cst_128 : f32 to vector<2x32xf32>
    %611 = arith.addf %610, %609 : vector<2x32xf32>
    %612 = arith.divf %610, %611 : vector<2x32xf32>
    %613 = vector.extract_strided_slice %597 {offsets = [0, 64], sizes = [2, 32], strides = [1, 1]} : vector<2x128xf32> to vector<2x32xf32>
    %614 = math.tanh %613 : vector<2x32xf32>
    %615 = vector.extract_strided_slice %597 {offsets = [0, 96], sizes = [2, 32], strides = [1, 1]} : vector<2x128xf32> to vector<2x32xf32>
    %616 = arith.negf %615 : vector<2x32xf32>
    %617 = math.exp %616 : vector<2x32xf32>
    %cst_129 = arith.constant 1.000000e+00 : f32
    %618 = vector.broadcast %cst_129 : f32 to vector<2x32xf32>
    %619 = arith.addf %618, %617 : vector<2x32xf32>
    %620 = arith.divf %618, %619 : vector<2x32xf32>
    %621 = arith.mulf %612, %565 : vector<2x32xf32>
    %622 = arith.mulf %606, %614 : vector<2x32xf32>
    %623 = arith.addf %621, %622 : vector<2x32xf32>
    %624 = math.tanh %623 : vector<2x32xf32>
    %625 = arith.mulf %620, %624 : vector<2x32xf32>
    %626 = vector.extract_strided_slice %600 {offsets = [0, 0], sizes = [2, 32], strides = [1, 1]} : vector<2x128xf32> to vector<2x32xf32>
    %627 = arith.negf %626 : vector<2x32xf32>
    %628 = math.exp %627 : vector<2x32xf32>
    %cst_130 = arith.constant 1.000000e+00 : f32
    %629 = vector.broadcast %cst_130 : f32 to vector<2x32xf32>
    %630 = arith.addf %629, %628 : vector<2x32xf32>
    %631 = arith.divf %629, %630 : vector<2x32xf32>
    %632 = vector.extract_strided_slice %600 {offsets = [0, 32], sizes = [2, 32], strides = [1, 1]} : vector<2x128xf32> to vector<2x32xf32>
    %633 = arith.negf %632 : vector<2x32xf32>
    %634 = math.exp %633 : vector<2x32xf32>
    %cst_131 = arith.constant 1.000000e+00 : f32
    %635 = vector.broadcast %cst_131 : f32 to vector<2x32xf32>
    %636 = arith.addf %635, %634 : vector<2x32xf32>
    %637 = arith.divf %635, %636 : vector<2x32xf32>
    %638 = vector.extract_strided_slice %600 {offsets = [0, 64], sizes = [2, 32], strides = [1, 1]} : vector<2x128xf32> to vector<2x32xf32>
    %639 = math.tanh %638 : vector<2x32xf32>
    %640 = vector.extract_strided_slice %600 {offsets = [0, 96], sizes = [2, 32], strides = [1, 1]} : vector<2x128xf32> to vector<2x32xf32>
    %641 = arith.negf %640 : vector<2x32xf32>
    %642 = math.exp %641 : vector<2x32xf32>
    %cst_132 = arith.constant 1.000000e+00 : f32
    %643 = vector.broadcast %cst_132 : f32 to vector<2x32xf32>
    %644 = arith.addf %643, %642 : vector<2x32xf32>
    %645 = arith.divf %643, %644 : vector<2x32xf32>
    %646 = arith.mulf %637, %590 : vector<2x32xf32>
    %647 = arith.mulf %631, %639 : vector<2x32xf32>
    %648 = arith.addf %646, %647 : vector<2x32xf32>
    %649 = math.tanh %648 : vector<2x32xf32>
    %650 = arith.mulf %645, %649 : vector<2x32xf32>
    %651 = arith.maximumf %593, %625 : vector<2x32xf32>
    %652 = arith.maximumf %594, %650 : vector<2x32xf32>
    %653 = vector.extract_strided_slice %478 {offsets = [6, 0], sizes = [2, 128], strides = [1, 1]} : vector<16x256xf32> to vector<2x128xf32>
    %cst_133 = arith.constant dense<0.000000e+00> : vector<2x128xf32>
    %654 = tpu.matmul %625, %479, %cst_133 {dimension_numbers = #tpu.dot_dimension_numbers<[1], [0], [0], [1], [0, 0, 1, 1], [], []>} : vector<2x32xf32>, vector<32x128xf32>, vector<2x128xf32> -> vector<2x128xf32>
    %655 = arith.addf %653, %654 : vector<2x128xf32>
    %656 = vector.extract_strided_slice %478 {offsets = [8, 128], sizes = [2, 128], strides = [1, 1]} : vector<16x256xf32> to vector<2x128xf32>
    %cst_134 = arith.constant dense<0.000000e+00> : vector<2x128xf32>
    %657 = tpu.matmul %650, %480, %cst_134 {dimension_numbers = #tpu.dot_dimension_numbers<[1], [0], [0], [1], [0, 0, 1, 1], [], []>} : vector<2x32xf32>, vector<32x128xf32>, vector<2x128xf32> -> vector<2x128xf32>
    %658 = arith.addf %656, %657 : vector<2x128xf32>
    %659 = vector.extract_strided_slice %655 {offsets = [0, 0], sizes = [2, 32], strides = [1, 1]} : vector<2x128xf32> to vector<2x32xf32>
    %660 = arith.negf %659 : vector<2x32xf32>
    %661 = math.exp %660 : vector<2x32xf32>
    %cst_135 = arith.constant 1.000000e+00 : f32
    %662 = vector.broadcast %cst_135 : f32 to vector<2x32xf32>
    %663 = arith.addf %662, %661 : vector<2x32xf32>
    %664 = arith.divf %662, %663 : vector<2x32xf32>
    %665 = vector.extract_strided_slice %655 {offsets = [0, 32], sizes = [2, 32], strides = [1, 1]} : vector<2x128xf32> to vector<2x32xf32>
    %666 = arith.negf %665 : vector<2x32xf32>
    %667 = math.exp %666 : vector<2x32xf32>
    %cst_136 = arith.constant 1.000000e+00 : f32
    %668 = vector.broadcast %cst_136 : f32 to vector<2x32xf32>
    %669 = arith.addf %668, %667 : vector<2x32xf32>
    %670 = arith.divf %668, %669 : vector<2x32xf32>
    %671 = vector.extract_strided_slice %655 {offsets = [0, 64], sizes = [2, 32], strides = [1, 1]} : vector<2x128xf32> to vector<2x32xf32>
    %672 = math.tanh %671 : vector<2x32xf32>
    %673 = vector.extract_strided_slice %655 {offsets = [0, 96], sizes = [2, 32], strides = [1, 1]} : vector<2x128xf32> to vector<2x32xf32>
    %674 = arith.negf %673 : vector<2x32xf32>
    %675 = math.exp %674 : vector<2x32xf32>
    %cst_137 = arith.constant 1.000000e+00 : f32
    %676 = vector.broadcast %cst_137 : f32 to vector<2x32xf32>
    %677 = arith.addf %676, %675 : vector<2x32xf32>
    %678 = arith.divf %676, %677 : vector<2x32xf32>
    %679 = arith.mulf %670, %623 : vector<2x32xf32>
    %680 = arith.mulf %664, %672 : vector<2x32xf32>
    %681 = arith.addf %679, %680 : vector<2x32xf32>
    %682 = math.tanh %681 : vector<2x32xf32>
    %683 = arith.mulf %678, %682 : vector<2x32xf32>
    %684 = vector.extract_strided_slice %658 {offsets = [0, 0], sizes = [2, 32], strides = [1, 1]} : vector<2x128xf32> to vector<2x32xf32>
    %685 = arith.negf %684 : vector<2x32xf32>
    %686 = math.exp %685 : vector<2x32xf32>
    %cst_138 = arith.constant 1.000000e+00 : f32
    %687 = vector.broadcast %cst_138 : f32 to vector<2x32xf32>
    %688 = arith.addf %687, %686 : vector<2x32xf32>
    %689 = arith.divf %687, %688 : vector<2x32xf32>
    %690 = vector.extract_strided_slice %658 {offsets = [0, 32], sizes = [2, 32], strides = [1, 1]} : vector<2x128xf32> to vector<2x32xf32>
    %691 = arith.negf %690 : vector<2x32xf32>
    %692 = math.exp %691 : vector<2x32xf32>
    %cst_139 = arith.constant 1.000000e+00 : f32
    %693 = vector.broadcast %cst_139 : f32 to vector<2x32xf32>
    %694 = arith.addf %693, %692 : vector<2x32xf32>
    %695 = arith.divf %693, %694 : vector<2x32xf32>
    %696 = vector.extract_strided_slice %658 {offsets = [0, 64], sizes = [2, 32], strides = [1, 1]} : vector<2x128xf32> to vector<2x32xf32>
    %697 = math.tanh %696 : vector<2x32xf32>
    %698 = vector.extract_strided_slice %658 {offsets = [0, 96], sizes = [2, 32], strides = [1, 1]} : vector<2x128xf32> to vector<2x32xf32>
    %699 = arith.negf %698 : vector<2x32xf32>
    %700 = math.exp %699 : vector<2x32xf32>
    %cst_140 = arith.constant 1.000000e+00 : f32
    %701 = vector.broadcast %cst_140 : f32 to vector<2x32xf32>
    %702 = arith.addf %701, %700 : vector<2x32xf32>
    %703 = arith.divf %701, %702 : vector<2x32xf32>
    %704 = arith.mulf %695, %648 : vector<2x32xf32>
    %705 = arith.mulf %689, %697 : vector<2x32xf32>
    %706 = arith.addf %704, %705 : vector<2x32xf32>
    %707 = math.tanh %706 : vector<2x32xf32>
    %708 = arith.mulf %703, %707 : vector<2x32xf32>
    %709 = arith.maximumf %651, %683 : vector<2x32xf32>
    %710 = arith.maximumf %652, %708 : vector<2x32xf32>
    %711 = vector.extract_strided_slice %478 {offsets = [8, 0], sizes = [2, 128], strides = [1, 1]} : vector<16x256xf32> to vector<2x128xf32>
    %cst_141 = arith.constant dense<0.000000e+00> : vector<2x128xf32>
    %712 = tpu.matmul %683, %479, %cst_141 {dimension_numbers = #tpu.dot_dimension_numbers<[1], [0], [0], [1], [0, 0, 1, 1], [], []>} : vector<2x32xf32>, vector<32x128xf32>, vector<2x128xf32> -> vector<2x128xf32>
    %713 = arith.addf %711, %712 : vector<2x128xf32>
    %714 = vector.extract_strided_slice %478 {offsets = [6, 128], sizes = [2, 128], strides = [1, 1]} : vector<16x256xf32> to vector<2x128xf32>
    %cst_142 = arith.constant dense<0.000000e+00> : vector<2x128xf32>
    %715 = tpu.matmul %708, %480, %cst_142 {dimension_numbers = #tpu.dot_dimension_numbers<[1], [0], [0], [1], [0, 0, 1, 1], [], []>} : vector<2x32xf32>, vector<32x128xf32>, vector<2x128xf32> -> vector<2x128xf32>
    %716 = arith.addf %714, %715 : vector<2x128xf32>
    %717 = vector.extract_strided_slice %713 {offsets = [0, 0], sizes = [2, 32], strides = [1, 1]} : vector<2x128xf32> to vector<2x32xf32>
    %718 = arith.negf %717 : vector<2x32xf32>
    %719 = math.exp %718 : vector<2x32xf32>
    %cst_143 = arith.constant 1.000000e+00 : f32
    %720 = vector.broadcast %cst_143 : f32 to vector<2x32xf32>
    %721 = arith.addf %720, %719 : vector<2x32xf32>
    %722 = arith.divf %720, %721 : vector<2x32xf32>
    %723 = vector.extract_strided_slice %713 {offsets = [0, 32], sizes = [2, 32], strides = [1, 1]} : vector<2x128xf32> to vector<2x32xf32>
    %724 = arith.negf %723 : vector<2x32xf32>
    %725 = math.exp %724 : vector<2x32xf32>
    %cst_144 = arith.constant 1.000000e+00 : f32
    %726 = vector.broadcast %cst_144 : f32 to vector<2x32xf32>
    %727 = arith.addf %726, %725 : vector<2x32xf32>
    %728 = arith.divf %726, %727 : vector<2x32xf32>
    %729 = vector.extract_strided_slice %713 {offsets = [0, 64], sizes = [2, 32], strides = [1, 1]} : vector<2x128xf32> to vector<2x32xf32>
    %730 = math.tanh %729 : vector<2x32xf32>
    %731 = vector.extract_strided_slice %713 {offsets = [0, 96], sizes = [2, 32], strides = [1, 1]} : vector<2x128xf32> to vector<2x32xf32>
    %732 = arith.negf %731 : vector<2x32xf32>
    %733 = math.exp %732 : vector<2x32xf32>
    %cst_145 = arith.constant 1.000000e+00 : f32
    %734 = vector.broadcast %cst_145 : f32 to vector<2x32xf32>
    %735 = arith.addf %734, %733 : vector<2x32xf32>
    %736 = arith.divf %734, %735 : vector<2x32xf32>
    %737 = arith.mulf %728, %681 : vector<2x32xf32>
    %738 = arith.mulf %722, %730 : vector<2x32xf32>
    %739 = arith.addf %737, %738 : vector<2x32xf32>
    %740 = math.tanh %739 : vector<2x32xf32>
    %741 = arith.mulf %736, %740 : vector<2x32xf32>
    %742 = vector.extract_strided_slice %716 {offsets = [0, 0], sizes = [2, 32], strides = [1, 1]} : vector<2x128xf32> to vector<2x32xf32>
    %743 = arith.negf %742 : vector<2x32xf32>
    %744 = math.exp %743 : vector<2x32xf32>
    %cst_146 = arith.constant 1.000000e+00 : f32
    %745 = vector.broadcast %cst_146 : f32 to vector<2x32xf32>
    %746 = arith.addf %745, %744 : vector<2x32xf32>
    %747 = arith.divf %745, %746 : vector<2x32xf32>
    %748 = vector.extract_strided_slice %716 {offsets = [0, 32], sizes = [2, 32], strides = [1, 1]} : vector<2x128xf32> to vector<2x32xf32>
    %749 = arith.negf %748 : vector<2x32xf32>
    %750 = math.exp %749 : vector<2x32xf32>
    %cst_147 = arith.constant 1.000000e+00 : f32
    %751 = vector.broadcast %cst_147 : f32 to vector<2x32xf32>
    %752 = arith.addf %751, %750 : vector<2x32xf32>
    %753 = arith.divf %751, %752 : vector<2x32xf32>
    %754 = vector.extract_strided_slice %716 {offsets = [0, 64], sizes = [2, 32], strides = [1, 1]} : vector<2x128xf32> to vector<2x32xf32>
    %755 = math.tanh %754 : vector<2x32xf32>
    %756 = vector.extract_strided_slice %716 {offsets = [0, 96], sizes = [2, 32], strides = [1, 1]} : vector<2x128xf32> to vector<2x32xf32>
    %757 = arith.negf %756 : vector<2x32xf32>
    %758 = math.exp %757 : vector<2x32xf32>
    %cst_148 = arith.constant 1.000000e+00 : f32
    %759 = vector.broadcast %cst_148 : f32 to vector<2x32xf32>
    %760 = arith.addf %759, %758 : vector<2x32xf32>
    %761 = arith.divf %759, %760 : vector<2x32xf32>
    %762 = arith.mulf %753, %706 : vector<2x32xf32>
    %763 = arith.mulf %747, %755 : vector<2x32xf32>
    %764 = arith.addf %762, %763 : vector<2x32xf32>
    %765 = math.tanh %764 : vector<2x32xf32>
    %766 = arith.mulf %761, %765 : vector<2x32xf32>
    %767 = arith.maximumf %709, %741 : vector<2x32xf32>
    %768 = arith.maximumf %710, %766 : vector<2x32xf32>
    %769 = vector.extract_strided_slice %478 {offsets = [10, 0], sizes = [2, 128], strides = [1, 1]} : vector<16x256xf32> to vector<2x128xf32>
    %cst_149 = arith.constant dense<0.000000e+00> : vector<2x128xf32>
    %770 = tpu.matmul %741, %479, %cst_149 {dimension_numbers = #tpu.dot_dimension_numbers<[1], [0], [0], [1], [0, 0, 1, 1], [], []>} : vector<2x32xf32>, vector<32x128xf32>, vector<2x128xf32> -> vector<2x128xf32>
    %771 = arith.addf %769, %770 : vector<2x128xf32>
    %772 = vector.extract_strided_slice %478 {offsets = [4, 128], sizes = [2, 128], strides = [1, 1]} : vector<16x256xf32> to vector<2x128xf32>
    %cst_150 = arith.constant dense<0.000000e+00> : vector<2x128xf32>
    %773 = tpu.matmul %766, %480, %cst_150 {dimension_numbers = #tpu.dot_dimension_numbers<[1], [0], [0], [1], [0, 0, 1, 1], [], []>} : vector<2x32xf32>, vector<32x128xf32>, vector<2x128xf32> -> vector<2x128xf32>
    %774 = arith.addf %772, %773 : vector<2x128xf32>
    %775 = vector.extract_strided_slice %771 {offsets = [0, 0], sizes = [2, 32], strides = [1, 1]} : vector<2x128xf32> to vector<2x32xf32>
    %776 = arith.negf %775 : vector<2x32xf32>
    %777 = math.exp %776 : vector<2x32xf32>
    %cst_151 = arith.constant 1.000000e+00 : f32
    %778 = vector.broadcast %cst_151 : f32 to vector<2x32xf32>
    %779 = arith.addf %778, %777 : vector<2x32xf32>
    %780 = arith.divf %778, %779 : vector<2x32xf32>
    %781 = vector.extract_strided_slice %771 {offsets = [0, 32], sizes = [2, 32], strides = [1, 1]} : vector<2x128xf32> to vector<2x32xf32>
    %782 = arith.negf %781 : vector<2x32xf32>
    %783 = math.exp %782 : vector<2x32xf32>
    %cst_152 = arith.constant 1.000000e+00 : f32
    %784 = vector.broadcast %cst_152 : f32 to vector<2x32xf32>
    %785 = arith.addf %784, %783 : vector<2x32xf32>
    %786 = arith.divf %784, %785 : vector<2x32xf32>
    %787 = vector.extract_strided_slice %771 {offsets = [0, 64], sizes = [2, 32], strides = [1, 1]} : vector<2x128xf32> to vector<2x32xf32>
    %788 = math.tanh %787 : vector<2x32xf32>
    %789 = vector.extract_strided_slice %771 {offsets = [0, 96], sizes = [2, 32], strides = [1, 1]} : vector<2x128xf32> to vector<2x32xf32>
    %790 = arith.negf %789 : vector<2x32xf32>
    %791 = math.exp %790 : vector<2x32xf32>
    %cst_153 = arith.constant 1.000000e+00 : f32
    %792 = vector.broadcast %cst_153 : f32 to vector<2x32xf32>
    %793 = arith.addf %792, %791 : vector<2x32xf32>
    %794 = arith.divf %792, %793 : vector<2x32xf32>
    %795 = arith.mulf %786, %739 : vector<2x32xf32>
    %796 = arith.mulf %780, %788 : vector<2x32xf32>
    %797 = arith.addf %795, %796 : vector<2x32xf32>
    %798 = math.tanh %797 : vector<2x32xf32>
    %799 = arith.mulf %794, %798 : vector<2x32xf32>
    %800 = vector.extract_strided_slice %774 {offsets = [0, 0], sizes = [2, 32], strides = [1, 1]} : vector<2x128xf32> to vector<2x32xf32>
    %801 = arith.negf %800 : vector<2x32xf32>
    %802 = math.exp %801 : vector<2x32xf32>
    %cst_154 = arith.constant 1.000000e+00 : f32
    %803 = vector.broadcast %cst_154 : f32 to vector<2x32xf32>
    %804 = arith.addf %803, %802 : vector<2x32xf32>
    %805 = arith.divf %803, %804 : vector<2x32xf32>
    %806 = vector.extract_strided_slice %774 {offsets = [0, 32], sizes = [2, 32], strides = [1, 1]} : vector<2x128xf32> to vector<2x32xf32>
    %807 = arith.negf %806 : vector<2x32xf32>
    %808 = math.exp %807 : vector<2x32xf32>
    %cst_155 = arith.constant 1.000000e+00 : f32
    %809 = vector.broadcast %cst_155 : f32 to vector<2x32xf32>
    %810 = arith.addf %809, %808 : vector<2x32xf32>
    %811 = arith.divf %809, %810 : vector<2x32xf32>
    %812 = vector.extract_strided_slice %774 {offsets = [0, 64], sizes = [2, 32], strides = [1, 1]} : vector<2x128xf32> to vector<2x32xf32>
    %813 = math.tanh %812 : vector<2x32xf32>
    %814 = vector.extract_strided_slice %774 {offsets = [0, 96], sizes = [2, 32], strides = [1, 1]} : vector<2x128xf32> to vector<2x32xf32>
    %815 = arith.negf %814 : vector<2x32xf32>
    %816 = math.exp %815 : vector<2x32xf32>
    %cst_156 = arith.constant 1.000000e+00 : f32
    %817 = vector.broadcast %cst_156 : f32 to vector<2x32xf32>
    %818 = arith.addf %817, %816 : vector<2x32xf32>
    %819 = arith.divf %817, %818 : vector<2x32xf32>
    %820 = arith.mulf %811, %764 : vector<2x32xf32>
    %821 = arith.mulf %805, %813 : vector<2x32xf32>
    %822 = arith.addf %820, %821 : vector<2x32xf32>
    %823 = math.tanh %822 : vector<2x32xf32>
    %824 = arith.mulf %819, %823 : vector<2x32xf32>
    %825 = arith.maximumf %767, %799 : vector<2x32xf32>
    %826 = arith.maximumf %768, %824 : vector<2x32xf32>
    %827 = vector.extract_strided_slice %478 {offsets = [12, 0], sizes = [2, 128], strides = [1, 1]} : vector<16x256xf32> to vector<2x128xf32>
    %cst_157 = arith.constant dense<0.000000e+00> : vector<2x128xf32>
    %828 = tpu.matmul %799, %479, %cst_157 {dimension_numbers = #tpu.dot_dimension_numbers<[1], [0], [0], [1], [0, 0, 1, 1], [], []>} : vector<2x32xf32>, vector<32x128xf32>, vector<2x128xf32> -> vector<2x128xf32>
    %829 = arith.addf %827, %828 : vector<2x128xf32>
    %830 = vector.extract_strided_slice %478 {offsets = [2, 128], sizes = [2, 128], strides = [1, 1]} : vector<16x256xf32> to vector<2x128xf32>
    %cst_158 = arith.constant dense<0.000000e+00> : vector<2x128xf32>
    %831 = tpu.matmul %824, %480, %cst_158 {dimension_numbers = #tpu.dot_dimension_numbers<[1], [0], [0], [1], [0, 0, 1, 1], [], []>} : vector<2x32xf32>, vector<32x128xf32>, vector<2x128xf32> -> vector<2x128xf32>
    %832 = arith.addf %830, %831 : vector<2x128xf32>
    %833 = vector.extract_strided_slice %829 {offsets = [0, 0], sizes = [2, 32], strides = [1, 1]} : vector<2x128xf32> to vector<2x32xf32>
    %834 = arith.negf %833 : vector<2x32xf32>
    %835 = math.exp %834 : vector<2x32xf32>
    %cst_159 = arith.constant 1.000000e+00 : f32
    %836 = vector.broadcast %cst_159 : f32 to vector<2x32xf32>
    %837 = arith.addf %836, %835 : vector<2x32xf32>
    %838 = arith.divf %836, %837 : vector<2x32xf32>
    %839 = vector.extract_strided_slice %829 {offsets = [0, 32], sizes = [2, 32], strides = [1, 1]} : vector<2x128xf32> to vector<2x32xf32>
    %840 = arith.negf %839 : vector<2x32xf32>
    %841 = math.exp %840 : vector<2x32xf32>
    %cst_160 = arith.constant 1.000000e+00 : f32
    %842 = vector.broadcast %cst_160 : f32 to vector<2x32xf32>
    %843 = arith.addf %842, %841 : vector<2x32xf32>
    %844 = arith.divf %842, %843 : vector<2x32xf32>
    %845 = vector.extract_strided_slice %829 {offsets = [0, 64], sizes = [2, 32], strides = [1, 1]} : vector<2x128xf32> to vector<2x32xf32>
    %846 = math.tanh %845 : vector<2x32xf32>
    %847 = vector.extract_strided_slice %829 {offsets = [0, 96], sizes = [2, 32], strides = [1, 1]} : vector<2x128xf32> to vector<2x32xf32>
    %848 = arith.negf %847 : vector<2x32xf32>
    %849 = math.exp %848 : vector<2x32xf32>
    %cst_161 = arith.constant 1.000000e+00 : f32
    %850 = vector.broadcast %cst_161 : f32 to vector<2x32xf32>
    %851 = arith.addf %850, %849 : vector<2x32xf32>
    %852 = arith.divf %850, %851 : vector<2x32xf32>
    %853 = arith.mulf %844, %797 : vector<2x32xf32>
    %854 = arith.mulf %838, %846 : vector<2x32xf32>
    %855 = arith.addf %853, %854 : vector<2x32xf32>
    %856 = math.tanh %855 : vector<2x32xf32>
    %857 = arith.mulf %852, %856 : vector<2x32xf32>
    %858 = vector.extract_strided_slice %832 {offsets = [0, 0], sizes = [2, 32], strides = [1, 1]} : vector<2x128xf32> to vector<2x32xf32>
    %859 = arith.negf %858 : vector<2x32xf32>
    %860 = math.exp %859 : vector<2x32xf32>
    %cst_162 = arith.constant 1.000000e+00 : f32
    %861 = vector.broadcast %cst_162 : f32 to vector<2x32xf32>
    %862 = arith.addf %861, %860 : vector<2x32xf32>
    %863 = arith.divf %861, %862 : vector<2x32xf32>
    %864 = vector.extract_strided_slice %832 {offsets = [0, 32], sizes = [2, 32], strides = [1, 1]} : vector<2x128xf32> to vector<2x32xf32>
    %865 = arith.negf %864 : vector<2x32xf32>
    %866 = math.exp %865 : vector<2x32xf32>
    %cst_163 = arith.constant 1.000000e+00 : f32
    %867 = vector.broadcast %cst_163 : f32 to vector<2x32xf32>
    %868 = arith.addf %867, %866 : vector<2x32xf32>
    %869 = arith.divf %867, %868 : vector<2x32xf32>
    %870 = vector.extract_strided_slice %832 {offsets = [0, 64], sizes = [2, 32], strides = [1, 1]} : vector<2x128xf32> to vector<2x32xf32>
    %871 = math.tanh %870 : vector<2x32xf32>
    %872 = vector.extract_strided_slice %832 {offsets = [0, 96], sizes = [2, 32], strides = [1, 1]} : vector<2x128xf32> to vector<2x32xf32>
    %873 = arith.negf %872 : vector<2x32xf32>
    %874 = math.exp %873 : vector<2x32xf32>
    %cst_164 = arith.constant 1.000000e+00 : f32
    %875 = vector.broadcast %cst_164 : f32 to vector<2x32xf32>
    %876 = arith.addf %875, %874 : vector<2x32xf32>
    %877 = arith.divf %875, %876 : vector<2x32xf32>
    %878 = arith.mulf %869, %822 : vector<2x32xf32>
    %879 = arith.mulf %863, %871 : vector<2x32xf32>
    %880 = arith.addf %878, %879 : vector<2x32xf32>
    %881 = math.tanh %880 : vector<2x32xf32>
    %882 = arith.mulf %877, %881 : vector<2x32xf32>
    %883 = arith.maximumf %825, %857 : vector<2x32xf32>
    %884 = arith.maximumf %826, %882 : vector<2x32xf32>
    %885 = vector.extract_strided_slice %478 {offsets = [14, 0], sizes = [2, 128], strides = [1, 1]} : vector<16x256xf32> to vector<2x128xf32>
    %cst_165 = arith.constant dense<0.000000e+00> : vector<2x128xf32>
    %886 = tpu.matmul %857, %479, %cst_165 {dimension_numbers = #tpu.dot_dimension_numbers<[1], [0], [0], [1], [0, 0, 1, 1], [], []>} : vector<2x32xf32>, vector<32x128xf32>, vector<2x128xf32> -> vector<2x128xf32>
    %887 = arith.addf %885, %886 : vector<2x128xf32>
    %888 = vector.extract_strided_slice %478 {offsets = [0, 128], sizes = [2, 128], strides = [1, 1]} : vector<16x256xf32> to vector<2x128xf32>
    %cst_166 = arith.constant dense<0.000000e+00> : vector<2x128xf32>
    %889 = tpu.matmul %882, %480, %cst_166 {dimension_numbers = #tpu.dot_dimension_numbers<[1], [0], [0], [1], [0, 0, 1, 1], [], []>} : vector<2x32xf32>, vector<32x128xf32>, vector<2x128xf32> -> vector<2x128xf32>
    %890 = arith.addf %888, %889 : vector<2x128xf32>
    %891 = vector.extract_strided_slice %887 {offsets = [0, 0], sizes = [2, 32], strides = [1, 1]} : vector<2x128xf32> to vector<2x32xf32>
    %892 = arith.negf %891 : vector<2x32xf32>
    %893 = math.exp %892 : vector<2x32xf32>
    %cst_167 = arith.constant 1.000000e+00 : f32
    %894 = vector.broadcast %cst_167 : f32 to vector<2x32xf32>
    %895 = arith.addf %894, %893 : vector<2x32xf32>
    %896 = arith.divf %894, %895 : vector<2x32xf32>
    %897 = vector.extract_strided_slice %887 {offsets = [0, 32], sizes = [2, 32], strides = [1, 1]} : vector<2x128xf32> to vector<2x32xf32>
    %898 = arith.negf %897 : vector<2x32xf32>
    %899 = math.exp %898 : vector<2x32xf32>
    %cst_168 = arith.constant 1.000000e+00 : f32
    %900 = vector.broadcast %cst_168 : f32 to vector<2x32xf32>
    %901 = arith.addf %900, %899 : vector<2x32xf32>
    %902 = arith.divf %900, %901 : vector<2x32xf32>
    %903 = vector.extract_strided_slice %887 {offsets = [0, 64], sizes = [2, 32], strides = [1, 1]} : vector<2x128xf32> to vector<2x32xf32>
    %904 = math.tanh %903 : vector<2x32xf32>
    %905 = vector.extract_strided_slice %887 {offsets = [0, 96], sizes = [2, 32], strides = [1, 1]} : vector<2x128xf32> to vector<2x32xf32>
    %906 = arith.negf %905 : vector<2x32xf32>
    %907 = math.exp %906 : vector<2x32xf32>
    %cst_169 = arith.constant 1.000000e+00 : f32
    %908 = vector.broadcast %cst_169 : f32 to vector<2x32xf32>
    %909 = arith.addf %908, %907 : vector<2x32xf32>
    %910 = arith.divf %908, %909 : vector<2x32xf32>
    %911 = arith.mulf %902, %855 : vector<2x32xf32>
    %912 = arith.mulf %896, %904 : vector<2x32xf32>
    %913 = arith.addf %911, %912 : vector<2x32xf32>
    %914 = math.tanh %913 : vector<2x32xf32>
    %915 = arith.mulf %910, %914 : vector<2x32xf32>
    %916 = vector.extract_strided_slice %890 {offsets = [0, 0], sizes = [2, 32], strides = [1, 1]} : vector<2x128xf32> to vector<2x32xf32>
    %917 = arith.negf %916 : vector<2x32xf32>
    %918 = math.exp %917 : vector<2x32xf32>
    %cst_170 = arith.constant 1.000000e+00 : f32
    %919 = vector.broadcast %cst_170 : f32 to vector<2x32xf32>
    %920 = arith.addf %919, %918 : vector<2x32xf32>
    %921 = arith.divf %919, %920 : vector<2x32xf32>
    %922 = vector.extract_strided_slice %890 {offsets = [0, 32], sizes = [2, 32], strides = [1, 1]} : vector<2x128xf32> to vector<2x32xf32>
    %923 = arith.negf %922 : vector<2x32xf32>
    %924 = math.exp %923 : vector<2x32xf32>
    %cst_171 = arith.constant 1.000000e+00 : f32
    %925 = vector.broadcast %cst_171 : f32 to vector<2x32xf32>
    %926 = arith.addf %925, %924 : vector<2x32xf32>
    %927 = arith.divf %925, %926 : vector<2x32xf32>
    %928 = vector.extract_strided_slice %890 {offsets = [0, 64], sizes = [2, 32], strides = [1, 1]} : vector<2x128xf32> to vector<2x32xf32>
    %929 = math.tanh %928 : vector<2x32xf32>
    %930 = vector.extract_strided_slice %890 {offsets = [0, 96], sizes = [2, 32], strides = [1, 1]} : vector<2x128xf32> to vector<2x32xf32>
    %931 = arith.negf %930 : vector<2x32xf32>
    %932 = math.exp %931 : vector<2x32xf32>
    %cst_172 = arith.constant 1.000000e+00 : f32
    %933 = vector.broadcast %cst_172 : f32 to vector<2x32xf32>
    %934 = arith.addf %933, %932 : vector<2x32xf32>
    %935 = arith.divf %933, %934 : vector<2x32xf32>
    %936 = arith.mulf %927, %880 : vector<2x32xf32>
    %937 = arith.mulf %921, %929 : vector<2x32xf32>
    %938 = arith.addf %936, %937 : vector<2x32xf32>
    %939 = math.tanh %938 : vector<2x32xf32>
    %940 = arith.mulf %935, %939 : vector<2x32xf32>
    %941 = arith.maximumf %883, %915 : vector<2x32xf32>
    %942 = arith.maximumf %884, %940 : vector<2x32xf32>
    %943 = vector.extract_strided_slice %0 {offsets = [0, 0], sizes = [2, 32], strides = [1, 1]} : vector<16x32xf32> to vector<2x32xf32>
    %944 = vector.extract_strided_slice %0 {offsets = [2, 0], sizes = [2, 32], strides = [1, 1]} : vector<16x32xf32> to vector<2x32xf32>
    %945 = arith.maximumf %943, %944 : vector<2x32xf32>
    %946 = vector.extract_strided_slice %0 {offsets = [4, 0], sizes = [2, 32], strides = [1, 1]} : vector<16x32xf32> to vector<2x32xf32>
    %947 = arith.maximumf %945, %946 : vector<2x32xf32>
    %948 = vector.extract_strided_slice %0 {offsets = [6, 0], sizes = [2, 32], strides = [1, 1]} : vector<16x32xf32> to vector<2x32xf32>
    %949 = arith.maximumf %947, %948 : vector<2x32xf32>
    %950 = vector.extract_strided_slice %0 {offsets = [8, 0], sizes = [2, 32], strides = [1, 1]} : vector<16x32xf32> to vector<2x32xf32>
    %951 = arith.maximumf %949, %950 : vector<2x32xf32>
    %952 = vector.extract_strided_slice %0 {offsets = [10, 0], sizes = [2, 32], strides = [1, 1]} : vector<16x32xf32> to vector<2x32xf32>
    %953 = arith.maximumf %951, %952 : vector<2x32xf32>
    %954 = vector.extract_strided_slice %0 {offsets = [12, 0], sizes = [2, 32], strides = [1, 1]} : vector<16x32xf32> to vector<2x32xf32>
    %955 = arith.maximumf %953, %954 : vector<2x32xf32>
    %956 = vector.extract_strided_slice %0 {offsets = [14, 0], sizes = [2, 32], strides = [1, 1]} : vector<16x32xf32> to vector<2x32xf32>
    %957 = arith.maximumf %955, %956 : vector<2x32xf32>
    %cst_173 = arith.constant 0.000000e+00 : f32
    %958 = vector.broadcast %cst_173 : f32 to vector<2x32xf32>
    %959 = arith.maximumf %957, %958 : vector<2x32xf32>
    %cst_174 = arith.constant 0.000000e+00 : f32
    %960 = vector.broadcast %cst_174 : f32 to vector<2x32xf32>
    %961 = arith.maximumf %941, %960 : vector<2x32xf32>
    %cst_175 = arith.constant 0.000000e+00 : f32
    %962 = vector.broadcast %cst_175 : f32 to vector<2x32xf32>
    %963 = arith.maximumf %942, %962 : vector<2x32xf32>
    %c0_176 = arith.constant 0 : index
    %c0_177 = arith.constant 0 : index
    %964 = vector.load %arg9[%c0_176, %c0_177] : memref<32x4xf32, #tpu.memory_space<vmem>>, vector<32x4xf32>
    %cst_178 = arith.constant dense<0.000000e+00> : vector<2x4xf32>
    %965 = tpu.matmul %959, %964, %cst_178 {dimension_numbers = #tpu.dot_dimension_numbers<[1], [0], [0], [1], [0, 0, 1, 1], [], []>} : vector<2x32xf32>, vector<32x4xf32>, vector<2x4xf32> -> vector<2x4xf32>
    %c0_179 = arith.constant 0 : index
    %c0_180 = arith.constant 0 : index
    %966 = vector.load %arg10[%c0_179, %c0_180] : memref<32x4xf32, #tpu.memory_space<vmem>>, vector<32x4xf32>
    %cst_181 = arith.constant dense<0.000000e+00> : vector<2x4xf32>
    %967 = tpu.matmul %961, %966, %cst_181 {dimension_numbers = #tpu.dot_dimension_numbers<[1], [0], [0], [1], [0, 0, 1, 1], [], []>} : vector<2x32xf32>, vector<32x4xf32>, vector<2x4xf32> -> vector<2x4xf32>
    %968 = arith.addf %965, %967 : vector<2x4xf32>
    %c0_182 = arith.constant 0 : index
    %c0_183 = arith.constant 0 : index
    %969 = vector.load %arg11[%c0_182, %c0_183] : memref<32x4xf32, #tpu.memory_space<vmem>>, vector<32x4xf32>
    %cst_184 = arith.constant dense<0.000000e+00> : vector<2x4xf32>
    %970 = tpu.matmul %963, %969, %cst_184 {dimension_numbers = #tpu.dot_dimension_numbers<[1], [0], [0], [1], [0, 0, 1, 1], [], []>} : vector<2x32xf32>, vector<32x4xf32>, vector<2x4xf32> -> vector<2x4xf32>
    %971 = arith.addf %968, %970 : vector<2x4xf32>
    %c0_185 = arith.constant 0 : index
    %c0_186 = arith.constant 0 : index
    %972 = vector.load %arg12[%c0_185, %c0_186] : memref<1x4xf32, #tpu.memory_space<vmem>>, vector<1x4xf32>
    %973 = vector.broadcast %972 : vector<1x4xf32> to vector<2x4xf32>
    %974 = arith.addf %971, %973 : vector<2x4xf32>
    %c0_187 = arith.constant 0 : index
    %c0_188 = arith.constant 0 : index
    %975 = vector.load %arg13[%c0_187, %c0_188] : memref<2x4xf32, #tpu.memory_space<vmem>>, vector<2x4xf32>
    tpu.vector_store %arg13[%c0_187, %c0_188], %974 {strides = array<i32>} : memref<2x4xf32, #tpu.memory_space<vmem>>, vector<2x4xf32>,
    return
  }
}

</mosaic_0001>

<bundles_post_ra>
// kernel: tpu_custom_call.1
= control target key start
LH: loop header
LB: loop body
LE: loop exit
PB: predicated region body
PF: predicated region fallthrough
CT: control target
= control target key end

     0   :  { %18 = vsyncpa [#allocation4], 0  ;;  %s6330_s0 = inlined_call_operand.hbm [shape: f32[16,32], index: 0, kind: input, shape index: {}]   ;;  %s6331_s1 = inlined_call_operand.vmem [shape: f32[32,256], index: 1, kind: input, shape index: {}]   ;;  %s6332_s2 = inlined_call_operand.vmem [shape: f32[32,128], index: 2, kind: input, shape index: {}]   ;;  %s6333_s3 = inlined_call_operand.hbm [shape: f32[32,128], index: 3, kind: input, shape index: {}]   ;;  %s6334_s4 = inlined_call_operand.vmem [shape: f32[1,256], index: 4, kind: input, shape index: {}]   ;;  %s6335_s5 = inlined_call_operand.hbm [shape: f32[64,256], index: 5, kind: input, shape index: {}]   ;;  %s6336_s6 = inlined_call_operand.vmem [shape: f32[32,128], index: 6, kind: input, shape index: {}]   ;;  %s6337_s7 = inlined_call_operand.hbm [shape: f32[32,128], index: 7, kind: input, shape index: {}]   ;;  %s6338_s8 = inlined_call_operand.hbm [shape: f32[1,256], index: 8, kind: input, shape index: {}]   ;;  %s6339_s9 = inlined_call_operand.vmem [shape: f32[32,4], index: 9, kind: input, shape index: {}]   ;;  %s6340_s10 = inlined_call_operand.vmem [shape: f32[32,4], index: 10, kind: input, shape index: {}]   ;;  %s6341_s11 = inlined_call_operand.vmem [shape: f32[32,4], index: 11, kind: input, shape index: {}]   ;;  %s6342_s12 = inlined_call_operand.vmem [shape: f32[1,4], index: 12, kind: input, shape index: {}]   ;;  %s6343_s13 = inlined_call_operand.hbm [shape: f32[2,4], index: 13, kind: output, shape index: {}]  }
   0x1   :  { %19 = vsyncpa [#allocation7], 0 }
   0x2   :  { %20 = vsyncpa [#allocation10], 0 }
   0x3   :  { %21 = vsyncpa [#allocation5], 0  ;;  %s5373_s25 = smov [#allocation6]   ;;  %s5374_s27 = smov [#allocation9]  }
   0x4   :  { %s43_s26 = sshll.u32 %s5373_s25, 4  ;;  %s71_s28 = sshll.u32 %s5374_s27, 4  ;;  %s44_s26 = int_to_ptr.vmem [resolvable:$true] %s43_s26  ;;  %s5458_s28 = int_to_ptr.vmem [resolvable:$true] %s71_s28 }
   0x5   :  { %s5233_s14 = scalar_lea.hbm %s6333_s3, 512 }
   0x6   :  { %p5234_p0 = scmp.ne.s32.totalorder %s6333_s3, %s5233_s14  ;;  %p5237_p1 = scmp.lt.u32.totalorder %s5233_s14, %s6333_s3 }
   0x8   :  { %p5239_p2 = pnand %p5237_p1, %p5234_p0 }
   0xa   :  { %5242 = shalt.err (!%p5239_p2)
}
   0xb   :  { %s5243_s19 = scalar_lea.vmem %s44_s26, 512  ;;  %p5248_p4 = scmp.lt.s32.totalorder %s44_s26, %s44_s26 }
   0xc   :  { %p5244_p3 = scmp.ne.s32.totalorder %s44_s26, %s5243_s19  ;;  %p5249_p5 = scmp.lt.s32.totalorder %s5243_s19, %s5243_s19 }
   0xe   :  { %p5250_p6 = por %p5249_p5, %p5248_p4 }
  0x10   :  { %p5251_p7 = pnand %p5250_p6, %p5244_p3 }
  0x12   :  { %5254 = shalt.err (!%p5251_p7)
}
  0x13   :  { %s5375_s20 = smov 128   ;;  %s5376_s21 = smov 8  }
  0x14   :  { %49 = dma.hbm_to_vmem [thread:$0]  %s6333_s3, 512, %s44_s26, [#allocation7], %s5375_s20, %s5375_s20, %s5376_s21  }
  0x15   :  { %s5255_s27 = scalar_lea.hbm %s6337_s7, 512 }
  0x16   :  { %p5256_p8 = scmp.ne.s32.totalorder %s6337_s7, %s5255_s27  ;;  %p5259_p9 = scmp.lt.u32.totalorder %s5255_s27, %s6337_s7 }
  0x18   :  { %p5261_p10 = pnand %p5259_p9, %p5256_p8 }
  0x1a   :  { %5264 = shalt.err (!%p5261_p10)
}
  0x1b   :  { %s5265_s16 = scalar_lea.vmem %s5458_s28, 512  ;;  %p5270_p12 = scmp.lt.s32.totalorder %s5458_s28, %s5458_s28 }
  0x1c   :  { %p5266_p11 = scmp.ne.s32.totalorder %s5458_s28, %s5265_s16  ;;  %p5271_p13 = scmp.lt.s32.totalorder %s5265_s16, %s5265_s16 }
  0x1e   :  { %p5272_p0 = por %p5271_p13, %p5270_p12 }
  0x20   :  { %p5273_p1 = pnand %p5272_p0, %p5266_p11 }
  0x22   :  { %5276 = shalt.err (!%p5273_p1)
}
  0x23   :  { %77 = dma.hbm_to_vmem [thread:$0]  %s6337_s7, 512, %s5458_s28, [#allocation10], %s5375_s20, %s5375_s20, %s5376_s21  }
  0x24   :  { %s5377_s17 = smov [#allocation3]   ;;  %s5378_s19 = smov [#allocation8]  }
  0x25   :  { %s27_s18 = sshll.u32 %s5377_s17, 4  ;;  %s57_s22 = sshll.u32 %s5378_s19, 4  ;;  %s28_s18 = int_to_ptr.vmem [resolvable:$true] %s27_s18  ;;  %s5495_s22 = int_to_ptr.vmem [resolvable:$true] %s57_s22 }
  0x26   :  { %s5277_s25 = scalar_lea.hbm %s6330_s0, 256 }
  0x27   :  { %p5278_p2 = scmp.ne.s32.totalorder %s6330_s0, %s5277_s25  ;;  %p5281_p3 = scmp.lt.u32.totalorder %s5277_s25, %s6330_s0 }
  0x29   :  { %p5283_p4 = pnand %p5281_p3, %p5278_p2 }
  0x2b   :  { %5286 = shalt.err (!%p5283_p4)
}
  0x2c   :  { %s5287_s7 = scalar_lea.vmem %s28_s18, 256  ;;  %p5292_p6 = scmp.lt.s32.totalorder %s28_s18, %s28_s18 }
  0x2d   :  { %p5288_p5 = scmp.ne.s32.totalorder %s28_s18, %s5287_s7  ;;  %p5293_p7 = scmp.lt.s32.totalorder %s5287_s7, %s5287_s7 }
  0x2f   :  { %p5294_p8 = por %p5293_p7, %p5292_p6 }
  0x31   :  { %p5295_p9 = pnand %p5294_p8, %p5288_p5 }
  0x33   :  { %5298 = shalt.err (!%p5295_p9)
}
  0x34   :  { %33 = dma.hbm_to_vmem [thread:$0]  %s6330_s0, 256, %s28_s18, [#allocation4], %s5375_s20, %s5375_s20, %s5376_s21  }
  0x35   :  { %s5299_s26 = scalar_lea.hbm %s6335_s5, 2048 }
  0x36   :  { %p5300_p10 = scmp.ne.s32.totalorder %s6335_s5, %s5299_s26  ;;  %p5303_p11 = scmp.lt.u32.totalorder %s5299_s26, %s6335_s5 }
  0x38   :  { %p5305_p12 = pnand %p5303_p11, %p5300_p10 }
  0x3a   :  { %5308 = shalt.err (!%p5305_p12)
}
  0x3b   :  { %s5309_s25 = scalar_lea.vmem %s5495_s22, 2048  ;;  %p5314_p0 = scmp.lt.s32.totalorder %s5495_s22, %s5495_s22 }
  0x3c   :  { %p5310_p13 = scmp.ne.s32.totalorder %s5495_s22, %s5309_s25  ;;  %p5315_p1 = scmp.lt.s32.totalorder %s5309_s25, %s5309_s25 }
  0x3e   :  { %p5316_p2 = por %p5315_p1, %p5314_p0 }
  0x40   :  { %p5317_p3 = pnand %p5316_p2, %p5310_p13 }
  0x42   :  { %5320 = shalt.err (!%p5317_p3)
}
  0x43   :  { %s5379_s0 = smov 256   ;;  %s5380_s20 = smov 16  }
  0x44   :  { %63 = dma.hbm_to_vmem [thread:$0]  %s6335_s5, 2048, %s5495_s22, [#allocation7], %s5379_s0, %s5379_s0, %s5380_s20  }
  0x45   :  { %s5381_s27 = smov [#allocation11]   ;;  %s5321_s7 = scalar_lea.hbm %s6338_s8, 32 }
  0x46   :  { %s84_s29 = sshll.u32 %s5381_s27, 4  ;;  %p5322_p4 = scmp.ne.s32.totalorder %s6338_s8, %s5321_s7  ;;  %s85_s29 = int_to_ptr.vmem [resolvable:$true] %s84_s29 }
  0x47   :  { %p5325_p5 = scmp.lt.u32.totalorder %s5321_s7, %s6338_s8 }
  0x49   :  { %p5327_p6 = pnand %p5325_p5, %p5322_p4 }
  0x4b   :  { %5330 = shalt.err (!%p5327_p6)
}
  0x4c   :  { %s5331_s26 = scalar_lea.vmem %s85_s29, 32  ;;  %p5336_p8 = scmp.lt.s32.totalorder %s85_s29, %s85_s29 }
  0x4d   :  { %p5332_p7 = scmp.ne.s32.totalorder %s85_s29, %s5331_s26  ;;  %p5337_p9 = scmp.lt.s32.totalorder %s5331_s26, %s5331_s26 }
  0x4f   :  { %p5338_p10 = por %p5337_p9, %p5336_p8 }
  0x51   :  { %p5339_p11 = pnand %p5338_p10, %p5332_p7 }
  0x53   :  { %5342 = shalt.err (!%p5339_p11)
}
  0x54   :  { %87 = dma.hbm_to_vmem [thread:$0]  %s6338_s8, 32, %s85_s29, [#allocation10]  }
  0x55   :  { %5365 = dma.done.wait [#allocation4], 256  }
  0x56   :  { %5366 = vsyncadd [#allocation4], 4294967040 }
  0x57   :  { %5367 = dma.done.wait [#allocation7], 2560  }
  0x58   :  { %5368 = vsyncadd [#allocation7], 4294964736 }
  0x59   :  { %5369 = dma.done.wait [#allocation10], 544  }
  0x5a   :  { %5370 = vsyncadd [#allocation10], 4294966752  ;;  %v5382_v0 = vmov 0.0|0.0   ;;  %v5383_v1 = vmov 0.0   ;;  %vm5384_vm0 = vmmov 0   ;;  %v114_v2 = vld [vmem:[%s6331_s1 + $0x8] sm:$0xff]  ;;  %v123_v39 = vlaneseq }
  0x5b   :  { %4735 = vmatprep.subr.bf16.mxu1 %v5382_v0  ;;  %204 = vmatprep.mubr.f32.mxu0 %v5383_v1  ;;  %v116_v3 = vld [vmem:[%s6331_s1 + $0x18] sm:$0xff]  ;;  %v113_v4 = vld [vmem:[%s6331_s1] sm:$0xff]  ;;  %v115_v6 = vld [vmem:[%s6331_s1 + $0x10] sm:$0xff]  ;;  %vm133_vm1 = vcmask 261120   ;;  %s5386_s8 = smov 32   ;;  %vm425_vm2 = vcmask 254976  }
  0x5c   :  { %4350 = vmatprep.mubr.msk.f32.mxu1 %vm5384_vm0, %v5383_v1  ;;  %v4727_v5 = vpack.c.bf16 %v116_v3, %v114_v2  ;;  %v118_v7 = vld [vmem:[%s6331_s1 + $0x28] sm:$0xff]  ;;  %v120_v8 = vld [vmem:[%s6331_s1 + $0x38] sm:$0xff]  ;;  %v4729_v9 = vpack.c.bf16 %v115_v6, %v113_v4  ;;  %v217_v11 = vld [vmem:[%s6332_s2] sm:$0xff]  ;;  %v5619_v40 = vshrl.u32 %v123_v39, 7  ;;  %vm646_vm3 = vcmask 257026   ;;  %s5387_s21 = smov [#allocation12]  }
  0x5d   :  { %v4731_v10 = vpack.c.bf16 %v120_v8, %v118_v7  ;;  %v218_v12 = vld [vmem:[%s6332_s2 + $0x8] sm:$0xff]  ;;  %v117_v13 = vld [vmem:[%s6331_s1 + $0x20] sm:$0xff]  ;;  %v119_v15 = vld [vmem:[%s6331_s1 + $0x30] sm:$0xff]  ;;  %vm1091_vm4 = vcmask 261126   ;;  %vm870_vm5 = vcmask 259076   ;;  %vm652_vm6 = vcmask 521476  }
  0x5e   :  { %4728 = vmatprep.subr.bf16.mxu0 %v4727_v5  ;;  %v5572_v14 = vpack.c.bf16 %v218_v12, %v217_v11  ;;  %v111_v16 = vld [vmem:[#allocation3] sm:$0xff]  ;;  %v4733_v18 = vpack.c.bf16 %v119_v15, %v117_v13  ;;  %v220_v21 = vld [vmem:[%s6332_s2 + $0x18] sm:$0xff]  ;;  %v221_v23 = vld [vmem:[#allocation6] sm:$0xff]  ;;  %v129_v41 = vsub.s32 1, %v5619_v40  ;;  %v125_v44 = vsub.s32 0, %v5619_v40  ;;  %s4088_s18 = sshll.u32 %s5387_s21, 4  ;;  %s4089_s18 = int_to_ptr.vmem [resolvable:$true] %s4088_s18 }
  0x5f   :  { %v219_v17 = vld [vmem:[%s6332_s2 + $0x10] sm:$0xff]  ;;  %4730 = vmatpush1.bf16.msra.mxu0 %v4729_v9  ;;  %v3813_v19 = vrot.slane %v111_v16, 2  ;;  %v3816_v20 = vrot.slane %v111_v16, 4  ;;  %v222_v24 = vld [vmem:[#allocation6 + $0x8] sm:$0xff]  ;;  %v3819_v26 = vrot.slane %v111_v16, 6  ;;  %v112_v29 = vld [vmem:[#allocation3 + $0x8] sm:$0xff]  ;;  %p5348_p13 = scmp.lt.s32.totalorder %s4089_s18, %s4089_s18 }
  0x60   :  { %4732 = vmatprep.subr.bf16.mxu0 %v4731_v10  ;;  %4737 = vmatpush3.bf16.msra.mxu1 %v5572_v14  ;;  %v5584_v22 = vpack.c.bf16 %v220_v21, %v219_v17  ;;  %v5587_v28 = vpack.c.bf16 %v222_v24, %v221_v23  ;;  %v223_v30 = vld [vmem:[#allocation6 + $0x10] sm:$0xff]  ;;  %v224_v31 = vld [vmem:[#allocation6 + $0x18] sm:$0xff]  ;;  %v3823_v33 = vrot.slane %v112_v29, 2  ;;  %v3826_v35 = vrot.slane %v112_v29, 4  ;;  %v121_v42 = vld [vmem:[%s6334_s4] sm:$0x3] }
  0x61   :  { %4738 = vmatprep.subr.bf16.mxu1 %v5382_v0  ;;  %v3815_v25 = vmax.f32 %v111_v16, %v3813_v19  ;;  %v5595_v36 = vpack.c.bf16 %v224_v31, %v223_v30  ;;  %v130_v43 = vrot.slane %v121_v42, %v129_v41  ;;  %v126_v49 = vrot.slane %v121_v42, %v125_v44  ;;  %s5385_s4 = smov 64   ;;  %s5343_s27 = scalar_lea.vmem %s4089_s18, 32 }
  0x62   :  { %vm431_vm7 = vcmask 523526   ;;  %vm876_vm8 = vcmask 519426   ;;  %vm1097_vm9 = vcmask 517376   ;;  %vm2007_vm10 = vcmask 523264   ;;  %p5344_p12 = scmp.ne.s32.totalorder %s4089_s18, %s5343_s27  ;;  %p5349_p0 = scmp.lt.s32.totalorder %s5343_s27, %s5343_s27 }
  0x63   :  { %4734 = vmatpush1.bf16.msra.mxu0 %v4733_v18  ;;  %v3818_v27 = vmax.f32 %v3815_v25, %v3816_v20  ;;  %vm4080_vm11 = vcmask 25600  }
  0x64   :  { %4740 = vmatpush3.bf16.msra.mxu1 %v5584_v22  ;;  %4741 = vmatprep.subr.bf16.mxu0 %v5382_v0  ;;  %p5350_p1 = por %p5349_p0, %p5348_p13 }
  0x65   :  { %v3821_v32 = vmax.f32 %v3818_v27, %v3819_v26  ;;  %4747 = vmatprep.subr.bf16.mxu1 %v5382_v0 }
  0x66   :  { %4099 = vmatmul.mubr.msk.f32.vlgmr.msra.gmra.mrb[0].mxu0 %vm133_vm1, %v111_v16  ;;  %p5351_p2 = pnand %p5350_p1, %p5344_p12 }
  0x67   :  { %4743 = vmatpush3.bf16.msra.mxu0 %v5587_v28  ;;  %210 = vmatprep.mubr.f32.mxu0 %v5383_v1  ;;  %v3822_v34 = vmax.f32 %v3821_v32, %v112_v29 }
  0x68   :  { %4351 = vmatmul.mubr.f32.vlgmr.msra.gmra.mrb[0].mxu1 %v5383_v1  ;;  %4744 = vmatprep.subr.bf16.mxu0 %v5382_v0 }
  0x69   :  { %v3825_v37 = vmax.f32 %v3822_v34, %v3823_v33  ;;  %4749 = vmatpush3.bf16.msra.mxu1 %v5572_v14  ;;  %4372 = vmatprep.mubr.msk.f32.mxu1 %vm5384_vm0, %v5383_v1 }
  0x6a   :  { %4100 = vmatmul.mubr.msk.f32.gmra.mrb[2].mxu0 %vm133_vm1, %v112_v29  ;;  %4750 = vmatprep.subr.bf16.mxu1 %v5382_v0 }
  0x6b   :  { %v5604_v38 = vmax.f32 %v3825_v37, %v3826_v35  ;;  %4746 = vmatpush3.bf16.msra.mxu0 %v5595_v36  ;;  %4361 = vmatprep.mubr.msk.f32.mxu0 %vm5384_vm0, %v5383_v1 }
  0x6c   :  { %4753 = vmatprep.subr.bf16.mxu0 %v5382_v0 }
  0x6d   :  { %4752 = vmatpush3.bf16.msra.mxu1 %v5584_v22 }
  0x6e   :  { %4362 = vmatmul.mubr.f32.vlgmr.msra.gmra.mrb[4].mxu0 %v5383_v1  ;;  %4759 = vmatprep.subr.bf16.mxu1 %v5382_v0 }
  0x6f   :  { %4755 = vmatpush3.bf16.msra.mxu0 %v5587_v28  ;;  %4383 = vmatprep.mubr.msk.f32.mxu0 %vm5384_vm0, %v5383_v1 }
  0x70   :  { %4756 = vmatprep.subr.bf16.mxu0 %v5382_v0 }
  0x73   :  { %4758 = vmatpush3.bf16.msra.mxu0 %v5595_v36 }
  0x74   :  { %4765 = vmatprep.subr.bf16.mxu0 %v5382_v0 }
 0x139   :  { %v206_v45 = vpop.f32.mrb[0].mxu0 }
 0x13a   :  { %v208_v46 = vpop.f32.mrb[1].mxu0  ;;  %v5634_v55 = vadd.f32 %v206_v45, %v126_v49 }
 0x13b   :  { %v5628_v47 = vadd.f32 %v208_v46, %v130_v43  ;;  %v294_v48 = vpop.f32.mrb[0].mxu1 }
 0x13c   :  { %v4352_v50 = vpop.f32.mrb[1].mxu1  ;;  %v298_v60 = vadd.f32 %v294_v48, %v5634_v55 }
 0x13d   :  { %v212_v51 = vpop.f32.mrb[2].mxu0 }
 0x13e   :  { %v5632_v52 = vadd.f32 %v212_v51, %v126_v49  ;;  %v214_v53 = vpop.f32.mrb[3].mxu0  ;;  %v4101_v2 = vmul.f32 -1.442695, %v298_v60 }
 0x13f   :  { %v5636_v56 = vadd.f32 %v214_v53, %v130_v43 }
 0x141   :  { %v365_v54 = vpop.f32.mrb[4].mxu0 }
 0x142   :  { %v370_v57 = vrot.slane %v365_v54, 2  ;;  %v4363_v58 = vpop.f32.mrb[5].mxu0 }
 0x144   :  { %v372_v59 = vadd.f32 %v370_v57, %v5636_v56 }
 0x146   :  { %4976 = vtanh.f32 %v372_v59  ;;  %v4102_v63 = vmul.f32 -1.442695, %v372_v59 }
 0x147   :  { %4978 = vtanh.f32 %v298_v60 }
 0x148   :  { %4980 = vpow2.f32 %v4102_v63 }
 0x149   :  { %4982 = vpow2.f32 %v4101_v2 }
 0x150   :  { %v4977_v61 = vpop.eup %4976 }
 0x151   :  { %406 = vrot.lane.b32.xlu0 %v4977_v61, %s5385_s4  ;;  %v4979_v62 = vpop.eup %4978 }
 0x152   :  { %v4981_v3 = vpop.eup %4980 }
 0x153   :  { %v400_v4 = vadd.f32 1.0, %v4981_v3  ;;  %v4983_v5 = vpop.eup %4982 }
 0x154   :  { %v376_v6 = vadd.f32 1.0, %v4983_v5 }
 0x155   :  { %382 = vrot.lane.b32.xlu0 %v4979_v62, %s5385_s4  ;;  %4984 = vrcp.f32 %v400_v4 }
 0x156   :  { %4986 = vrcp.f32 %v376_v6 }
 0x15f   :  { %v4985_v7 = vpop.eup %4984 }
 0x160   :  { %v4987_v10 = vpop.eup %4986  ;;  %v404_v13 = vmul.f32 0.0, %v4985_v7 }
 0x161   :  { %v380_v17 = vmul.f32 0.0, %v4987_v10 }
 0x1c3   :  { %v407_v8 = vpop.permute.xlu0 %406 }
 0x1c4   :  { %v409_v9 = vmul.f32 %v4985_v7, %v407_v8 }
 0x1c6   :  { %411 = vrot.lane.b32.xlu1 %v409_v9, %s5386_s8 }
 0x1c7   :  { %v383_v11 = vpop.permute.xlu0 %382 }
 0x1c8   :  { %v385_v12 = vmul.f32 %v4987_v10, %v383_v11 }
 0x1ca   :  { %387 = vrot.lane.b32.xlu1 %v385_v12, %s5386_s8 }
 0x238   :  { %v412_v15 = vpop.permute.xlu1 %411 }
 0x239   :  { %v5644_v16 = vadd.f32 %v412_v15, %v404_v13 }
 0x23b   :  { %4988 = vtanh.f32 %v5644_v16  ;;  %v623_v62 = vrot.slane %v5644_v16, 2 }
 0x23c   :  { %v388_v18 = vpop.permute.xlu1 %387 }
 0x23d   :  { %v5647_v19 = vadd.f32 %v388_v18, %v380_v17 }
 0x23f   :  { %4990 = vtanh.f32 %v5647_v19  ;;  %v596_v2 = vrot.slane %v5647_v19, 6 }
 0x245   :  { %v4989_v20 = vpop.eup %4988 }
 0x246   :  { %417 = vrot.lane.b32.xlu0 %v4989_v20, %s5385_s4 }
 0x249   :  { %v4991_v21 = vpop.eup %4990 }
 0x24a   :  { %393 = vrot.lane.b32.xlu1 %v4991_v21, %s5385_s4 }
 0x2b8   :  { %v418_v23 = vpop.permute.xlu0 %417 }
 0x2b9   :  { %v5652_v24 = vmul.f32 %v4985_v7, %v418_v23 }
 0x2bb   :  { %v509_v25 = vrot.slane %v5652_v24, 6 }
 0x2bc   :  { %v394_v26 = vpop.permute.xlu1 %393 }
 0x2bd   :  { %v396_v27 = vmul.f32 %v4987_v10, %v394_v26  ;;  %510 = vrot.lane.b32.xlu0 %v509_v25, %s5386_s8 }
 0x2bf   :  { %422 = vrot.lane.b32.xlu1 %v396_v27, %s5386_s8 }
 0x32f   :  { %v511_v29 = vpop.permute.xlu0 %510 }
 0x330   :  { %4384 = vmatmul.mubr.msk.f32.vlgmr.msra.gmra.mrb[6].mxu0 %vm133_vm1, %v511_v29 }
 0x331   :  { %v423_v30 = vpop.permute.xlu1 %422  ;;  %4767 = vmatpush3.bf16.msra.mxu0 %v5587_v28  ;;  %4405 = vmatprep.mubr.msk.f32.mxu0 %vm5384_vm0, %v5383_v1 }
 0x332   :  { %426 = vst.msk [vmem:[#allocation2] sm:$0x3] %vm425_vm2, %v423_v30  ;;  %4373 = vmatmul.mubr.msk.f32.vlgmr.msra.gmra.mrb[2].mxu1 %vm133_vm1, %v423_v30  ;;  %4768 = vmatprep.subr.bf16.mxu0 %v5382_v0 }
 0x333   :  { %4761 = vmatpush3.bf16.msra.mxu1 %v5572_v14  ;;  %4394 = vmatprep.mubr.msk.f32.mxu1 %vm5384_vm0, %v5383_v1 }
 0x334   :  { %4762 = vmatprep.subr.bf16.mxu1 %v5382_v0 }
 0x335   :  { %4770 = vmatpush3.bf16.msra.mxu0 %v5595_v36 }
 0x336   :  { %4777 = vmatprep.subr.bf16.mxu0 %v5382_v0 }
 0x337   :  { %4764 = vmatpush3.bf16.msra.mxu1 %v5584_v22 }
 0x338   :  { %4771 = vmatprep.subr.bf16.mxu1 %v5382_v0 }
 0x403   :  { %v580_v31 = vpop.f32.mrb[6].mxu0 }
 0x404   :  { %v585_v32 = vrot.slane %v580_v31, 4  ;;  %v4385_v33 = vpop.f32.mrb[7].mxu0 }
 0x405   :  { %v501_v34 = vpop.f32.mrb[2].mxu1 }
 0x406   :  { %v587_v35 = vadd.f32 %v585_v32, %v5636_v56  ;;  %v506_v37 = vrot.slane %v501_v34, 6  ;;  %v4374_v39 = vpop.f32.mrb[3].mxu1 }
 0x408   :  { %4992 = vtanh.f32 %v587_v35  ;;  %v508_v42 = vadd.f32 %v506_v37, %v5634_v55  ;;  %v4106_v46 = vmul.f32 -1.442695, %v587_v35 }
 0x40a   :  { %4994 = vtanh.f32 %v508_v42  ;;  %v4105_v48 = vmul.f32 -1.442695, %v508_v42 }
 0x40b   :  { %4996 = vpow2.f32 %v4106_v46 }
 0x40c   :  { %4998 = vpow2.f32 %v4105_v48 }
 0x412   :  { %v4993_v43 = vpop.eup %4992 }
 0x413   :  { %627 = vrot.lane.b32.xlu0 %v4993_v43, %s5385_s4 }
 0x414   :  { %v4995_v45 = vpop.eup %4994 }
 0x415   :  { %600 = vrot.lane.b32.xlu1 %v4995_v45, %s5385_s4  ;;  %v4997_v49 = vpop.eup %4996 }
 0x416   :  { %v4999_v50 = vpop.eup %4998  ;;  %v618_v51 = vadd.f32 1.0, %v4997_v49 }
 0x417   :  { %v591_v53 = vadd.f32 1.0, %v4999_v50 }
 0x418   :  { %5000 = vrcp.f32 %v618_v51 }
 0x419   :  { %5002 = vrcp.f32 %v591_v53 }
 0x422   :  { %v5001_v54 = vpop.eup %5000 }
 0x423   :  { %v5003_v59 = vpop.eup %5002  ;;  %v625_v63 = vmul.f32 %v5001_v54, %v623_v62 }
 0x424   :  { %v598_v5 = vmul.f32 %v5003_v59, %v596_v2 }
 0x485   :  { %v628_v57 = vpop.permute.xlu0 %627 }
 0x486   :  { %v630_v58 = vmul.f32 %v5001_v54, %v628_v57 }
 0x487   :  { %v601_v60 = vpop.permute.xlu1 %600 }
 0x488   :  { %632 = vrot.lane.b32.xlu0 %v630_v58, %s5386_s8  ;;  %v603_v61 = vmul.f32 %v5003_v59, %v601_v60 }
 0x48a   :  { %605 = vrot.lane.b32.xlu1 %v603_v61, %s5386_s8 }
 0x4fa   :  { %v633_v3 = vpop.permute.xlu0 %632 }
 0x4fb   :  { %v5680_v4 = vadd.f32 %v633_v3, %v625_v63 }
 0x4fc   :  { %v606_v6 = vpop.permute.xlu1 %605 }
 0x4fd   :  { %5004 = vtanh.f32 %v5680_v4  ;;  %v5683_v7 = vadd.f32 %v606_v6, %v598_v5  ;;  %v847_v50 = vrot.slane %v5680_v4, 2 }
 0x4ff   :  { %5006 = vtanh.f32 %v5683_v7  ;;  %v820_v53 = vrot.slane %v5683_v7, 6 }
 0x507   :  { %v5005_v8 = vpop.eup %5004 }
 0x508   :  { %638 = vrot.lane.b32.xlu0 %v5005_v8, %s5385_s4 }
 0x509   :  { %v5007_v9 = vpop.eup %5006 }
 0x50a   :  { %611 = vrot.lane.b32.xlu1 %v5007_v9, %s5385_s4 }
 0x57a   :  { %v639_v10 = vpop.permute.xlu0 %638 }
 0x57b   :  { %v5688_v11 = vmul.f32 %v5001_v54, %v639_v10 }
 0x57c   :  { %v612_v13 = vpop.permute.xlu1 %611 }
 0x57d   :  { %v733_v12 = vrot.slane %v5688_v11, 4  ;;  %v5691_v15 = vmul.f32 %v5003_v59, %v612_v13 }
 0x57f   :  { %734 = vrot.lane.b32.xlu0 %v733_v12, %s5386_s8  ;;  %v654_v16 = vrot.slane %v5691_v15, 2 }
 0x581   :  { %655 = vrot.lane.b32.xlu1 %v654_v16, %s5386_s8 }
 0x5f1   :  { %v735_v17 = vpop.permute.xlu0 %734 }
 0x5f2   :  { %4406 = vmatmul.mubr.msk.f32.vlgmr.msra.gmra.mrb[8].mxu0 %vm133_vm1, %v735_v17 }
 0x5f3   :  { %4779 = vmatpush3.bf16.msra.mxu0 %v5587_v28  ;;  %4427 = vmatprep.mubr.msk.f32.mxu0 %vm5384_vm0, %v5383_v1  ;;  %v656_v18 = vpop.permute.xlu1 %655 }
 0x5f4   :  { %4780 = vmatprep.subr.bf16.mxu0 %v5382_v0  ;;  %4395 = vmatmul.mubr.msk.f32.vlgmr.msra.gmra.mrb[4].mxu1 %vm133_vm1, %v656_v18 }
 0x5f5   :  { %4773 = vmatpush3.bf16.msra.mxu1 %v5572_v14  ;;  %4416 = vmatprep.mubr.msk.f32.mxu1 %vm5384_vm0, %v5383_v1 }
 0x5f6   :  { %4774 = vmatprep.subr.bf16.mxu1 %v5382_v0 }
 0x5f7   :  { %4782 = vmatpush3.bf16.msra.mxu0 %v5595_v36 }
 0x5f8   :  { %4789 = vmatprep.subr.bf16.mxu0 %v5382_v0 }
 0x5f9   :  { %4776 = vmatpush3.bf16.msra.mxu1 %v5584_v22 }
 0x5fa   :  { %4783 = vmatprep.subr.bf16.mxu1 %v5382_v0 }
 0x6c5   :  { %v804_v19 = vpop.f32.mrb[8].mxu0 }
 0x6c6   :  { %v809_v20 = vrot.slane %v804_v19, 6  ;;  %v4407_v21 = vpop.f32.mrb[9].mxu0 }
 0x6c7   :  { %v725_v25 = vpop.f32.mrb[4].mxu1 }
 0x6c8   :  { %v811_v23 = vadd.f32 %v809_v20, %v5636_v56  ;;  %v730_v26 = vrot.slane %v725_v25, 4  ;;  %v4396_v27 = vpop.f32.mrb[5].mxu1 }
 0x6ca   :  { %5008 = vtanh.f32 %v811_v23  ;;  %v732_v29 = vadd.f32 %v730_v26, %v5634_v55  ;;  %v4110_v32 = vmul.f32 -1.442695, %v811_v23 }
 0x6cc   :  { %5010 = vtanh.f32 %v732_v29  ;;  %v4109_v33 = vmul.f32 -1.442695, %v732_v29 }
 0x6cd   :  { %5012 = vpow2.f32 %v4110_v32 }
 0x6ce   :  { %5014 = vpow2.f32 %v4109_v33 }
 0x6d4   :  { %v5009_v30 = vpop.eup %5008 }
 0x6d5   :  { %851 = vrot.lane.b32.xlu0 %v5009_v30, %s5385_s4 }
 0x6d6   :  { %v5011_v31 = vpop.eup %5010 }
 0x6d7   :  { %824 = vrot.lane.b32.xlu1 %v5011_v31, %s5385_s4  ;;  %v5013_v34 = vpop.eup %5012 }
 0x6d8   :  { %v5015_v35 = vpop.eup %5014  ;;  %v842_v37 = vadd.f32 1.0, %v5013_v34 }
 0x6d9   :  { %v815_v39 = vadd.f32 1.0, %v5015_v35 }
 0x6da   :  { %5016 = vrcp.f32 %v842_v37 }
 0x6db   :  { %5018 = vrcp.f32 %v815_v39 }
 0x6e4   :  { %v5017_v42 = vpop.eup %5016 }
 0x6e5   :  { %v5019_v46 = vpop.eup %5018  ;;  %v849_v51 = vmul.f32 %v5017_v42, %v847_v50 }
 0x6e6   :  { %v822_v58 = vmul.f32 %v5019_v46, %v820_v53 }
 0x747   :  { %v852_v43 = vpop.permute.xlu0 %851 }
 0x748   :  { %v854_v45 = vmul.f32 %v5017_v42, %v852_v43 }
 0x749   :  { %v825_v48 = vpop.permute.xlu1 %824 }
 0x74a   :  { %856 = vrot.lane.b32.xlu0 %v854_v45, %s5386_s8  ;;  %v827_v49 = vmul.f32 %v5019_v46, %v825_v48 }
 0x74c   :  { %829 = vrot.lane.b32.xlu1 %v827_v49, %s5386_s8 }
 0x7bc   :  { %v857_v54 = vpop.permute.xlu0 %856 }
 0x7bd   :  { %v5718_v57 = vadd.f32 %v857_v54, %v849_v51 }
 0x7be   :  { %v830_v59 = vpop.permute.xlu1 %829 }
 0x7bf   :  { %5020 = vtanh.f32 %v5718_v57  ;;  %v5721_v60 = vadd.f32 %v830_v59, %v822_v58  ;;  %v1068_v34 = vrot.slane %v5718_v57, 2 }
 0x7c1   :  { %5022 = vtanh.f32 %v5721_v60 }
 0x7c9   :  { %v5021_v61 = vpop.eup %5020 }
 0x7ca   :  { %862 = vrot.lane.b32.xlu0 %v5021_v61, %s5385_s4 }
 0x7cb   :  { %v5023_v62 = vpop.eup %5022 }
 0x7cc   :  { %835 = vrot.lane.b32.xlu1 %v5023_v62, %s5385_s4 }
 0x83c   :  { %v863_v63 = vpop.permute.xlu0 %862 }
 0x83d   :  { %v5726_v2 = vmul.f32 %v5017_v42, %v863_v63  ;;  %v1041_v42 = vrot.slane %v5721_v60, 6 }
 0x83e   :  { %v836_v4 = vpop.permute.xlu1 %835 }
 0x83f   :  { %v957_v3 = vrot.slane %v5726_v2, 2  ;;  %v5729_v5 = vmul.f32 %v5019_v46, %v836_v4 }
 0x841   :  { %958 = vrot.lane.b32.xlu0 %v957_v3, %s5386_s8  ;;  %v878_v6 = vrot.slane %v5729_v5, 4 }
 0x843   :  { %879 = vrot.lane.b32.xlu1 %v878_v6, %s5386_s8 }
 0x8b3   :  { %v959_v7 = vpop.permute.xlu0 %958 }
 0x8b4   :  { %4428 = vmatmul.mubr.msk.f32.vlgmr.msra.gmra.mrb[10].mxu0 %vm133_vm1, %v959_v7 }
 0x8b5   :  { %4791 = vmatpush3.bf16.msra.mxu0 %v5587_v28  ;;  %4449 = vmatprep.mubr.msk.f32.mxu0 %vm5384_vm0, %v5383_v1  ;;  %v880_v8 = vpop.permute.xlu1 %879 }
 0x8b6   :  { %4792 = vmatprep.subr.bf16.mxu0 %v5382_v0  ;;  %4417 = vmatmul.mubr.msk.f32.vlgmr.msra.gmra.mrb[6].mxu1 %vm133_vm1, %v880_v8 }
 0x8b7   :  { %4785 = vmatpush3.bf16.msra.mxu1 %v5572_v14  ;;  %4438 = vmatprep.mubr.msk.f32.mxu1 %vm5384_vm0, %v5383_v1 }
 0x8b8   :  { %4786 = vmatprep.subr.bf16.mxu1 %v5382_v0 }
 0x8b9   :  { %4794 = vmatpush3.bf16.msra.mxu0 %v5595_v36 }
 0x8ba   :  { %4801 = vmatprep.subr.bf16.mxu0 %v5382_v0 }
 0x8bb   :  { %4788 = vmatpush3.bf16.msra.mxu1 %v5584_v22 }
 0x8bc   :  { %4795 = vmatprep.subr.bf16.mxu1 %v5382_v0 }
 0x987   :  { %v1028_v9 = vpop.f32.mrb[10].mxu0 }
 0x988   :  { %v1032_v10 = vadd.f32 %v1028_v9, %v5636_v56  ;;  %v4429_v12 = vpop.f32.mrb[11].mxu0 }
 0x989   :  { %v949_v13 = vpop.f32.mrb[6].mxu1 }
 0x98a   :  { %5024 = vtanh.f32 %v1032_v10  ;;  %v954_v16 = vrot.slane %v949_v13, 2  ;;  %v4418_v17 = vpop.f32.mrb[7].mxu1  ;;  %v4114_v21 = vmul.f32 -1.442695, %v1032_v10 }
 0x98c   :  { %v956_v18 = vadd.f32 %v954_v16, %v5634_v55 }
 0x98e   :  { %5026 = vtanh.f32 %v956_v18  ;;  %v4113_v23 = vmul.f32 -1.442695, %v956_v18 }
 0x98f   :  { %5028 = vpow2.f32 %v4114_v21 }
 0x990   :  { %5030 = vpow2.f32 %v4113_v23 }
 0x994   :  { %v5025_v19 = vpop.eup %5024 }
 0x995   :  { %1072 = vrot.lane.b32.xlu0 %v5025_v19, %s5385_s4 }
 0x998   :  { %v5027_v20 = vpop.eup %5026 }
 0x999   :  { %1045 = vrot.lane.b32.xlu1 %v5027_v20, %s5385_s4  ;;  %v5029_v25 = vpop.eup %5028 }
 0x99a   :  { %v1063_v56 = vadd.f32 1.0, %v5029_v25  ;;  %v5031_v26 = vpop.eup %5030 }
 0x99b   :  { %v1036_v27 = vadd.f32 1.0, %v5031_v26 }
 0x99c   :  { %5032 = vrcp.f32 %v1063_v56 }
 0x99d   :  { %5034 = vrcp.f32 %v1036_v27 }
 0x9a6   :  { %v5033_v29 = vpop.eup %5032 }
 0x9a7   :  { %v5035_v31 = vpop.eup %5034  ;;  %v1070_v35 = vmul.f32 %v5033_v29, %v1068_v34 }
 0x9a8   :  { %v1043_v43 = vmul.f32 %v5035_v31, %v1041_v42 }
 0xa07   :  { %v1073_v30 = vpop.permute.xlu0 %1072 }
 0xa08   :  { %v1075_v55 = vmul.f32 %v5033_v29, %v1073_v30 }
 0xa0a   :  { %1077 = vrot.lane.b32.xlu0 %v1075_v55, %s5386_s8 }
 0xa0b   :  { %v1046_v32 = vpop.permute.xlu1 %1045 }
 0xa0c   :  { %v1048_v33 = vmul.f32 %v5035_v31, %v1046_v32 }
 0xa0e   :  { %1050 = vrot.lane.b32.xlu1 %v1048_v33, %s5386_s8 }
 0xa7c   :  { %v1078_v37 = vpop.permute.xlu0 %1077 }
 0xa7d   :  { %v5755_v39 = vadd.f32 %v1078_v37, %v1070_v35 }
 0xa7f   :  { %5036 = vtanh.f32 %v5755_v39  ;;  %v1288_v56 = vrot.slane %v5755_v39, 2 }
 0xa80   :  { %v1051_v45 = vpop.permute.xlu1 %1050 }
 0xa81   :  { %v5759_v46 = vadd.f32 %v1051_v45, %v1043_v43 }
 0xa83   :  { %5038 = vtanh.f32 %v5759_v46  ;;  %v1261_v30 = vrot.slane %v5759_v46, 6 }
 0xa89   :  { %v5037_v48 = vpop.eup %5036 }
 0xa8a   :  { %1083 = vrot.lane.b32.xlu0 %v5037_v48, %s5385_s4 }
 0xa8d   :  { %v5039_v49 = vpop.eup %5038 }
 0xa8e   :  { %1056 = vrot.lane.b32.xlu1 %v5039_v49, %s5385_s4 }
 0xafc   :  { %v1084_v50 = vpop.permute.xlu0 %1083 }
 0xafd   :  { %v5764_v51 = vmul.f32 %v5033_v29, %v1084_v50 }
 0xaff   :  { %1175 = vrot.lane.b32.xlu0 %v5764_v51, %s5386_s8 }
 0xb00   :  { %v1057_v53 = vpop.permute.xlu1 %1056 }
 0xb01   :  { %v5768_v54 = vmul.f32 %v5035_v31, %v1057_v53 }
 0xb03   :  { %v1099_v57 = vrot.slane %v5768_v54, 6 }
 0xb05   :  { %1100 = vrot.lane.b32.xlu1 %v1099_v57, %s5386_s8 }
 0xb71   :  { %v1176_v58 = vpop.permute.xlu0 %1175 }
 0xb72   :  { %4450 = vmatmul.mubr.msk.f32.vlgmr.msra.gmra.mrb[12].mxu0 %vm133_vm1, %v1176_v58 }
 0xb73   :  { %4803 = vmatpush3.bf16.msra.mxu0 %v5587_v28  ;;  %4471 = vmatprep.mubr.msk.f32.mxu0 %vm5384_vm0, %v5383_v1 }
 0xb74   :  { %4804 = vmatprep.subr.bf16.mxu0 %v5382_v0 }
 0xb77   :  { %4806 = vmatpush3.bf16.msra.mxu0 %v5595_v36  ;;  %v1101_v59 = vpop.permute.xlu1 %1100 }
 0xb78   :  { %4813 = vmatprep.subr.bf16.mxu0 %v5382_v0  ;;  %4439 = vmatmul.mubr.msk.f32.vlgmr.msra.gmra.mrb[8].mxu1 %vm133_vm1, %v1101_v59 }
 0xb79   :  { %4797 = vmatpush3.bf16.msra.mxu1 %v5572_v14  ;;  %4460 = vmatprep.mubr.msk.f32.mxu1 %vm5384_vm0, %v5383_v1 }
 0xb7a   :  { %4798 = vmatprep.subr.bf16.mxu1 %v5382_v0 }
 0xb7d   :  { %4800 = vmatpush3.bf16.msra.mxu1 %v5584_v22 }
 0xb7e   :  { %4807 = vmatprep.subr.bf16.mxu1 %v5382_v0 }
 0xc45   :  { %v1245_v60 = vpop.f32.mrb[12].mxu0 }
 0xc46   :  { %v1250_v61 = vrot.slane %v1245_v60, 2  ;;  %v4451_v62 = vpop.f32.mrb[13].mxu0 }
 0xc48   :  { %v1252_v63 = vadd.f32 %v1250_v61, %v5628_v47 }
 0xc4a   :  { %5040 = vtanh.f32 %v1252_v63  ;;  %v4118_v9 = vmul.f32 -1.442695, %v1252_v63 }
 0xc4b   :  { %v1170_v3 = vpop.f32.mrb[8].mxu1 }
 0xc4c   :  { %v1174_v4 = vadd.f32 %v1170_v3, %v5632_v52  ;;  %v4440_v6 = vpop.f32.mrb[9].mxu1 }
 0xc4e   :  { %5042 = vtanh.f32 %v1174_v4  ;;  %v4117_v10 = vmul.f32 -1.442695, %v1174_v4 }
 0xc4f   :  { %5044 = vpow2.f32 %v4118_v9 }
 0xc50   :  { %5046 = vpow2.f32 %v4117_v10 }
 0xc54   :  { %v5041_v7 = vpop.eup %5040 }
 0xc55   :  { %1292 = vrot.lane.b32.xlu0 %v5041_v7, %s5385_s4 }
 0xc58   :  { %v5043_v8 = vpop.eup %5042 }
 0xc59   :  { %1265 = vrot.lane.b32.xlu1 %v5043_v8, %s5385_s4  ;;  %v5045_v12 = vpop.eup %5044 }
 0xc5a   :  { %v1283_v13 = vadd.f32 1.0, %v5045_v12  ;;  %v5047_v16 = vpop.eup %5046 }
 0xc5b   :  { %v1256_v17 = vadd.f32 1.0, %v5047_v16 }
 0xc5c   :  { %5048 = vrcp.f32 %v1283_v13 }
 0xc5d   :  { %5050 = vrcp.f32 %v1256_v17 }
 0xc66   :  { %v5049_v18 = vpop.eup %5048 }
 0xc67   :  { %v5051_v21 = vpop.eup %5050  ;;  %v1290_v26 = vmul.f32 %v5049_v18, %v1288_v56 }
 0xc68   :  { %v1263_v55 = vmul.f32 %v5051_v21, %v1261_v30 }
 0xcc7   :  { %v1293_v19 = vpop.permute.xlu0 %1292 }
 0xcc8   :  { %v1295_v20 = vmul.f32 %v5049_v18, %v1293_v19 }
 0xcca   :  { %1297 = vrot.lane.b32.xlu0 %v1295_v20, %s5386_s8 }
 0xccb   :  { %v1266_v23 = vpop.permute.xlu1 %1265 }
 0xccc   :  { %v1268_v25 = vmul.f32 %v5051_v21, %v1266_v23 }
 0xcce   :  { %1270 = vrot.lane.b32.xlu1 %v1268_v25, %s5386_s8 }
 0xd3c   :  { %v1298_v27 = vpop.permute.xlu0 %1297 }
 0xd3d   :  { %v5793_v29 = vadd.f32 %v1298_v27, %v1290_v26 }
 0xd3f   :  { %5052 = vtanh.f32 %v5793_v29 }
 0xd40   :  { %v1271_v31 = vpop.permute.xlu1 %1270 }
 0xd41   :  { %v5797_v32 = vadd.f32 %v1271_v31, %v1263_v55 }
 0xd43   :  { %5054 = vtanh.f32 %v5797_v32  ;;  %v1480_v20 = vrot.slane %v5797_v32, 6 }
 0xd49   :  { %v5053_v33 = vpop.eup %5052 }
 0xd4a   :  { %1303 = vrot.lane.b32.xlu0 %v5053_v33, %s5385_s4 }
 0xd4d   :  { %v5055_v34 = vpop.eup %5054 }
 0xd4e   :  { %1276 = vrot.lane.b32.xlu1 %v5055_v34, %s5385_s4 }
 0xdbc   :  { %v1304_v35 = vpop.permute.xlu0 %1303 }
 0xdbd   :  { %v5802_v37 = vmul.f32 %v5049_v18, %v1304_v35  ;;  %v1507_v18 = vrot.slane %v5793_v29, 2 }
 0xdbf   :  { %v1393_v39 = vrot.slane %v5802_v37, 6 }
 0xdc0   :  { %v1277_v42 = vpop.permute.xlu1 %1276 }
 0xdc1   :  { %1394 = vrot.lane.b32.xlu0 %v1393_v39, %s5386_s8  ;;  %v1279_v43 = vmul.f32 %v5051_v21, %v1277_v42 }
 0xdc3   :  { %1308 = vrot.lane.b32.xlu1 %v1279_v43, %s5386_s8 }
 0xe33   :  { %v1395_v45 = vpop.permute.xlu0 %1394 }
 0xe34   :  { %4472 = vmatmul.mubr.msk.f32.vlgmr.msra.gmra.mrb[14].mxu0 %vm133_vm1, %v1395_v45 }
 0xe35   :  { %4815 = vmatpush3.bf16.msra.mxu0 %v5587_v28  ;;  %4493 = vmatprep.mubr.msk.f32.mxu0 %vm5384_vm0, %v5383_v1  ;;  %v5811_v46 = vpop.permute.xlu1 %1308 }
 0xe36   :  { %4816 = vmatprep.subr.bf16.mxu0 %v5382_v0  ;;  %4461 = vmatmul.mubr.msk.f32.vlgmr.msra.gmra.mrb[10].mxu1 %vm133_vm1, %v5811_v46 }
 0xe37   :  { %4809 = vmatpush3.bf16.msra.mxu1 %v5572_v14  ;;  %4482 = vmatprep.mubr.msk.f32.mxu1 %vm5384_vm0, %v5383_v1 }
 0xe38   :  { %4810 = vmatprep.subr.bf16.mxu1 %v5382_v0 }
 0xe39   :  { %4818 = vmatpush3.bf16.msra.mxu0 %v5595_v36 }
 0xe3a   :  { %4825 = vmatprep.subr.bf16.mxu0 %v5382_v0 }
 0xe3b   :  { %4812 = vmatpush3.bf16.msra.mxu1 %v5584_v22 }
 0xe3c   :  { %4819 = vmatprep.subr.bf16.mxu1 %v5382_v0 }
 0xf07   :  { %v1464_v48 = vpop.f32.mrb[14].mxu0 }
 0xf08   :  { %v1469_v49 = vrot.slane %v1464_v48, 4  ;;  %v4473_v50 = vpop.f32.mrb[15].mxu0 }
 0xf09   :  { %v1385_v57 = vpop.f32.mrb[10].mxu1 }
 0xf0a   :  { %v1471_v53 = vadd.f32 %v1469_v49, %v5628_v47  ;;  %v1390_v58 = vrot.slane %v1385_v57, 6  ;;  %v4462_v59 = vpop.f32.mrb[11].mxu1 }
 0xf0c   :  { %5056 = vtanh.f32 %v1471_v53  ;;  %v1392_v60 = vadd.f32 %v1390_v58, %v5632_v52  ;;  %v4122_v63 = vmul.f32 -1.442695, %v1471_v53 }
 0xf0e   :  { %5058 = vtanh.f32 %v1392_v60  ;;  %v4121_v3 = vmul.f32 -1.442695, %v1392_v60 }
 0xf0f   :  { %5060 = vpow2.f32 %v4122_v63 }
 0xf10   :  { %5062 = vpow2.f32 %v4121_v3 }
 0xf16   :  { %v5057_v61 = vpop.eup %5056 }
 0xf17   :  { %1511 = vrot.lane.b32.xlu0 %v5057_v61, %s5385_s4 }
 0xf18   :  { %v5059_v62 = vpop.eup %5058 }
 0xf19   :  { %1484 = vrot.lane.b32.xlu1 %v5059_v62, %s5385_s4  ;;  %v5061_v4 = vpop.eup %5060 }
 0xf1a   :  { %v5063_v6 = vpop.eup %5062  ;;  %v1502_v7 = vadd.f32 1.0, %v5061_v4 }
 0xf1b   :  { %v1475_v8 = vadd.f32 1.0, %v5063_v6 }
 0xf1c   :  { %5064 = vrcp.f32 %v1502_v7 }
 0xf1d   :  { %5066 = vrcp.f32 %v1475_v8 }
 0xf26   :  { %v5065_v9 = vpop.eup %5064 }
 0xf27   :  { %v5067_v13 = vpop.eup %5066  ;;  %v1509_v19 = vmul.f32 %v5065_v9, %v1507_v18 }
 0xf28   :  { %v1482_v25 = vmul.f32 %v5067_v13, %v1480_v20 }
 0xf89   :  { %v1512_v10 = vpop.permute.xlu0 %1511 }
 0xf8a   :  { %v1514_v12 = vmul.f32 %v5065_v9, %v1512_v10 }
 0xf8b   :  { %v1485_v16 = vpop.permute.xlu1 %1484 }
 0xf8c   :  { %1516 = vrot.lane.b32.xlu0 %v1514_v12, %s5386_s8  ;;  %v1487_v17 = vmul.f32 %v5067_v13, %v1485_v16 }
 0xf8e   :  { %1489 = vrot.lane.b32.xlu1 %v1487_v17, %s5386_s8 }
 0xffe   :  { %v1517_v21 = vpop.permute.xlu0 %1516 }
 0xfff   :  { %v5832_v23 = vadd.f32 %v1517_v21, %v1509_v19 }
0x1000   :  { %v1490_v56 = vpop.permute.xlu1 %1489 }
0x1001   :  { %5068 = vtanh.f32 %v5832_v23  ;;  %v5835_v26 = vadd.f32 %v1490_v56, %v1482_v25  ;;  %v1729_v8 = vrot.slane %v5832_v23, 2 }
0x1003   :  { %5070 = vtanh.f32 %v5835_v26  ;;  %v1702_v10 = vrot.slane %v5835_v26, 6 }
0x100b   :  { %v5069_v27 = vpop.eup %5068 }
0x100c   :  { %1522 = vrot.lane.b32.xlu0 %v5069_v27, %s5385_s4 }
0x100d   :  { %v5071_v30 = vpop.eup %5070 }
0x100e   :  { %1495 = vrot.lane.b32.xlu1 %v5071_v30, %s5385_s4 }
0x107e   :  { %v1523_v29 = vpop.permute.xlu0 %1522 }
0x107f   :  { %v5840_v55 = vmul.f32 %v5065_v9, %v1523_v29 }
0x1080   :  { %v1496_v32 = vpop.permute.xlu1 %1495 }
0x1081   :  { %v1615_v31 = vrot.slane %v5840_v55, 4  ;;  %v5843_v33 = vmul.f32 %v5067_v13, %v1496_v32 }
0x1083   :  { %1616 = vrot.lane.b32.xlu0 %v1615_v31, %s5386_s8  ;;  %v1536_v34 = vrot.slane %v5843_v33, 2 }
0x1085   :  { %1537 = vrot.lane.b32.xlu1 %v1536_v34, %s5386_s8 }
0x10f5   :  { %v1617_v35 = vpop.permute.xlu0 %1616 }
0x10f6   :  { %4494 = vmatmul.mubr.msk.f32.vlgmr.msra.gmra.mrb[16].mxu0 %vm133_vm1, %v1617_v35 }
0x10f7   :  { %4827 = vmatpush3.bf16.msra.mxu0 %v5587_v28  ;;  %4515 = vmatprep.mubr.msk.f32.mxu0 %vm5384_vm0, %v5383_v1  ;;  %v1538_v39 = vpop.permute.xlu1 %1537 }
0x10f8   :  { %4828 = vmatprep.subr.bf16.mxu0 %v5382_v0  ;;  %4483 = vmatmul.mubr.msk.f32.vlgmr.msra.gmra.mrb[12].mxu1 %vm133_vm1, %v1538_v39 }
0x10f9   :  { %4821 = vmatpush3.bf16.msra.mxu1 %v5572_v14  ;;  %4504 = vmatprep.mubr.msk.f32.mxu1 %vm5384_vm0, %v5383_v1 }
0x10fa   :  { %4822 = vmatprep.subr.bf16.mxu1 %v5382_v0 }
0x10fb   :  { %4830 = vmatpush3.bf16.msra.mxu0 %v5595_v36 }
0x10fc   :  { %4847 = vmatprep.subr.bf16.mxu0 %v5382_v0 }
0x10fd   :  { %4824 = vmatpush3.bf16.msra.mxu1 %v5584_v22 }
0x11c9   :  { %v1686_v28 = vpop.f32.mrb[16].mxu0 }
0x11ca   :  { %v1691_v42 = vrot.slane %v1686_v28, 6  ;;  %v4495_v43 = vpop.f32.mrb[17].mxu0 }
0x11cb   :  { %v1607_v48 = vpop.f32.mrb[12].mxu1 }
0x11cc   :  { %v1693_v45 = vadd.f32 %v1691_v42, %v5628_v47  ;;  %v1612_v49 = vrot.slane %v1607_v48, 4  ;;  %v4484_v50 = vpop.f32.mrb[13].mxu1 }
0x11ce   :  { %5072 = vtanh.f32 %v1693_v45  ;;  %v1614_v14 = vadd.f32 %v1612_v49, %v5632_v52  ;;  %v4126_v57 = vmul.f32 -1.442695, %v1693_v45 }
0x11d0   :  { %5074 = vtanh.f32 %v1614_v14  ;;  %v4125_v22 = vmul.f32 -1.442695, %v1614_v14 }
0x11d1   :  { %5076 = vpow2.f32 %v4126_v57 }
0x11d2   :  { %5078 = vpow2.f32 %v4125_v22 }
0x11d8   :  { %v5073_v53 = vpop.eup %5072 }
0x11d9   :  { %1733 = vrot.lane.b32.xlu0 %v5073_v53, %s5385_s4 }
0x11da   :  { %v5075_v36 = vpop.eup %5074 }
0x11db   :  { %1706 = vrot.lane.b32.xlu1 %v5075_v36, %s5385_s4  ;;  %v5077_v58 = vpop.eup %5076 }
0x11dc   :  { %v5079_v59 = vpop.eup %5078  ;;  %v1724_v60 = vadd.f32 1.0, %v5077_v58 }
0x11dd   :  { %v1697_v61 = vadd.f32 1.0, %v5079_v59 }
0x11de   :  { %5080 = vrcp.f32 %v1724_v60 }
0x11df   :  { %5082 = vrcp.f32 %v1697_v61 }
0x11e8   :  { %v5081_v62 = vpop.eup %5080 }
0x11e9   :  { %v5083_v4 = vpop.eup %5082  ;;  %v1731_v9 = vmul.f32 %v5081_v62, %v1729_v8 }
0x11ea   :  { %v1704_v16 = vmul.f32 %v5083_v4, %v1702_v10  ;;  %v1980_v10 = vld [vmem:[#allocation8 + $0x8] sm:$0xff] }
0x124b   :  { %v1734_v63 = vpop.permute.xlu0 %1733 }
0x124c   :  { %v1736_v3 = vmul.f32 %v5081_v62, %v1734_v63 }
0x124d   :  { %v1707_v6 = vpop.permute.xlu1 %1706 }
0x124e   :  { %1738 = vrot.lane.b32.xlu0 %v1736_v3, %s5386_s8  ;;  %v1709_v7 = vmul.f32 %v5083_v4, %v1707_v6 }
0x1250   :  { %1711 = vrot.lane.b32.xlu1 %v1709_v7, %s5386_s8 }
0x12c0   :  { %v1739_v12 = vpop.permute.xlu0 %1738 }
0x12c1   :  { %v1741_v13 = vadd.f32 %v1739_v12, %v1731_v9  ;;  %v1982_v12 = vld [vmem:[#allocation8 + $0x18] sm:$0xff] }
0x12c2   :  { %v1712_v17 = vpop.permute.xlu1 %1711 }
0x12c3   :  { %5084 = vtanh.f32 %v1741_v13  ;;  %v1714_v18 = vadd.f32 %v1712_v17, %v1704_v16  ;;  %v1948_v60 = vrot.slane %v1741_v13, 2  ;;  %v4831_v13 = vpack.c.bf16 %v1982_v12, %v1980_v10  ;;  %v1984_v16 = vld [vmem:[#allocation8 + $0x28] sm:$0xff]  ;;  %v1986_v17 = vld [vmem:[#allocation8 + $0x38] sm:$0xff] }
0x12c5   :  { %5086 = vtanh.f32 %v1714_v18  ;;  %v1921_v3 = vrot.slane %v1714_v18, 6  ;;  %v4835_v18 = vpack.c.bf16 %v1986_v17, %v1984_v16  ;;  %4832 = vmatprep.subr.bf16.mxu1 %v4831_v13 }
0x12cd   :  { %v5085_v19 = vpop.eup %5084 }
0x12ce   :  { %1744 = vrot.lane.b32.xlu0 %v5085_v19, %s5385_s4  ;;  %v1983_v19 = vld [vmem:[#allocation8 + $0x20] sm:$0xff] }
0x12cf   :  { %v5087_v20 = vpop.eup %5086 }
0x12d0   :  { %1717 = vrot.lane.b32.xlu1 %v5087_v20, %s5385_s4 }
0x1340   :  { %v1745_v21 = vpop.permute.xlu0 %1744 }
0x1341   :  { %v5871_v25 = vmul.f32 %v5081_v62, %v1745_v21 }
0x1342   :  { %v1718_v56 = vpop.permute.xlu1 %1717 }
0x1343   :  { %v1837_v23 = vrot.slane %v5871_v25, 2  ;;  %v5874_v26 = vmul.f32 %v5083_v4, %v1718_v56  ;;  %v1987_v56 = vld [vmem:[#allocation8 + $0x40] sm:$0xff] }
0x1345   :  { %1838 = vrot.lane.b32.xlu0 %v1837_v23, %s5386_s8  ;;  %v1758_v27 = vrot.slane %v5874_v26, 4 }
0x1347   :  { %1759 = vrot.lane.b32.xlu1 %v1758_v27, %s5386_s8  ;;  %v1989_v27 = vld [vmem:[#allocation8 + $0x50] sm:$0xff] }
0x13b7   :  { %v1839_v30 = vpop.permute.xlu0 %1838 }
0x13b8   :  { %4516 = vmatmul.mubr.msk.f32.vlgmr.msra.gmra.mrb[18].mxu0 %vm133_vm1, %v1839_v30  ;;  %v4841_v30 = vpack.c.bf16 %v1989_v27, %v1987_v56 }
0x13b9   :  { %4526 = vmatprep.mubr.msk.f32.mxu0 %vm5384_vm0, %v5383_v1  ;;  %v1760_v29 = vpop.permute.xlu1 %1759 }
0x13ba   :  { %4505 = vmatmul.mubr.msk.f32.vlgmr.msra.gmra.mrb[14].mxu1 %vm133_vm1, %v1760_v29  ;;  %v2094_v29 = vld [vmem:[%s6336_s6 + $0x18] sm:$0xff] }
0x13bb   :  { %2078 = vmatprep.mubr.f32.mxu1 %v5383_v1 }
0x148b   :  { %v1908_v31 = vpop.f32.mrb[18].mxu0 }
0x148c   :  { %v1912_v32 = vadd.f32 %v1908_v31, %v5628_v47  ;;  %v4517_v34 = vpop.f32.mrb[19].mxu0 }
0x148d   :  { %v1829_v35 = vpop.f32.mrb[14].mxu1  ;;  %v1991_v34 = vld [vmem:[#allocation8 + $0x60] sm:$0xff] }
0x148e   :  { %5088 = vtanh.f32 %v1912_v32  ;;  %v1834_v39 = vrot.slane %v1829_v35, 2  ;;  %v4506_v28 = vpop.f32.mrb[15].mxu1  ;;  %v4130_v48 = vmul.f32 -1.442695, %v1912_v32  ;;  %v1993_v35 = vld [vmem:[#allocation8 + $0x70] sm:$0xff] }
0x148f   :  { %v4845_v28 = vpack.c.bf16 %v1993_v35, %v1991_v34 }
0x1490   :  { %v1836_v42 = vadd.f32 %v1834_v39, %v5632_v52  ;;  %v2095_v39 = vld [vmem:[#allocation9] sm:$0xff] }
0x1492   :  { %5090 = vtanh.f32 %v1836_v42  ;;  %v4129_v49 = vmul.f32 -1.442695, %v1836_v42  ;;  %v2096_v42 = vld [vmem:[#allocation9 + $0x8] sm:$0xff] }
0x1493   :  { %5092 = vpow2.f32 %v4130_v48  ;;  %v2098_v48 = vld [vmem:[#allocation9 + $0x18] sm:$0xff] }
0x1494   :  { %5094 = vpow2.f32 %v4129_v49 }
0x1498   :  { %v5089_v43 = vpop.eup %5088 }
0x1499   :  { %1952 = vrot.lane.b32.xlu0 %v5089_v43, %s5385_s4  ;;  %v5942_v43 = vpack.c.bf16 %v2096_v42, %v2095_v39 }
0x149c   :  { %v5091_v45 = vpop.eup %5090 }
0x149d   :  { %1925 = vrot.lane.b32.xlu1 %v5091_v45, %s5385_s4  ;;  %v5093_v50 = vpop.eup %5092  ;;  %v2097_v45 = vld [vmem:[#allocation9 + $0x10] sm:$0xff] }
0x149e   :  { %v1943_v47 = vadd.f32 1.0, %v5093_v50  ;;  %v5095_v14 = vpop.eup %5094  ;;  %v5949_v49 = vpack.c.bf16 %v2098_v48, %v2097_v45 }
0x149f   :  { %v1916_v53 = vadd.f32 1.0, %v5095_v14 }
0x14a0   :  { %5096 = vrcp.f32 %v1943_v47 }
0x14a1   :  { %5098 = vrcp.f32 %v1916_v53 }
0x14aa   :  { %v5888_v36 = vpop.eup %5096 }
0x14ab   :  { %v5892_v22 = vpop.eup %5098  ;;  %v1950_v61 = vmul.f32 %v5888_v36, %v1948_v60 }
0x14ac   :  { %v1923_v4 = vmul.f32 %v5892_v22, %v1921_v3 }
0x150b   :  { %v1953_v52 = vpop.permute.xlu0 %1952 }
0x150c   :  { %v1955_v57 = vmul.f32 %v5888_v36, %v1953_v52 }
0x150e   :  { %1957 = vrot.lane.b32.xlu0 %v1955_v57, %s5386_s8 }
0x150f   :  { %v1926_v58 = vpop.permute.xlu1 %1925 }
0x1510   :  { %v1928_v59 = vmul.f32 %v5892_v22, %v1926_v58 }
0x1512   :  { %1930 = vrot.lane.b32.xlu1 %v1928_v59, %s5386_s8 }
0x1580   :  { %v1958_v62 = vpop.permute.xlu0 %1957 }
0x1581   :  { %v1960_v63 = vadd.f32 %v1958_v62, %v1950_v61 }
0x1583   :  { %5100 = vtanh.f32 %v1960_v63 }
0x1584   :  { %v1931_v6 = vpop.permute.xlu1 %1930 }
0x1585   :  { %v1933_v7 = vadd.f32 %v1931_v6, %v1923_v4 }
0x1587   :  { %5102 = vtanh.f32 %v1933_v7 }
0x158d   :  { %v5101_v8 = vpop.eup %5100 }
0x158e   :  { %1963 = vrot.lane.b32.xlu0 %v5101_v8, %s5385_s4 }
0x1591   :  { %v5103_v9 = vpop.eup %5102 }
0x1592   :  { %643 = vrot.lane.b32.xlu0 %v5691_v15, %s5386_s8  ;;  %1936 = vrot.lane.b32.xlu1 %v5103_v9, %s5385_s4  ;;  %v1979_v15 = vld [vmem:[#allocation8] sm:$0xff] }
0x1596   :  { %1088 = vrot.lane.b32.xlu0 %v5768_v54, %s5386_s8  ;;  %867 = vrot.lane.b32.xlu1 %v5729_v5, %s5386_s8  ;;  %v1981_v54 = vld [vmem:[#allocation8 + $0x10] sm:$0xff] }
0x1597   :  { %v4833_v5 = vpack.c.bf16 %v1981_v54, %v1979_v15  ;;  %v1995_v15 = vld [vmem:[#allocation11] sm:$0x3] }
0x1598   :  { %v2000_v13 = vrot.slane %v1995_v15, %v125_v44  ;;  %v2004_v54 = vrot.slane %v1995_v15, %v129_v41 }
0x1599   :  { %4834 = vmatpush1.bf16.msra.mxu1 %v4833_v5 }
0x159a   :  { %1532 = vrot.lane.b32.xlu0 %v5840_v55, %s5385_s4  ;;  %1313 = vrot.lane.b32.xlu1 %v5802_v37, %s5385_s4  ;;  %v1985_v55 = vld [vmem:[#allocation8 + $0x30] sm:$0xff]  ;;  %v2091_v37 = vld [vmem:[%s6336_s6] sm:$0xff] }
0x159b   :  { %v4837_v20 = vpack.c.bf16 %v1985_v55, %v1983_v19  ;;  %4836 = vmatprep.subr.bf16.mxu1 %v4835_v18 }
0x159d   :  { %4838 = vmatpush1.bf16.msra.mxu1 %v4837_v20 }
0x159e   :  { %649 = vrot.lane.b32.xlu0 %v5688_v11, %s5385_s4  ;;  %1754 = vrot.lane.b32.xlu1 %v5871_v25, %s5385_s4  ;;  %v2092_v11 = vld [vmem:[%s6336_s6 + $0x8] sm:$0xff]  ;;  %v1990_v25 = vld [vmem:[#allocation8 + $0x58] sm:$0xff] }
0x159f   :  { %v5922_v21 = vpack.c.bf16 %v2092_v11, %v2091_v37 }
0x15a1   :  { %4849 = vmatpush3.bf16.msra.mxu0 %v5922_v21 }
0x15a2   :  { %1094 = vrot.lane.b32.xlu0 %v5764_v51, %s5385_s4  ;;  %428 = vrot.lane.b32.xlu1 %v5652_v24, %s5385_s4  ;;  %v1988_v51 = vld [vmem:[#allocation8 + $0x48] sm:$0xff]  ;;  %v2093_v24 = vld [vmem:[%s6336_s6 + $0x10] sm:$0xff] }
0x15a3   :  { %4850 = vmatprep.subr.bf16.mxu0 %v5382_v0  ;;  %v4839_v23 = vpack.c.bf16 %v1990_v25, %v1988_v51  ;;  %v5938_v31 = vpack.c.bf16 %v2094_v29, %v2093_v24 }
0x15a5   :  { %4840 = vmatprep.subr.bf16.mxu1 %v4839_v23  ;;  %4852 = vmatpush3.bf16.msra.mxu0 %v5938_v31 }
0x15a6   :  { %873 = vrot.lane.b32.xlu1 %v5726_v2, %s5385_s4  ;;  %4842 = vmatpush1.bf16.msra.mxu1 %v4841_v30  ;;  %v1992_v2 = vld [vmem:[#allocation8 + $0x68] sm:$0xff] }
0x15a7   :  { %4853 = vmatprep.subr.bf16.mxu0 %v5382_v0 }
0x15a8   :  { %4527 = vmatmul.mubr.f32.vlgmr.msra.gmra.mrb[20].mxu0 %v5383_v1 }
0x15a9   :  { %4855 = vmatpush3.bf16.msra.mxu0 %v5942_v43  ;;  %4537 = vmatprep.mubr.msk.f32.mxu0 %vm5384_vm0, %v5383_v1 }
0x15aa   :  { %1527 = vrot.lane.b32.xlu1 %v5843_v33, %s5386_s8  ;;  %v1994_v33 = vld [vmem:[#allocation8 + $0x78] sm:$0xff]  ;;  %4856 = vmatprep.subr.bf16.mxu0 %v5382_v0 }
0x15ab   :  { %v4843_v32 = vpack.c.bf16 %v1994_v33, %v1992_v2 }
0x15ad   :  { %4844 = vmatprep.subr.bf16.mxu1 %v4843_v32  ;;  %4858 = vmatpush3.bf16.msra.mxu0 %v5949_v49 }
0x15ae   :  { %4846 = vmatpush1.bf16.msra.mxu1 %v4845_v28  ;;  %4865 = vmatprep.subr.bf16.mxu0 %v5382_v0 }
0x15af   :  { %4859 = vmatprep.subr.bf16.mxu1 %v5382_v0 }
0x15b0   :  { %4538 = vmatmul.mubr.f32.vlgmr.msra.gmra.mrb[22].mxu0 %v5383_v1 }
0x15b1   :  { %4867 = vmatpush3.bf16.msra.mxu0 %v5942_v43  ;;  %4559 = vmatprep.mubr.msk.f32.mxu0 %vm5384_vm0, %v5383_v1 }
0x15b2   :  { %4868 = vmatprep.subr.bf16.mxu0 %v5382_v0 }
0x15b5   :  { %4870 = vmatpush3.bf16.msra.mxu0 %v5949_v49 }
0x15b6   :  { %4877 = vmatprep.subr.bf16.mxu0 %v5382_v0 }
0x1600   :  { %v1964_v50 = vpop.permute.xlu0 %1963 }
0x1601   :  { %v1966_v47 = vmul.f32 %v5888_v36, %v1964_v50 }
0x1603   :  { %1973 = vrot.lane.b32.xlu0 %v1966_v47, %s5385_s4 }
0x1604   :  { %v644_v14 = vpop.permute.xlu0 %643  ;;  %v1937_v53 = vpop.permute.xlu1 %1936 }
0x1605   :  { %647 = vst.msk [vmem:[#allocation2] sm:$0xc] %vm646_vm3, %v644_v14  ;;  %v1939_v36 = vmul.f32 %v5892_v22, %v1937_v53 }
0x1607   :  { %1749 = vrot.lane.b32.xlu0 %v5874_v26, %s5386_s8  ;;  %1968 = vrot.lane.b32.xlu1 %v1939_v36, %s5386_s8 }
0x1608   :  { %v1089_v52 = vpop.permute.xlu0 %1088  ;;  %v868_v57 = vpop.permute.xlu1 %867 }
0x1609   :  { %1092 = vst.msk [vmem:[#allocation2] sm:$0xc0] %vm1091_vm4, %v1089_v52 }
0x160a   :  { %871 = vst.msk [vmem:[#allocation2] sm:$0x30] %vm870_vm5, %v868_v57 }
0x160c   :  { %v1533_v22 = vpop.permute.xlu0 %1532  ;;  %v1314_v58 = vpop.permute.xlu1 %1313 }
0x160d   :  { %1535 = vst.msk [vmem:[#allocation2] sm:$0x30] %vm652_vm6, %v1533_v22 }
0x160e   :  { %1316 = vst.msk [vmem:[#allocation2] sm:$0xc0] %vm431_vm7, %v1314_v58 }
0x1610   :  { %v650_v26 = vpop.permute.xlu0 %649  ;;  %v1755_v59 = vpop.permute.xlu1 %1754 }
0x1611   :  { %653 = vst.msk [vmem:[#allocation2 + $0x8] sm:$0x30] %vm652_vm6, %v650_v26 }
0x1612   :  { %1757 = vst.msk [vmem:[#allocation2] sm:$0xc] %vm876_vm8, %v1755_v59 }
0x1614   :  { %v1095_v60 = vpop.permute.xlu0 %1094  ;;  %v429_v61 = vpop.permute.xlu1 %428 }
0x1615   :  { %1098 = vst.msk [vmem:[#allocation2 + $0x8] sm:$0x3] %vm1097_vm9, %v1095_v60 }
0x1616   :  { %1311 = vst.msk [vmem:[#allocation2 + $0x8] sm:$0x3] %vm425_vm2, %v5811_v46 }
0x1617   :  { %432 = vst.msk [vmem:[#allocation2 + $0x8] sm:$0xc0] %vm431_vm7, %v429_v61 }
0x1618   :  { %v874_v62 = vpop.permute.xlu1 %873 }
0x1619   :  { %877 = vst.msk [vmem:[#allocation2 + $0x8] sm:$0xc] %vm876_vm8, %v874_v62 }
0x161c   :  { %v1528_v63 = vpop.permute.xlu1 %1527 }
0x161d   :  { %1530 = vst.msk [vmem:[#allocation2 + $0x8] sm:$0xc] %vm646_vm3, %v1528_v63 }
0x1675   :  { %v1974_v3 = vpop.permute.xlu0 %1973 }
0x1676   :  { %1976 = vst.msk [vmem:[#allocation2] sm:$0x3] %vm1097_vm9, %v1974_v3 }
0x1679   :  { %v1750_v4 = vpop.permute.xlu0 %1749  ;;  %v1969_v6 = vpop.permute.xlu1 %1968 }
0x167a   :  { %1752 = vst.msk [vmem:[#allocation2 + $0x8] sm:$0x30] %vm870_vm5, %v1750_v4 }
0x167b   :  { %1971 = vst.msk [vmem:[#allocation2 + $0x8] sm:$0xc0] %vm1091_vm4, %v1969_v6  ;;  %v2165_v8 = vpop.f32.mrb[20].mxu0 }
0x167c   :  { %v4528_v9 = vpop.f32.mrb[21].mxu0 }
0x167d   :  { %v1977_v7 = vld [vmem:[#allocation2] sm:$0xff] }
0x167e   :  { %4131 = vmatmul.mubr.msk.f32.vlgmr.msra.gmra.mrb[16].mxu1 %vm2007_vm10, %v1977_v7 }
0x167f   :  { %2084 = vmatprep.mubr.f32.mxu1 %v5383_v1  ;;  %4861 = vmatpush3.bf16.msra.mxu1 %v5922_v21 }
0x1680   :  { %4862 = vmatprep.subr.bf16.mxu1 %v5382_v0 }
0x1682   :  { %v1978_v46 = vld [vmem:[#allocation2 + $0x8] sm:$0xff] }
0x1683   :  { %4132 = vmatmul.mubr.msk.f32.gmra.mrb[18].mxu1 %vm2007_vm10, %v1978_v46  ;;  %v2236_v10 = vpop.f32.mrb[22].mxu0 }
0x1684   :  { %4864 = vmatpush3.bf16.msra.mxu1 %v5938_v31  ;;  %4548 = vmatprep.mubr.msk.f32.mxu1 %vm5384_vm0, %v5383_v1  ;;  %v4539_v12 = vpop.f32.mrb[23].mxu0  ;;  %v2241_v37 = vrot.slane %v2236_v10, 2 }
0x1685   :  { %4871 = vmatprep.subr.bf16.mxu1 %v5382_v0 }
0x1751   :  { %v2080_v16 = vpop.f32.mrb[16].mxu1 }
0x1752   :  { %v5986_v17 = vadd.f32 %v2080_v16, %v2000_v13  ;;  %v2082_v5 = vpop.f32.mrb[17].mxu1 }
0x1753   :  { %v5988_v18 = vadd.f32 %v2082_v5, %v2004_v54 }
0x1754   :  { %v2169_v19 = vadd.f32 %v2165_v8, %v5986_v17 }
0x1756   :  { %5104 = vtanh.f32 %v2169_v19  ;;  %v2086_v55 = vpop.f32.mrb[18].mxu1  ;;  %v4133_v25 = vmul.f32 -1.442695, %v2169_v19 }
0x1757   :  { %v5991_v11 = vadd.f32 %v2086_v55, %v2000_v13  ;;  %v2088_v20 = vpop.f32.mrb[19].mxu1 }
0x1758   :  { %v5993_v51 = vadd.f32 %v2088_v20, %v2004_v54 }
0x175a   :  { %v2243_v44 = vadd.f32 %v2241_v37, %v5993_v51 }
0x175c   :  { %5106 = vtanh.f32 %v2243_v44  ;;  %v4134_v23 = vmul.f32 -1.442695, %v2243_v44 }
0x175d   :  { %5108 = vpow2.f32 %v4133_v25 }
0x175e   :  { %5110 = vpow2.f32 %v4134_v23 }
0x1760   :  { %v5105_v40 = vpop.eup %5104 }
0x1761   :  { %2253 = vrot.lane.b32.xlu0 %v5105_v40, %s5385_s4 }
0x1766   :  { %v5107_v41 = vpop.eup %5106 }
0x1767   :  { %2277 = vrot.lane.b32.xlu1 %v5107_v41, %s5385_s4  ;;  %v5109_v56 = vpop.eup %5108 }
0x1768   :  { %v2247_v27 = vadd.f32 1.0, %v5109_v56  ;;  %v5111_v24 = vpop.eup %5110 }
0x1769   :  { %v2271_v30 = vadd.f32 1.0, %v5111_v24 }
0x176a   :  { %5112 = vrcp.f32 %v2247_v27 }
0x176b   :  { %5114 = vrcp.f32 %v2271_v30 }
0x1774   :  { %v5113_v29 = vpop.eup %5112 }
0x1775   :  { %v5115_v32 = vpop.eup %5114  ;;  %v2251_v39 = vmul.f32 0.0, %v5113_v29 }
0x1776   :  { %v2275_v45 = vmul.f32 0.0, %v5115_v32 }
0x17d3   :  { %v2254_v2 = vpop.permute.xlu0 %2253 }
0x17d4   :  { %v2256_v33 = vmul.f32 %v5113_v29, %v2254_v2 }
0x17d6   :  { %2258 = vrot.lane.b32.xlu0 %v2256_v33, %s5386_s8 }
0x17d9   :  { %v2278_v34 = vpop.permute.xlu1 %2277 }
0x17da   :  { %v2280_v35 = vmul.f32 %v5115_v32, %v2278_v34 }
0x17dc   :  { %2282 = vrot.lane.b32.xlu1 %v2280_v35, %s5386_s8 }
0x1848   :  { %v2259_v28 = vpop.permute.xlu0 %2258 }
0x1849   :  { %v6000_v42 = vadd.f32 %v2259_v28, %v2251_v39 }
0x184b   :  { %5116 = vtanh.f32 %v6000_v42  ;;  %v2459_v20 = vrot.slane %v6000_v42, 6 }
0x184e   :  { %v2283_v48 = vpop.permute.xlu1 %2282 }
0x184f   :  { %v6003_v50 = vadd.f32 %v2283_v48, %v2275_v45 }
0x1851   :  { %5118 = vtanh.f32 %v6003_v50  ;;  %v2486_v25 = vrot.slane %v6003_v50, 2 }
0x1855   :  { %v5117_v47 = vpop.eup %5116 }
0x1856   :  { %2264 = vrot.lane.b32.xlu0 %v5117_v47, %s5385_s4 }
0x185b   :  { %v5119_v14 = vpop.eup %5118 }
0x185c   :  { %2288 = vrot.lane.b32.xlu1 %v5119_v14, %s5385_s4 }
0x18c8   :  { %v2265_v53 = vpop.permute.xlu0 %2264 }
0x18c9   :  { %v6008_v36 = vmul.f32 %v5113_v29, %v2265_v53 }
0x18cb   :  { %2293 = vrot.lane.b32.xlu0 %v6008_v36, %s5386_s8 }
0x18ce   :  { %v2289_v52 = vpop.permute.xlu1 %2288 }
0x18cf   :  { %v6012_v57 = vmul.f32 %v5115_v32, %v2289_v52 }
0x18d1   :  { %v2372_v22 = vrot.slane %v6012_v57, 6 }
0x18d3   :  { %2373 = vrot.lane.b32.xlu1 %v2372_v22, %s5386_s8 }
0x193d   :  { %v2294_v58 = vpop.permute.xlu0 %2293 }
0x193e   :  { %4549 = vmatmul.mubr.msk.f32.vlgmr.msra.gmra.mrb[20].mxu1 %vm133_vm1, %v2294_v58 }
0x193f   :  { %4873 = vmatpush3.bf16.msra.mxu1 %v5922_v21  ;;  %4570 = vmatprep.mubr.msk.f32.mxu1 %vm5384_vm0, %v5383_v1 }
0x1940   :  { %4874 = vmatprep.subr.bf16.mxu1 %v5382_v0 }
0x1943   :  { %4876 = vmatpush3.bf16.msra.mxu1 %v5938_v31 }
0x1944   :  { %4883 = vmatprep.subr.bf16.mxu1 %v5382_v0 }
0x1945   :  { %v2374_v26 = vpop.permute.xlu1 %2373 }
0x1946   :  { %4560 = vmatmul.mubr.msk.f32.vlgmr.msra.gmra.mrb[24].mxu0 %vm133_vm1, %v2374_v26 }
0x1947   :  { %4879 = vmatpush3.bf16.msra.mxu0 %v5942_v43  ;;  %4581 = vmatprep.mubr.msk.f32.mxu0 %vm5384_vm0, %v5383_v1 }
0x1948   :  { %4880 = vmatprep.subr.bf16.mxu0 %v5382_v0 }
0x194b   :  { %4882 = vmatpush3.bf16.msra.mxu0 %v5949_v49 }
0x194c   :  { %4889 = vmatprep.subr.bf16.mxu0 %v5382_v0 }
0x1a11   :  { %v2363_v59 = vpop.f32.mrb[20].mxu1 }
0x1a12   :  { %v2368_v60 = vrot.slane %v2363_v59, 6  ;;  %v4550_v61 = vpop.f32.mrb[21].mxu1 }
0x1a14   :  { %v2370_v62 = vadd.f32 %v2368_v60, %v5986_v17 }
0x1a16   :  { %5120 = vtanh.f32 %v2370_v62  ;;  %v4137_v8 = vmul.f32 -1.442695, %v2370_v62 }
0x1a19   :  { %v2443_v63 = vpop.f32.mrb[24].mxu0 }
0x1a1a   :  { %v2448_v3 = vrot.slane %v2443_v63, 4  ;;  %v4561_v4 = vpop.f32.mrb[25].mxu0 }
0x1a1c   :  { %v2450_v6 = vadd.f32 %v2448_v3, %v5993_v51 }
0x1a1e   :  { %5122 = vtanh.f32 %v2450_v6  ;;  %v4138_v9 = vmul.f32 -1.442695, %v2450_v6 }
0x1a1f   :  { %5124 = vpow2.f32 %v4137_v8 }
0x1a20   :  { %v5121_v7 = vpop.eup %5120  ;;  %5126 = vpow2.f32 %v4138_v9 }
0x1a21   :  { %2463 = vrot.lane.b32.xlu0 %v5121_v7, %s5385_s4 }
0x1a28   :  { %v5123_v46 = vpop.eup %5122 }
0x1a29   :  { %2490 = vrot.lane.b32.xlu1 %v5123_v46, %s5385_s4  ;;  %v5125_v10 = vpop.eup %5124 }
0x1a2a   :  { %v2454_v12 = vadd.f32 1.0, %v5125_v10  ;;  %v5127_v15 = vpop.eup %5126 }
0x1a2b   :  { %v2481_v13 = vadd.f32 1.0, %v5127_v15 }
0x1a2c   :  { %5128 = vrcp.f32 %v2454_v12 }
0x1a2d   :  { %5130 = vrcp.f32 %v2481_v13 }
0x1a36   :  { %v5129_v54 = vpop.eup %5128 }
0x1a37   :  { %v5131_v19 = vpop.eup %5130  ;;  %v2461_v44 = vmul.f32 %v5129_v54, %v2459_v20 }
0x1a38   :  { %v2488_v23 = vmul.f32 %v5131_v19, %v2486_v25 }
0x1a93   :  { %v2464_v16 = vpop.permute.xlu0 %2463 }
0x1a94   :  { %v2466_v5 = vmul.f32 %v5129_v54, %v2464_v16 }
0x1a96   :  { %2468 = vrot.lane.b32.xlu0 %v2466_v5, %s5386_s8 }
0x1a9b   :  { %v2491_v55 = vpop.permute.xlu1 %2490 }
0x1a9c   :  { %v2493_v37 = vmul.f32 %v5131_v19, %v2491_v55 }
0x1a9e   :  { %2495 = vrot.lane.b32.xlu1 %v2493_v37, %s5386_s8 }
0x1b08   :  { %v2469_v40 = vpop.permute.xlu0 %2468 }
0x1b09   :  { %v6037_v41 = vadd.f32 %v2469_v40, %v2461_v44 }
0x1b0b   :  { %5132 = vtanh.f32 %v6037_v41  ;;  %v2678_v9 = vrot.slane %v6037_v41, 6 }
0x1b10   :  { %v2496_v56 = vpop.permute.xlu1 %2495 }
0x1b11   :  { %v6041_v27 = vadd.f32 %v2496_v56, %v2488_v23 }
0x1b13   :  { %5134 = vtanh.f32 %v6041_v27  ;;  %v2705_v13 = vrot.slane %v6041_v27, 2 }
0x1b15   :  { %v5133_v24 = vpop.eup %5132 }
0x1b16   :  { %2474 = vrot.lane.b32.xlu0 %v5133_v24, %s5385_s4 }
0x1b1d   :  { %v5135_v30 = vpop.eup %5134 }
0x1b1e   :  { %2501 = vrot.lane.b32.xlu1 %v5135_v30, %s5385_s4 }
0x1b88   :  { %v2475_v29 = vpop.permute.xlu0 %2474 }
0x1b89   :  { %v6046_v2 = vmul.f32 %v5129_v54, %v2475_v29 }
0x1b8b   :  { %v2506_v33 = vrot.slane %v6046_v2, 2 }
0x1b8d   :  { %2513 = vrot.lane.b32.xlu0 %v2506_v33, %s5386_s8  ;;  %v2508_v44 = vmax.f32 %v6008_v36, %v2506_v33 }
0x1b90   :  { %v2502_v32 = vpop.permute.xlu1 %2501 }
0x1b91   :  { %v6052_v34 = vmul.f32 %v5131_v19, %v2502_v32 }
0x1b93   :  { %v2591_v35 = vrot.slane %v6052_v34, 4  ;;  %v2510_v25 = vrot.slane %v6052_v34, 6 }
0x1b95   :  { %2592 = vrot.lane.b32.xlu1 %v2591_v35, %s5386_s8  ;;  %v2512_v27 = vmax.f32 %v6012_v57, %v2510_v25 }
0x1bff   :  { %v2514_v39 = vpop.permute.xlu0 %2513 }
0x1c00   :  { %4571 = vmatmul.mubr.msk.f32.vlgmr.msra.gmra.mrb[22].mxu1 %vm133_vm1, %v2514_v39 }
0x1c01   :  { %4885 = vmatpush3.bf16.msra.mxu1 %v5922_v21  ;;  %4592 = vmatprep.mubr.msk.f32.mxu1 %vm5384_vm0, %v5383_v1 }
0x1c02   :  { %4886 = vmatprep.subr.bf16.mxu1 %v5382_v0 }
0x1c05   :  { %4888 = vmatpush3.bf16.msra.mxu1 %v5938_v31 }
0x1c06   :  { %4895 = vmatprep.subr.bf16.mxu1 %v5382_v0 }
0x1c07   :  { %v2593_v28 = vpop.permute.xlu1 %2592 }
0x1c08   :  { %4582 = vmatmul.mubr.msk.f32.vlgmr.msra.gmra.mrb[26].mxu0 %vm133_vm1, %v2593_v28 }
0x1c09   :  { %4891 = vmatpush3.bf16.msra.mxu0 %v5942_v43  ;;  %4603 = vmatprep.mubr.msk.f32.mxu0 %vm5384_vm0, %v5383_v1 }
0x1c0a   :  { %4892 = vmatprep.subr.bf16.mxu0 %v5382_v0 }
0x1c0d   :  { %4894 = vmatpush3.bf16.msra.mxu0 %v5949_v49 }
0x1c0e   :  { %4901 = vmatprep.subr.bf16.mxu0 %v5382_v0 }
0x1cd3   :  { %v2583_v42 = vpop.f32.mrb[22].mxu1 }
0x1cd4   :  { %v2588_v45 = vrot.slane %v2583_v42, 4  ;;  %v4572_v48 = vpop.f32.mrb[23].mxu1 }
0x1cd6   :  { %v2590_v50 = vadd.f32 %v2588_v45, %v5986_v17 }
0x1cd8   :  { %5136 = vtanh.f32 %v2590_v50  ;;  %v4141_v26 = vmul.f32 -1.442695, %v2590_v50 }
0x1cdb   :  { %v2662_v47 = vpop.f32.mrb[26].mxu0 }
0x1cdc   :  { %v2667_v14 = vrot.slane %v2662_v47, 6  ;;  %v4583_v53 = vpop.f32.mrb[27].mxu0 }
0x1cde   :  { %v2669_v52 = vadd.f32 %v2667_v14, %v5993_v51 }
0x1ce0   :  { %5138 = vtanh.f32 %v2669_v52  ;;  %v4142_v59 = vmul.f32 -1.442695, %v2669_v52 }
0x1ce1   :  { %5140 = vpow2.f32 %v4141_v26 }
0x1ce2   :  { %v5137_v22 = vpop.eup %5136  ;;  %5142 = vpow2.f32 %v4142_v59 }
0x1ce3   :  { %2682 = vrot.lane.b32.xlu0 %v5137_v22, %s5385_s4 }
0x1cea   :  { %v5139_v58 = vpop.eup %5138 }
0x1ceb   :  { %2709 = vrot.lane.b32.xlu1 %v5139_v58, %s5385_s4  ;;  %v5141_v60 = vpop.eup %5140 }
0x1cec   :  { %v2673_v61 = vadd.f32 1.0, %v5141_v60  ;;  %v5143_v62 = vpop.eup %5142 }
0x1ced   :  { %v2700_v63 = vadd.f32 1.0, %v5143_v62 }
0x1cee   :  { %5144 = vrcp.f32 %v2673_v61 }
0x1cef   :  { %5146 = vrcp.f32 %v2700_v63 }
0x1cf8   :  { %v5145_v3 = vpop.eup %5144 }
0x1cf9   :  { %v5147_v7 = vpop.eup %5146  ;;  %v2680_v10 = vmul.f32 %v5145_v3, %v2678_v9 }
0x1cfa   :  { %v2707_v54 = vmul.f32 %v5147_v7, %v2705_v13 }
0x1d55   :  { %v2683_v4 = vpop.permute.xlu0 %2682 }
0x1d56   :  { %v2685_v6 = vmul.f32 %v5145_v3, %v2683_v4 }
0x1d58   :  { %2687 = vrot.lane.b32.xlu0 %v2685_v6, %s5386_s8 }
0x1d5d   :  { %v2710_v46 = vpop.permute.xlu1 %2709 }
0x1d5e   :  { %v2712_v8 = vmul.f32 %v5147_v7, %v2710_v46 }
0x1d60   :  { %2714 = vrot.lane.b32.xlu1 %v2712_v8, %s5386_s8 }
0x1dca   :  { %v2688_v12 = vpop.permute.xlu0 %2687 }
0x1dcb   :  { %v6077_v15 = vadd.f32 %v2688_v12, %v2680_v10 }
0x1dcd   :  { %5148 = vtanh.f32 %v6077_v15  ;;  %v2894_v60 = vrot.slane %v6077_v15, 6 }
0x1dd2   :  { %v2715_v16 = vpop.permute.xlu1 %2714 }
0x1dd3   :  { %v6081_v5 = vadd.f32 %v2715_v16, %v2707_v54 }
0x1dd5   :  { %5150 = vtanh.f32 %v6081_v5 }
0x1dd7   :  { %v5149_v19 = vpop.eup %5148 }
0x1dd8   :  { %2693 = vrot.lane.b32.xlu0 %v5149_v19, %s5385_s4 }
0x1ddf   :  { %v5151_v55 = vpop.eup %5150 }
0x1de0   :  { %2720 = vrot.lane.b32.xlu1 %v5151_v55, %s5385_s4 }
0x1e4a   :  { %v2694_v37 = vpop.permute.xlu0 %2693 }
0x1e4b   :  { %v2696_v20 = vmul.f32 %v5145_v3, %v2694_v37  ;;  %v2921_v3 = vrot.slane %v6081_v5, 2 }
0x1e4d   :  { %v2725_v40 = vrot.slane %v2696_v20, 4 }
0x1e4f   :  { %v6089_v41 = vmax.f32 %v2508_v44, %v2725_v40  ;;  %2732 = vrot.lane.b32.xlu0 %v2725_v40, %s5386_s8 }
0x1e52   :  { %v2721_v23 = vpop.permute.xlu1 %2720 }
0x1e53   :  { %v2723_v56 = vmul.f32 %v5147_v7, %v2721_v23 }
0x1e55   :  { %v2729_v24 = vrot.slane %v2723_v56, 4  ;;  %v2810_v30 = vrot.slane %v2723_v56, 2 }
0x1e57   :  { %v6094_v29 = vmax.f32 %v2512_v27, %v2729_v24  ;;  %2811 = vrot.lane.b32.xlu1 %v2810_v30, %s5386_s8 }
0x1ec1   :  { %v2733_v2 = vpop.permute.xlu0 %2732 }
0x1ec2   :  { %4593 = vmatmul.mubr.msk.f32.vlgmr.msra.gmra.mrb[24].mxu1 %vm133_vm1, %v2733_v2 }
0x1ec3   :  { %4897 = vmatpush3.bf16.msra.mxu1 %v5922_v21  ;;  %4614 = vmatprep.mubr.msk.f32.mxu1 %vm5384_vm0, %v5383_v1 }
0x1ec4   :  { %4898 = vmatprep.subr.bf16.mxu1 %v5382_v0 }
0x1ec7   :  { %4900 = vmatpush3.bf16.msra.mxu1 %v5938_v31 }
0x1ec8   :  { %4907 = vmatprep.subr.bf16.mxu1 %v5382_v0 }
0x1ec9   :  { %v2812_v36 = vpop.permute.xlu1 %2811 }
0x1eca   :  { %4604 = vmatmul.mubr.msk.f32.vlgmr.msra.gmra.mrb[28].mxu0 %vm133_vm1, %v2812_v36 }
0x1ecb   :  { %4903 = vmatpush3.bf16.msra.mxu0 %v5942_v43  ;;  %4625 = vmatprep.mubr.msk.f32.mxu0 %vm5384_vm0, %v5383_v1 }
0x1ecc   :  { %4904 = vmatprep.subr.bf16.mxu0 %v5382_v0 }
0x1ecf   :  { %4906 = vmatpush3.bf16.msra.mxu0 %v5949_v49 }
0x1ed0   :  { %4913 = vmatprep.subr.bf16.mxu0 %v5382_v0 }
0x1f95   :  { %v2802_v57 = vpop.f32.mrb[24].mxu1 }
0x1f96   :  { %v2807_v33 = vrot.slane %v2802_v57, 2  ;;  %v4594_v32 = vpop.f32.mrb[25].mxu1 }
0x1f98   :  { %v2809_v34 = vadd.f32 %v2807_v33, %v5986_v17 }
0x1f9a   :  { %5152 = vtanh.f32 %v2809_v34  ;;  %v4145_v48 = vmul.f32 -1.442695, %v2809_v34 }
0x1f9d   :  { %v2881_v35 = vpop.f32.mrb[28].mxu0 }
0x1f9e   :  { %v2885_v39 = vadd.f32 %v2881_v35, %v5993_v51  ;;  %v4605_v28 = vpop.f32.mrb[29].mxu0 }
0x1fa0   :  { %5154 = vtanh.f32 %v2885_v39  ;;  %v4146_v50 = vmul.f32 -1.442695, %v2885_v39 }
0x1fa1   :  { %5156 = vpow2.f32 %v4145_v48 }
0x1fa2   :  { %5158 = vpow2.f32 %v4146_v50 }
0x1fa4   :  { %v5153_v42 = vpop.eup %5152 }
0x1fa5   :  { %2898 = vrot.lane.b32.xlu0 %v5153_v42, %s5385_s4 }
0x1faa   :  { %v5155_v45 = vpop.eup %5154 }
0x1fab   :  { %2925 = vrot.lane.b32.xlu1 %v5155_v45, %s5385_s4  ;;  %v5157_v47 = vpop.eup %5156 }
0x1fac   :  { %v2889_v14 = vadd.f32 1.0, %v5157_v47  ;;  %v5159_v53 = vpop.eup %5158 }
0x1fad   :  { %v2916_v17 = vadd.f32 1.0, %v5159_v53 }
0x1fae   :  { %5160 = vrcp.f32 %v2889_v14 }
0x1faf   :  { %5162 = vrcp.f32 %v2916_v17 }
0x1fb8   :  { %v5161_v52 = vpop.eup %5160 }
0x1fb9   :  { %v5163_v58 = vpop.eup %5162  ;;  %v2896_v61 = vmul.f32 %v5161_v52, %v2894_v60 }
0x1fba   :  { %v2923_v4 = vmul.f32 %v5163_v58, %v2921_v3 }
0x2017   :  { %v2899_v51 = vpop.permute.xlu0 %2898 }
0x2018   :  { %v2901_v22 = vmul.f32 %v5161_v52, %v2899_v51 }
0x201a   :  { %2903 = vrot.lane.b32.xlu0 %v2901_v22, %s5386_s8 }
0x201d   :  { %v2926_v26 = vpop.permute.xlu1 %2925 }
0x201e   :  { %v2928_v59 = vmul.f32 %v5163_v58, %v2926_v26 }
0x2020   :  { %2930 = vrot.lane.b32.xlu1 %v2928_v59, %s5386_s8 }
0x208c   :  { %v2904_v62 = vpop.permute.xlu0 %2903 }
0x208d   :  { %v6118_v63 = vadd.f32 %v2904_v62, %v2896_v61 }
0x208f   :  { %5164 = vtanh.f32 %v6118_v63  ;;  %v3109_v42 = vrot.slane %v6118_v63, 6 }
0x2092   :  { %v2931_v6 = vpop.permute.xlu1 %2930 }
0x2093   :  { %v6122_v7 = vadd.f32 %v2931_v6, %v2923_v4 }
0x2095   :  { %5166 = vtanh.f32 %v6122_v7  ;;  %v3136_v47 = vrot.slane %v6122_v7, 2 }
0x2099   :  { %v5165_v46 = vpop.eup %5164 }
0x209a   :  { %2909 = vrot.lane.b32.xlu0 %v5165_v46, %s5385_s4 }
0x209f   :  { %v5167_v8 = vpop.eup %5166 }
0x20a0   :  { %2936 = vrot.lane.b32.xlu1 %v5167_v8, %s5385_s4 }
0x210c   :  { %v2910_v9 = vpop.permute.xlu0 %2909 }
0x210d   :  { %v2912_v10 = vmul.f32 %v5161_v52, %v2910_v9 }
0x210f   :  { %v2941_v12 = vrot.slane %v2912_v10, 6 }
0x2111   :  { %v6128_v15 = vmax.f32 %v6089_v41, %v2941_v12  ;;  %2948 = vrot.lane.b32.xlu0 %v2941_v12, %s5386_s8 }
0x2112   :  { %v2937_v13 = vpop.permute.xlu1 %2936 }
0x2113   :  { %v2939_v54 = vmul.f32 %v5163_v58, %v2937_v13 }
0x2115   :  { %v2945_v16 = vrot.slane %v2939_v54, 2  ;;  %3023 = vrot.lane.b32.xlu1 %v2939_v54, %s5386_s8 }
0x2117   :  { %v6133_v5 = vmax.f32 %v6094_v29, %v2945_v16 }
0x2183   :  { %v2949_v19 = vpop.permute.xlu0 %2948 }
0x2184   :  { %4615 = vmatmul.mubr.msk.f32.vlgmr.msra.gmra.mrb[26].mxu1 %vm133_vm1, %v2949_v19 }
0x2185   :  { %4909 = vmatpush3.bf16.msra.mxu1 %v5922_v21  ;;  %4636 = vmatprep.mubr.msk.f32.mxu1 %vm5384_vm0, %v5383_v1 }
0x2186   :  { %4910 = vmatprep.subr.bf16.mxu1 %v5382_v0 }
0x2187   :  { %v3024_v55 = vpop.permute.xlu1 %3023 }
0x2188   :  { %4626 = vmatmul.mubr.msk.f32.vlgmr.msra.gmra.mrb[30].mxu0 %vm133_vm1, %v3024_v55 }
0x2189   :  { %4912 = vmatpush3.bf16.msra.mxu1 %v5938_v31  ;;  %4915 = vmatpush3.bf16.msra.mxu0 %v5942_v43 }
0x218a   :  { %4916 = vmatprep.subr.bf16.mxu0 %v5382_v0  ;;  %4647 = vmatprep.mubr.msk.f32.mxu0 %vm5384_vm0, %v5383_v1 }
0x218b   :  { %4919 = vmatprep.subr.bf16.mxu1 %v5382_v0 }
0x218d   :  { %4918 = vmatpush3.bf16.msra.mxu0 %v5949_v49 }
0x218e   :  { %4925 = vmatprep.subr.bf16.mxu0 %v5382_v0 }
0x2257   :  { %v3018_v37 = vpop.f32.mrb[26].mxu1 }
0x2258   :  { %v3022_v20 = vadd.f32 %v3018_v37, %v5991_v11  ;;  %v4616_v44 = vpop.f32.mrb[27].mxu1 }
0x225a   :  { %5168 = vtanh.f32 %v3022_v20  ;;  %v4149_v24 = vmul.f32 -1.442695, %v3022_v20 }
0x225b   :  { %v3093_v40 = vpop.f32.mrb[30].mxu0 }
0x225c   :  { %v3098_v41 = vrot.slane %v3093_v40, 2  ;;  %v4627_v25 = vpop.f32.mrb[31].mxu0 }
0x225e   :  { %v3100_v23 = vadd.f32 %v3098_v41, %v5988_v18 }
0x2260   :  { %5170 = vtanh.f32 %v3100_v23  ;;  %v4150_v30 = vmul.f32 -1.442695, %v3100_v23 }
0x2261   :  { %5172 = vpow2.f32 %v4149_v24 }
0x2262   :  { %5174 = vpow2.f32 %v4150_v30 }
0x2264   :  { %v5169_v56 = vpop.eup %5168 }
0x2265   :  { %3113 = vrot.lane.b32.xlu0 %v5169_v56, %s5385_s4 }
0x226a   :  { %v5171_v27 = vpop.eup %5170 }
0x226b   :  { %3140 = vrot.lane.b32.xlu1 %v5171_v27, %s5385_s4  ;;  %v5173_v29 = vpop.eup %5172 }
0x226c   :  { %v3104_v2 = vadd.f32 1.0, %v5173_v29  ;;  %v5175_v36 = vpop.eup %5174 }
0x226d   :  { %v3131_v57 = vadd.f32 1.0, %v5175_v36 }
0x226e   :  { %5176 = vrcp.f32 %v3104_v2 }
0x226f   :  { %5178 = vrcp.f32 %v3131_v57 }
0x2278   :  { %v5177_v33 = vpop.eup %5176 }
0x2279   :  { %v5179_v35 = vpop.eup %5178  ;;  %v3111_v45 = vmul.f32 %v5177_v33, %v3109_v42 }
0x227a   :  { %v3138_v14 = vmul.f32 %v5179_v35, %v3136_v47 }
0x22d7   :  { %v3114_v32 = vpop.permute.xlu0 %3113 }
0x22d8   :  { %v3116_v34 = vmul.f32 %v5177_v33, %v3114_v32 }
0x22da   :  { %3118 = vrot.lane.b32.xlu0 %v3116_v34, %s5386_s8 }
0x22dd   :  { %v3141_v39 = vpop.permute.xlu1 %3140 }
0x22de   :  { %v3143_v28 = vmul.f32 %v5179_v35, %v3141_v39 }
0x22e0   :  { %3145 = vrot.lane.b32.xlu1 %v3143_v28, %s5386_s8 }
0x234c   :  { %v3119_v48 = vpop.permute.xlu0 %3118 }
0x234d   :  { %v6156_v50 = vadd.f32 %v3119_v48, %v3111_v45 }
0x234f   :  { %5180 = vtanh.f32 %v6156_v50  ;;  %v3324_v24 = vrot.slane %v6156_v50, 6 }
0x2352   :  { %v3146_v53 = vpop.permute.xlu1 %3145 }
0x2353   :  { %v6160_v17 = vadd.f32 %v3146_v53, %v3138_v14 }
0x2355   :  { %5182 = vtanh.f32 %v6160_v17  ;;  %v3351_v36 = vrot.slane %v6160_v17, 2 }
0x2359   :  { %v5181_v52 = vpop.eup %5180 }
0x235a   :  { %3124 = vrot.lane.b32.xlu0 %v5181_v52, %s5385_s4 }
0x235f   :  { %v5183_v51 = vpop.eup %5182 }
0x2360   :  { %3151 = vrot.lane.b32.xlu1 %v5183_v51, %s5385_s4 }
0x23cc   :  { %v3125_v22 = vpop.permute.xlu0 %3124 }
0x23cd   :  { %v6165_v58 = vmul.f32 %v5177_v33, %v3125_v22 }
0x23cf   :  { %v3155_v26 = vmax.f32 %v6128_v15, %v6165_v58  ;;  %3158 = vrot.lane.b32.xlu0 %v6165_v58, %s5386_s8 }
0x23d2   :  { %v3152_v59 = vpop.permute.xlu1 %3151 }
0x23d3   :  { %v6171_v60 = vmul.f32 %v5179_v35, %v3152_v59 }
0x23d5   :  { %v3156_v61 = vmax.f32 %v6133_v5, %v6171_v60  ;;  %v3237_v62 = vrot.slane %v6171_v60, 6 }
0x23d7   :  { %3238 = vrot.lane.b32.xlu1 %v3237_v62, %s5386_s8 }
0x2441   :  { %v3159_v63 = vpop.permute.xlu0 %3158 }
0x2442   :  { %4637 = vmatmul.mubr.msk.f32.vlgmr.msra.gmra.mrb[28].mxu1 %vm133_vm1, %v3159_v63 }
0x2443   :  { %4921 = vmatpush3.bf16.msra.mxu1 %v5922_v21  ;;  %4658 = vmatprep.mubr.msk.f32.mxu1 %vm5384_vm0, %v5383_v1 }
0x2444   :  { %4922 = vmatprep.subr.bf16.mxu1 %v5382_v0 }
0x2447   :  { %4924 = vmatpush3.bf16.msra.mxu1 %v5938_v31 }
0x2448   :  { %4931 = vmatprep.subr.bf16.mxu1 %v5382_v0 }
0x2449   :  { %v3239_v3 = vpop.permute.xlu1 %3238 }
0x244a   :  { %4648 = vmatmul.mubr.msk.f32.vlgmr.msra.gmra.mrb[32].mxu0 %vm133_vm1, %v3239_v3 }
0x244b   :  { %4927 = vmatpush3.bf16.msra.mxu0 %v5942_v43  ;;  %4669 = vmatprep.mubr.msk.f32.mxu0 %vm5384_vm0, %v5383_v1 }
0x244c   :  { %4928 = vmatprep.subr.bf16.mxu0 %v5382_v0 }
0x244f   :  { %4930 = vmatpush3.bf16.msra.mxu0 %v5949_v49 }
0x2450   :  { %4937 = vmatprep.subr.bf16.mxu0 %v5382_v0 }
0x2515   :  { %v3228_v4 = vpop.f32.mrb[28].mxu1 }
0x2516   :  { %v3233_v6 = vrot.slane %v3228_v4, 6  ;;  %v4638_v7 = vpop.f32.mrb[29].mxu1 }
0x2518   :  { %v3235_v46 = vadd.f32 %v3233_v6, %v5991_v11 }
0x251a   :  { %5184 = vtanh.f32 %v3235_v46  ;;  %v4153_v16 = vmul.f32 -1.442695, %v3235_v46 }
0x251d   :  { %v3308_v8 = vpop.f32.mrb[32].mxu0 }
0x251e   :  { %v3313_v9 = vrot.slane %v3308_v8, 4  ;;  %v4649_v10 = vpop.f32.mrb[33].mxu0 }
0x2520   :  { %v3315_v12 = vadd.f32 %v3313_v9, %v5988_v18 }
0x2522   :  { %5186 = vtanh.f32 %v3315_v12  ;;  %v4154_v19 = vmul.f32 -1.442695, %v3315_v12 }
0x2523   :  { %5188 = vpow2.f32 %v4153_v16 }
0x2524   :  { %v5185_v13 = vpop.eup %5184  ;;  %5190 = vpow2.f32 %v4154_v19 }
0x2525   :  { %3328 = vrot.lane.b32.xlu0 %v5185_v13, %s5385_s4 }
0x252c   :  { %v5187_v54 = vpop.eup %5186 }
0x252d   :  { %3355 = vrot.lane.b32.xlu1 %v5187_v54, %s5385_s4  ;;  %v5189_v55 = vpop.eup %5188 }
0x252e   :  { %v3319_v37 = vadd.f32 1.0, %v5189_v55  ;;  %v5191_v20 = vpop.eup %5190 }
0x252f   :  { %v3346_v44 = vadd.f32 1.0, %v5191_v20 }
0x2530   :  { %5192 = vrcp.f32 %v3319_v37 }
0x2531   :  { %5194 = vrcp.f32 %v3346_v44 }
0x253a   :  { %v5193_v40 = vpop.eup %5192 }
0x253b   :  { %v5195_v23 = vpop.eup %5194  ;;  %v3326_v30 = vmul.f32 %v5193_v40, %v3324_v24 }
0x253c   :  { %v3353_v57 = vmul.f32 %v5195_v23, %v3351_v36 }
0x2597   :  { %v3329_v41 = vpop.permute.xlu0 %3328 }
0x2598   :  { %v3331_v25 = vmul.f32 %v5193_v40, %v3329_v41 }
0x259a   :  { %3333 = vrot.lane.b32.xlu0 %v3331_v25, %s5386_s8 }
0x259f   :  { %v3356_v56 = vpop.permute.xlu1 %3355 }
0x25a0   :  { %v3358_v27 = vmul.f32 %v5195_v23, %v3356_v56 }
0x25a2   :  { %3360 = vrot.lane.b32.xlu1 %v3358_v27, %s5386_s8 }
0x260c   :  { %v3334_v29 = vpop.permute.xlu0 %3333 }
0x260d   :  { %v6198_v2 = vadd.f32 %v3334_v29, %v3326_v30 }
0x260f   :  { %5196 = vtanh.f32 %v6198_v2  ;;  %v3543_v10 = vrot.slane %v6198_v2, 6 }
0x2614   :  { %v3361_v33 = vpop.permute.xlu1 %3360 }
0x2615   :  { %v6202_v32 = vadd.f32 %v3361_v33, %v3353_v57 }
0x2617   :  { %5198 = vtanh.f32 %v6202_v32  ;;  %v3570_v16 = vrot.slane %v6202_v32, 2 }
0x2619   :  { %v5197_v34 = vpop.eup %5196 }
0x261a   :  { %3339 = vrot.lane.b32.xlu0 %v5197_v34, %s5385_s4 }
0x2621   :  { %v5199_v35 = vpop.eup %5198 }
0x2622   :  { %3366 = vrot.lane.b32.xlu1 %v5199_v35, %s5385_s4 }
0x268c   :  { %v3340_v39 = vpop.permute.xlu0 %3339 }
0x268d   :  { %v3342_v28 = vmul.f32 %v5193_v40, %v3340_v39 }
0x268f   :  { %v3371_v42 = vrot.slane %v3342_v28, 2 }
0x2691   :  { %v6210_v45 = vmax.f32 %v3155_v26, %v3371_v42  ;;  %3378 = vrot.lane.b32.xlu0 %v3371_v42, %s5386_s8 }
0x2694   :  { %v3367_v48 = vpop.permute.xlu1 %3366 }
0x2695   :  { %v3369_v50 = vmul.f32 %v5195_v23, %v3367_v48 }
0x2697   :  { %v3375_v47 = vrot.slane %v3369_v50, 6  ;;  %v3456_v14 = vrot.slane %v3369_v50, 4 }
0x2699   :  { %v6216_v53 = vmax.f32 %v3156_v61, %v3375_v47  ;;  %3457 = vrot.lane.b32.xlu1 %v3456_v14, %s5386_s8 }
0x2703   :  { %v3379_v17 = vpop.permute.xlu0 %3378 }
0x2704   :  { %4659 = vmatmul.mubr.msk.f32.vlgmr.msra.gmra.mrb[30].mxu1 %vm133_vm1, %v3379_v17 }
0x2705   :  { %4933 = vmatpush3.bf16.msra.mxu1 %v5922_v21  ;;  %4680 = vmatprep.mubr.msk.f32.mxu1 %vm5384_vm0, %v5383_v1 }
0x2706   :  { %4934 = vmatprep.subr.bf16.mxu1 %v5382_v0 }
0x2709   :  { %4936 = vmatpush3.bf16.msra.mxu1 %v5938_v31 }
0x270a   :  { %4943 = vmatprep.subr.bf16.mxu1 %v5382_v0 }
0x270b   :  { %v3458_v15 = vpop.permute.xlu1 %3457 }
0x270c   :  { %4670 = vmatmul.mubr.msk.f32.vlgmr.msra.gmra.mrb[34].mxu0 %vm133_vm1, %v3458_v15 }
0x270d   :  { %4939 = vmatpush3.bf16.msra.mxu0 %v5942_v43  ;;  %4691 = vmatprep.mubr.msk.f32.mxu0 %vm5384_vm0, %v5383_v1 }
0x270e   :  { %4940 = vmatprep.subr.bf16.mxu0 %v5382_v0 }
0x2711   :  { %4942 = vmatpush3.bf16.msra.mxu0 %v5949_v49 }
0x2712   :  { %4949 = vmatprep.subr.bf16.mxu0 %v5382_v0 }
0x27d7   :  { %v3448_v21 = vpop.f32.mrb[30].mxu1 }
0x27d8   :  { %v3453_v5 = vrot.slane %v3448_v21, 4  ;;  %v4660_v52 = vpop.f32.mrb[31].mxu1 }
0x27da   :  { %v3455_v31 = vadd.f32 %v3453_v5, %v5991_v11 }
0x27dc   :  { %5200 = vtanh.f32 %v3455_v31  ;;  %v4157_v49 = vmul.f32 -1.442695, %v3455_v31 }
0x27df   :  { %v3527_v51 = vpop.f32.mrb[34].mxu0 }
0x27e0   :  { %v3532_v22 = vrot.slane %v3527_v51, 6  ;;  %v4671_v58 = vpop.f32.mrb[35].mxu0 }
0x27e2   :  { %v3534_v43 = vadd.f32 %v3532_v22, %v5988_v18 }
0x27e4   :  { %5202 = vtanh.f32 %v3534_v43  ;;  %v4158_v60 = vmul.f32 -1.442695, %v3534_v43 }
0x27e5   :  { %5204 = vpow2.f32 %v4157_v49 }
0x27e6   :  { %v5201_v26 = vpop.eup %5200  ;;  %5206 = vpow2.f32 %v4158_v60 }
0x27e7   :  { %3547 = vrot.lane.b32.xlu0 %v5201_v26, %s5385_s4 }
0x27ee   :  { %v5203_v59 = vpop.eup %5202 }
0x27ef   :  { %3574 = vrot.lane.b32.xlu1 %v5203_v59, %s5385_s4  ;;  %v5205_v61 = vpop.eup %5204 }
0x27f0   :  { %v3538_v62 = vadd.f32 1.0, %v5205_v61  ;;  %v5207_v63 = vpop.eup %5206  ;;  %v3839_v61 = vld [vmem:[%s6340_s10] sm:$0xff] }
0x27f1   :  { %v3565_v3 = vadd.f32 1.0, %v5207_v63  ;;  %v3835_v63 = vld [vmem:[%s6339_s9] sm:$0xff] }
0x27f2   :  { %5208 = vrcp.f32 %v3538_v62  ;;  %v3840_v62 = vld [vmem:[%s6340_s10 + $0x8] sm:$0xff] }
0x27f3   :  { %5210 = vrcp.f32 %v3565_v3  ;;  %v4944_v3 = vpack.c.bf16 %v3840_v62, %v3839_v61 }
0x27fc   :  { %v5209_v4 = vpop.eup %5208 }
0x27fd   :  { %v5211_v46 = vpop.eup %5210  ;;  %v3545_v12 = vmul.f32 %v5209_v4, %v3543_v10  ;;  %v3838_v10 = vld [vmem:[%s6339_s9 + $0x18] sm:$0xff] }
0x27fe   :  { %v3572_v19 = vmul.f32 %v5211_v46, %v3570_v16 }
0x2859   :  { %v3548_v6 = vpop.permute.xlu0 %3547 }
0x285a   :  { %v3550_v7 = vmul.f32 %v5209_v4, %v3548_v6  ;;  %v3841_v6 = vld [vmem:[%s6340_s10 + $0x10] sm:$0xff] }
0x285c   :  { %3552 = vrot.lane.b32.xlu0 %v3550_v7, %s5386_s8  ;;  %v3842_v7 = vld [vmem:[%s6340_s10 + $0x18] sm:$0xff] }
0x2861   :  { %v3575_v8 = vpop.permute.xlu1 %3574 }
0x2862   :  { %v3577_v9 = vmul.f32 %v5211_v46, %v3575_v8 }
0x2864   :  { %3579 = vrot.lane.b32.xlu1 %v3577_v9, %s5386_s8  ;;  %v3837_v9 = vld [vmem:[%s6339_s9 + $0x10] sm:$0xff] }
0x28ce   :  { %v3553_v13 = vpop.permute.xlu0 %3552 }
0x28cf   :  { %v3555_v54 = vadd.f32 %v3553_v13, %v3545_v12  ;;  %v4947_v12 = vpack.c.bf16 %v3842_v7, %v3841_v6  ;;  %v4953_v13 = vpack.c.bf16 %v3838_v10, %v3837_v9 }
0x28d1   :  { %5212 = vtanh.f32 %v3555_v54  ;;  %v3759_v31 = vrot.slane %v3555_v54, 6  ;;  %v5232_v54 = vld [vmem:[#allocation3 + $0x8] sm:$0xff] }
0x28d2   :  { %v3829_v16 = vrot.slane %v5232_v54, 6 }
0x28d6   :  { %v3580_v55 = vpop.permute.xlu1 %3579 }
0x28d7   :  { %v3582_v37 = vadd.f32 %v3580_v55, %v3572_v19  ;;  %v3831_v19 = vmax.f32 %v5604_v38, %v3829_v16  ;;  %v3991_v38 = vld [vmem:[%s6341_s11] sm:$0xff] }
0x28d9   :  { %5214 = vtanh.f32 %v3582_v37  ;;  %v3786_v43 = vrot.slane %v3582_v37, 2  ;;  %v3832_v55 = vmax.f32 %v3831_v19, 0.0 }
0x28db   :  { %v5213_v20 = vpop.eup %5212 }
0x28dc   :  { %3558 = vrot.lane.b32.xlu0 %v5213_v20, %s5385_s4 }
0x28e3   :  { %v5215_v44 = vpop.eup %5214 }
0x28e4   :  { %3585 = vrot.lane.b32.xlu1 %v5215_v44, %s5385_s4 }
0x294e   :  { %v3559_v40 = vpop.permute.xlu0 %3558 }
0x294f   :  { %v3561_v41 = vmul.f32 %v5209_v4, %v3559_v40  ;;  %v3836_v4 = vld [vmem:[%s6339_s9 + $0x8] sm:$0xff] }
0x2950   :  { %v4950_v8 = vpack.c.bf16 %v3836_v4, %v3835_v63 }
0x2951   :  { %v3590_v25 = vrot.slane %v3561_v41, 4 }
0x2953   :  { %v6244_v23 = vmax.f32 %v6210_v45, %v3590_v25  ;;  %3597 = vrot.lane.b32.xlu0 %v3590_v25, %s5386_s8 }
0x2956   :  { %v3586_v56 = vpop.permute.xlu1 %3585 }
0x2957   :  { %v3588_v27 = vmul.f32 %v5211_v46, %v3586_v56 }
0x2959   :  { %v3594_v24 = vrot.slane %v3588_v27, 4  ;;  %v3675_v30 = vrot.slane %v3588_v27, 2 }
0x295b   :  { %v6248_v29 = vmax.f32 %v6216_v53, %v3594_v24  ;;  %3676 = vrot.lane.b32.xlu1 %v3675_v30, %s5386_s8 }
0x29c5   :  { %v3598_v2 = vpop.permute.xlu0 %3597 }
0x29c6   :  { %4681 = vmatmul.mubr.msk.f32.vlgmr.msra.gmra.mrb[32].mxu1 %vm133_vm1, %v3598_v2 }
0x29c7   :  { %4702 = vmatprep.mubr.msk.f32.mxu1 %vm5384_vm0, %v5383_v1  ;;  %4945 = vmatpush3.bf16.msra.mxu1 %v4944_v3 }
0x29c8   :  { %4946 = vmatprep.subr.bf16.mxu1 %v5382_v0 }
0x29cb   :  { %4948 = vmatpush3.bf16.msra.mxu1 %v4947_v12 }
0x29cc   :  { %4955 = vmatprep.subr.bf16.mxu1 %v5382_v0 }
0x29cd   :  { %v3677_v36 = vpop.permute.xlu1 %3676 }
0x29ce   :  { %4692 = vmatmul.mubr.msk.f32.vlgmr.msra.gmra.mrb[36].mxu0 %vm133_vm1, %v3677_v36 }
0x29cf   :  { %4713 = vmatprep.mubr.msk.f32.mxu0 %vm5384_vm0, %v5383_v1  ;;  %4951 = vmatpush3.bf16.msra.mxu0 %v4950_v8 }
0x29d0   :  { %4952 = vmatprep.subr.bf16.mxu0 %v5382_v0 }
0x29d3   :  { %4954 = vmatpush3.bf16.msra.mxu0 %v4953_v13 }
0x29d6   :  { %4714 = vmatmul.mubr.msk.f32.vlgmr.msra.gmra.mrb[38].mxu0 %vm133_vm1, %v3832_v55 }
0x2a99   :  { %v3667_v57 = vpop.f32.mrb[32].mxu1 }
0x2a9a   :  { %v3672_v33 = vrot.slane %v3667_v57, 2  ;;  %v4682_v32 = vpop.f32.mrb[33].mxu1  ;;  %v3993_v57 = vld [vmem:[%s6341_s11 + $0x10] sm:$0xff] }
0x2a9c   :  { %v3674_v34 = vadd.f32 %v3672_v33, %v5991_v11 }
0x2a9e   :  { %5216 = vtanh.f32 %v3674_v34  ;;  %v4161_v48 = vmul.f32 -1.442695, %v3674_v34 }
0x2aa1   :  { %v3746_v35 = vpop.f32.mrb[36].mxu0 }
0x2aa2   :  { %v3750_v39 = vadd.f32 %v3746_v35, %v5988_v18  ;;  %v4693_v28 = vpop.f32.mrb[37].mxu0 }
0x2aa4   :  { %5218 = vtanh.f32 %v3750_v39  ;;  %v4162_v50 = vmul.f32 -1.442695, %v3750_v39 }
0x2aa5   :  { %5220 = vpow2.f32 %v4161_v48 }
0x2aa6   :  { %5222 = vpow2.f32 %v4162_v50  ;;  %v4166_v50 = vld [vmem:[%s6342_s12] ss:$0 sm:$0xff] }
0x2aa8   :  { %v5217_v42 = vpop.eup %5216 }
0x2aa9   :  { %3763 = vrot.lane.b32.xlu0 %v5217_v42, %s5385_s4  ;;  %v3987_v35 = vpop.f32.mrb[38].mxu0 }
0x2aaa   :  { %v4715_v39 = vpop.f32.mrb[39].mxu0 }
0x2aae   :  { %v5219_v45 = vpop.eup %5218 }
0x2aaf   :  { %3790 = vrot.lane.b32.xlu1 %v5219_v45, %s5385_s4  ;;  %v5221_v47 = vpop.eup %5220 }
0x2ab0   :  { %v3754_v14 = vadd.f32 1.0, %v5221_v47  ;;  %v5223_v53 = vpop.eup %5222 }
0x2ab1   :  { %v3781_v11 = vadd.f32 1.0, %v5223_v53 }
0x2ab2   :  { %5224 = vrcp.f32 %v3754_v14 }
0x2ab3   :  { %5226 = vrcp.f32 %v3781_v11 }
0x2abc   :  { %v5225_v17 = vpop.eup %5224 }
0x2abd   :  { %v5227_v21 = vpop.eup %5226  ;;  %v3761_v51 = vmul.f32 %v5225_v17, %v3759_v31 }
0x2abe   :  { %v3788_v26 = vmul.f32 %v5227_v21, %v3786_v43 }
0x2b1b   :  { %v3764_v18 = vpop.permute.xlu0 %3763 }
0x2b1c   :  { %v3766_v15 = vmul.f32 %v5225_v17, %v3764_v18 }
0x2b1e   :  { %3768 = vrot.lane.b32.xlu0 %v3766_v15, %s5386_s8 }
0x2b21   :  { %v3791_v5 = vpop.permute.xlu1 %3790 }
0x2b22   :  { %v3793_v52 = vmul.f32 %v5227_v21, %v3791_v5 }
0x2b24   :  { %3795 = vrot.lane.b32.xlu1 %v3793_v52, %s5386_s8 }
0x2b90   :  { %v3769_v22 = vpop.permute.xlu0 %3768 }
0x2b91   :  { %v3771_v58 = vadd.f32 %v3769_v22, %v3761_v51 }
0x2b93   :  { %5228 = vtanh.f32 %v3771_v58 }
0x2b96   :  { %v3796_v59 = vpop.permute.xlu1 %3795 }
0x2b97   :  { %v3798_v49 = vadd.f32 %v3796_v59, %v3788_v26 }
0x2b99   :  { %5230 = vtanh.f32 %v3798_v49 }
0x2b9d   :  { %v5229_v60 = vpop.eup %5228 }
0x2b9e   :  { %3774 = vrot.lane.b32.xlu0 %v5229_v60, %s5385_s4 }
0x2ba3   :  { %v5231_v46 = vpop.eup %5230 }
0x2ba4   :  { %3801 = vrot.lane.b32.xlu1 %v5231_v46, %s5385_s4 }
0x2c10   :  { %v3775_v37 = vpop.permute.xlu0 %3774 }
0x2c11   :  { %v3777_v20 = vmul.f32 %v5225_v17, %v3775_v37 }
0x2c13   :  { %v3806_v44 = vrot.slane %v3777_v20, 6 }
0x2c15   :  { %v3808_v40 = vmax.f32 %v6244_v23, %v3806_v44  ;;  %v3992_v23 = vld [vmem:[%s6341_s11 + $0x8] sm:$0xff] }
0x2c16   :  { %v3802_v41 = vpop.permute.xlu1 %3801  ;;  %v4956_v36 = vpack.c.bf16 %v3992_v23, %v3991_v38 }
0x2c17   :  { %v3833_v25 = vmax.f32 %v3808_v40, 0.0  ;;  %v3804_v56 = vmul.f32 %v5227_v21, %v3802_v41 }
0x2c19   :  { %v3810_v27 = vrot.slane %v3804_v56, 2  ;;  %3844 = vrot.lane.b32.xlu0 %v3833_v25, %s5386_s8 }
0x2c1b   :  { %v3812_v24 = vmax.f32 %v6248_v29, %v3810_v27  ;;  %v3994_v29 = vld [vmem:[%s6341_s11 + $0x18] sm:$0xff] }
0x2c1c   :  { %v4959_v32 = vpack.c.bf16 %v3994_v29, %v3993_v57 }
0x2c1d   :  { %v3834_v30 = vmax.f32 %v3812_v24, 0.0 }
0x2c1f   :  { %v3996_v2 = vrot.slane %v3834_v30, 6 }
0x2c21   :  { %3997 = vrot.lane.b32.xlu1 %v3996_v2, %s5386_s8 }
0x2c8b   :  { %v3845_v33 = vpop.permute.xlu0 %3844 }
0x2c8c   :  { %4703 = vmatmul.mubr.msk.f32.vlgmr.msra.gmra.mrb[34].mxu1 %vm133_vm1, %v3845_v33 }
0x2c8d   :  { %4957 = vmatpush3.bf16.msra.mxu1 %v4956_v36  ;;  %4724 = vmatprep.mubr.msk.f32.mxu1 %vm5384_vm0, %v5383_v1 }
0x2c8e   :  { %4958 = vmatprep.subr.bf16.mxu1 %v5382_v0 }
0x2c91   :  { %4960 = vmatpush3.bf16.msra.mxu1 %v4959_v32 }
0x2c93   :  { %v3998_v34 = vpop.permute.xlu1 %3997 }
0x2c94   :  { %4725 = vmatmul.mubr.msk.f32.vlgmr.msra.gmra.mrb[36].mxu1 %vm133_vm1, %v3998_v34 }
0x2d5f   :  { %v3914_v28 = vpop.f32.mrb[34].mxu1 }
0x2d60   :  { %v3988_v42 = vadd.f32 %v3987_v35, %v3914_v28  ;;  %v4704_v45 = vpop.f32.mrb[35].mxu1 }
0x2d67   :  { %v4067_v48 = vpop.f32.mrb[36].mxu1 }
0x2d68   :  { %v4071_v47 = vadd.f32 %v4067_v48, %v3988_v42  ;;  %v4726_v1 = vpop.f32.mrb[37].mxu1 }
0x2d6a   :  { %v4079_v0 = vadd.f32 %v4166_v50, %v4071_v47 }
0x2d6c   :  { %4081 = vst.msk [vmem:[#allocation12] sm:$0x3] %vm4080_vm11, %v4079_v0 }
0x2d6d   :  { %5354 = shalt.err (!%p5351_p2)
}
0x2d6e   :  { %s5355_s30 = scalar_lea.hbm %s6343_s13, 32 }
0x2d6f   :  { %p5356_p3 = scmp.ne.s32.totalorder %s6343_s13, %s5355_s30  ;;  %p5359_p4 = scmp.lt.u32.totalorder %s5355_s30, %s6343_s13 }
0x2d71   :  { %p5361_p5 = pnand %p5359_p4, %p5356_p3 }
0x2d73   :  { %5364 = shalt.err (!%p5361_p5)
}
0x2d74   :  { %4091 = dma.vmem_to_hbm [thread:$0]  %s4089_s18, 32, %s6343_s13, [#allocation5]  }
0x2d75   :  { %5371 = dma.done.wait [#allocation5], 32  }
0x2d76   :  { %5372 = vsyncadd [#allocation5], 4294967264 }
0x2d77   :  { %4095 = vsyncpa [#allocation4], 1 }
0x2d78   :  { %4096 = vsyncpa [#allocation7], 1 }
0x2d79   :  { %4097 = vsyncpa [#allocation10], 1 }
0x2d7a   :  { %4098 = vsyncpa [#allocation5], 1 }

</bundles_post_ra>
